<compile_context>
chip_gen: v6e
topology: v6e:2x2x1
jax: 0.10.0
libtpu: 0.0.40
codegen_flags: <defaults>
</compile_context>

<pallas_src>
import functools
from dataclasses import dataclass

import jax
import jax.numpy as jnp
from jax.experimental import pallas as pl
from jax.experimental.pallas import tpu as pltpu

_DOT_DT = jnp.bfloat16  # MXU operand dtype; accumulation stays f32.


# -----------------------------------------------------------------------------
# Config (stands in for the `C` config object in the PyTorch code)
# -----------------------------------------------------------------------------
@dataclass
class ARCConfig:
    hidden_size: int = 32
    num_attention_heads: int = 2
    qk_nope_head_dim: int = 8
    qk_rope_head_dim: int = 8
    v_head_dim: int = 8
    q_lora_rank: int = 16
    kv_lora_rank: int = 16
    rms_norm_eps: float = 1e-6
    attention_bias: bool = False
    attention_dropout: float = 0.0          # eval mode: dropout is a no-op
    num_self_pattern_modules: int = 1
    num_cross_pattern_modules: int = 0      # no context_states -> cross path inactive
    pattern_heads: int = 2
    num_attention_cycles: int = 2
    max_position_embeddings: int = 64
    rope_theta: float = 10000.0


# -----------------------------------------------------------------------------
# The single fused kernel: one grid step per batch, whole forward in-body.
# -----------------------------------------------------------------------------
def _arc_fused_kernel(*refs, nH, dn, dr, dv, kv_rank, pattern_heads,
                      n_self, n_cycles, eps, scale):
    (hs_ref, cos_ref, sin_ref,
     qa_w_ref, qa_ln_ref, qb_w_ref,
     kva_w_ref, kva_ln_ref, kvb_w_ref, o_w_ref,
     gate_wt_ref, gate_b_ref) = refs[:12]
    mpa_refs = refs[12:12 + 3 * n_self]
    cyc_ln_ref = refs[12 + 3 * n_self]
    out_ref = refs[13 + 3 * n_self]

    f32 = jnp.float32
    x0 = hs_ref[0].astype(f32)              # [S, H]  original hidden (kv source)
    cos = cos_ref[...].astype(f32)          # [S, dr]
    sin_signed = sin_ref[...].astype(f32)   # [S, dr] rotate-half sign folded in
    dq = dn + dr
    half = dr // 2
    S, H = x0.shape

    def rmsnorm(x, gamma):                  # gamma: (1, D)
        var = jnp.mean(x * x, axis=-1, keepdims=True)
        return x * jax.lax.rsqrt(var + eps) * gamma

    def rope(x):                            # x: [S, dr] f32
        rot = jnp.concatenate([x[:, half:], x[:, :half]], axis=-1)
        return x * cos + rot * sin_signed

    def dot_bf(a, b):
        return jnp.dot(a.astype(_DOT_DT), b.astype(_DOT_DT),
                       preferred_element_type=f32)

    def attend(q, k_bf, v_bf):              # [S,dk] f32, [S,dk] bf16, [S,dv] bf16
        s = jax.lax.dot_general(q.astype(_DOT_DT), k_bf,
                                dimension_numbers=(((1,), (1,)), ((), ())),
                                preferred_element_type=f32)          # [S, S]
        s = s - jnp.max(s, axis=-1, keepdims=True)
        e = jnp.exp(s)
        p = e / jnp.sum(e, axis=-1, keepdims=True)
        return jnp.dot(p.astype(_DOT_DT), v_bf, preferred_element_type=f32)

    # ---- KV path: depends only on the ORIGINAL hidden_states -> once per fwd ----
    x0_bf = x0.astype(_DOT_DT)
    kv_lora = jnp.dot(x0_bf, kva_w_ref[:, :kv_rank].astype(_DOT_DT),
                      preferred_element_type=f32)
    kv_norm_bf = rmsnorm(kv_lora, kva_ln_ref[...].astype(f32)).astype(_DOT_DT)
    k_heads_bf, v_heads_bf = [], []
    for h in range(nH):                     # static unroll; weight-ref column views
        base = h * (dn + dv)
        k_nope_h = jnp.dot(kv_norm_bf, kvb_w_ref[:, base:base + dn].astype(_DOT_DT),
                           preferred_element_type=f32)
        v_h = jnp.dot(kv_norm_bf,
                      kvb_w_ref[:, base + dn:base + dn + dv].astype(_DOT_DT),
                      preferred_element_type=f32)
        kpe_h = jnp.dot(
            x0_bf,
            kva_w_ref[:, kv_rank + h * dr:kv_rank + (h + 1) * dr].astype(_DOT_DT),
            preferred_element_type=f32)
        k_h = jnp.concatenate([k_nope_h, rope(kpe_h)], axis=-1)     # RoPE on K once
        k_heads_bf.append(k_h.astype(_DOT_DT))
        v_heads_bf.append(v_h.astype(_DOT_DT))

    n_paths = 1 + n_self
    gate_b = gate_b_ref[...].astype(f32)                            # [1, P]
    gate_rows = [gate_wt_ref[p:p + 1, :].astype(f32) for p in range(n_paths)]

    cur = x0
    for cycle in range(n_cycles):           # static unroll over cycles
        if cycle > 0:
            cur = rmsnorm(cur, cyc_ln_ref[cycle - 1:cycle, :].astype(f32))
        cur_bf = cur.astype(_DOT_DT)

        # ---- main MLA attention: q path + per-head attention + o_proj --------
        q_mid = jnp.dot(cur_bf, qa_w_ref[...].astype(_DOT_DT),
                        preferred_element_type=f32)
        q_norm_bf = rmsnorm(q_mid, qa_ln_ref[...].astype(f32)).astype(_DOT_DT)
        ctx_heads = []
        for h in range(nH):
            base = h * dq
            q_nope_h = jnp.dot(q_norm_bf, qb_w_ref[:, base:base + dn].astype(_DOT_DT),
                               preferred_element_type=f32)
            q_pe_h = jnp.dot(q_norm_bf,
                             qb_w_ref[:, base + dn:base + dq].astype(_DOT_DT),
                             preferred_element_type=f32)
            # fold softmax scale into q (S*dq elems instead of S*S scores)
            q_h = jnp.concatenate([q_nope_h, rope(q_pe_h)], axis=-1) * scale
            ctx_heads.append(attend(q_h, k_heads_bf[h], v_heads_bf[h]))
        ctx = jnp.concatenate(ctx_heads, axis=-1)                    # [S, nH*dv]
        attn_main = dot_bf(ctx, o_w_ref[...])                        # [S, H]
        path_outs = [attn_main]

        # ---- self-pattern attention modules (standard MHA, fully fused) ------
        hd = H // pattern_heads
        p_scale = float(hd) ** -0.5
        for m in range(n_self):
            qkv_w_ref, pout_w_ref, pout_b_ref = mpa_refs[3 * m:3 * m + 3]
            p_ctx = []
            for h in range(pattern_heads):
                q_h = jnp.dot(cur_bf,
                              qkv_w_ref[:, h * hd:(h + 1) * hd].astype(_DOT_DT),
                              preferred_element_type=f32) * p_scale
                k_h = jnp.dot(cur_bf,
                              qkv_w_ref[:, H + h * hd:H + (h + 1) * hd].astype(_DOT_DT),
                              preferred_element_type=f32)
                v_h = jnp.dot(cur_bf,
                              qkv_w_ref[:, 2 * H + h * hd:2 * H + (h + 1) * hd]
                              .astype(_DOT_DT),
                              preferred_element_type=f32)
                p_ctx.append(attend(q_h, k_h.astype(_DOT_DT), v_h.astype(_DOT_DT)))
            p_ctx_flat = jnp.concatenate(p_ctx, axis=-1)             # [S, H]
            p_out = dot_bf(p_ctx_flat, pout_w_ref[...]) + pout_b_ref[...].astype(f32)
            path_outs.append(p_out)

        # ---- gate (VPU logits) + softmax + weighted combine + residual -------
        logits = [jnp.sum(cur * gate_rows[p], axis=-1, keepdims=True)
                  + gate_b[:, p:p + 1] for p in range(n_paths)]
        m_l = logits[0]
        for p in range(1, n_paths):
            m_l = jnp.maximum(m_l, logits[p])
        exps = [jnp.exp(l - m_l) for l in logits]
        denom = exps[0]
        for p in range(1, n_paths):
            denom = denom + exps[p]
        inv_denom = 1.0 / denom
        nxt = cur
        for p in range(n_paths):
            nxt = nxt + path_outs[p] * (exps[p] * inv_denom)
        cur = nxt

    out_ref[0] = cur.astype(out_ref.dtype)


# -----------------------------------------------------------------------------
# RoPE tables (plain JAX glue; the rotation itself is applied in-kernel)
# -----------------------------------------------------------------------------
def rotary_cos_sin(dim, seq_len, theta):
    inv_freq = 1.0 / (theta ** (jnp.arange(0, dim, 2, dtype=jnp.float32) / dim))
    t = jnp.arange(seq_len, dtype=jnp.float32)
    freqs = jnp.outer(t, inv_freq)                     # [S, dim/2]
    emb = jnp.concatenate([freqs, freqs], axis=-1)     # [S, dim]
    return jnp.cos(emb), jnp.sin(emb)


# -----------------------------------------------------------------------------
# Parameter init (deterministic, synthetic; weights stored [in, out])
# -----------------------------------------------------------------------------
def init_params(key, cfg: ARCConfig):
    nH = cfg.num_attention_heads
    dq = cfg.qk_nope_head_dim + cfg.qk_rope_head_dim
    keys = iter(jax.random.split(key, 32))

    def lin_w(in_d, out_d):
        return jax.random.normal(next(keys), (in_d, out_d), jnp.float32) * 0.02

    params = {
        "q_a_w": lin_w(cfg.hidden_size, cfg.q_lora_rank),
        "q_a_ln": jnp.ones((cfg.q_lora_rank,), jnp.float32),
        "q_b_w": lin_w(cfg.q_lora_rank, nH * dq),
        "kv_a_w": lin_w(cfg.hidden_size, cfg.kv_lora_rank + nH * cfg.qk_rope_head_dim),
        "kv_a_ln": jnp.ones((cfg.kv_lora_rank,), jnp.float32),
        "kv_b_w": lin_w(cfg.kv_lora_rank, nH * (cfg.qk_nope_head_dim + cfg.v_head_dim)),
        "o_w": lin_w(nH * cfg.v_head_dim, cfg.hidden_size),
    }
    gate_paths = 1 + cfg.num_self_pattern_modules + (
        cfg.num_cross_pattern_modules if cfg.num_cross_pattern_modules > 0 else 0)
    params["gate_w"] = lin_w(cfg.hidden_size, gate_paths)
    params["gate_b"] = jnp.zeros((gate_paths,), jnp.float32)

    params["self_mpa"] = [{
        "qkv_w": lin_w(cfg.hidden_size, 3 * cfg.hidden_size),
        "out_w": lin_w(cfg.hidden_size, cfg.hidden_size),
        "out_b": jnp.zeros((cfg.hidden_size,), jnp.float32),
    } for _ in range(cfg.num_self_pattern_modules)]

    params["cycle_ln"] = [jnp.ones((cfg.hidden_size,), jnp.float32)
                          for _ in range(max(cfg.num_attention_cycles - 1, 0))]
    return params


# -----------------------------------------------------------------------------
# Forward: ONE pallas_call for the whole multi-cycle attention block
# -----------------------------------------------------------------------------
def arc_attention_forward(params, cfg: ARCConfig, hidden_states):
    B, S, H = hidden_states.shape
    nH = cfg.num_attention_heads
    dn, dr, dv = cfg.qk_nope_head_dim, cfg.qk_rope_head_dim, cfg.v_head_dim
    dq = dn + dr
    kv_rank = cfg.kv_lora_rank
    q_rank = cfg.q_lora_rank
    n_self = cfg.num_self_pattern_modules
    n_cycles = cfg.num_attention_cycles
    n_paths = 1 + n_self
    eps = cfg.rms_norm_eps
    scale = dq ** (-0.5)

    cos, sin = rotary_cos_sin(dr, S, cfg.rope_theta)
    sign = jnp.concatenate([-jnp.ones((dr // 2,), jnp.float32),
                            jnp.ones((dr // 2,), jnp.float32)])
    sin_signed = sin * sign                            # fold rotate-half sign into sin

    cyc_ln = (jnp.stack(params["cycle_ln"], axis=0) if n_cycles > 1
              else jnp.ones((1, H), jnp.float32))      # unused dummy if single cycle

    arrays = [hidden_states, cos, sin_signed,
              params["q_a_w"], params["q_a_ln"].reshape(1, q_rank), params["q_b_w"],
              params["kv_a_w"], params["kv_a_ln"].reshape(1, kv_rank),
              params["kv_b_w"], params["o_w"],
              params["gate_w"].T,                       # (P, H): rows are free views
              params["gate_b"].reshape(1, n_paths)]
    for pp in params["self_mpa"]:
        arrays += [pp["qkv_w"], pp["out_w"], pp["out_b"].reshape(1, H)]
    arrays.append(cyc_ln)

    def whole(a):                                       # weight resident across grid
        return pl.BlockSpec(a.shape, lambda b, _nd=a.ndim: (0,) * _nd)

    in_specs = ([pl.BlockSpec((1, S, H), lambda b: (b, 0, 0))]
                + [whole(a) for a in arrays[1:]])

    kernel = functools.partial(
        _arc_fused_kernel, nH=nH, dn=dn, dr=dr, dv=dv, kv_rank=kv_rank,
        pattern_heads=cfg.pattern_heads, n_self=n_self, n_cycles=n_cycles,
        eps=eps, scale=scale)

    out = pl.pallas_call(
        kernel,
        out_shape=jax.ShapeDtypeStruct((B, S, H), hidden_states.dtype),
        grid=(B,),
        in_specs=in_specs,
        out_specs=pl.BlockSpec((1, S, H), lambda b: (b, 0, 0)),
        compiler_params=pltpu.CompilerParams(dimension_semantics=("parallel",)),
    )(*arrays)
    return out


# -----------------------------------------------------------------------------
if __name__ == "__main__":
    cfg = ARCConfig()
    key = jax.random.PRNGKey(0)
    pkey, xkey = jax.random.split(key)
    params = init_params(pkey, cfg)

    B, S = 2, 8
    hidden_states = jax.random.normal(xkey, (B, S, cfg.hidden_size), jnp.float32)

    @jax.jit
    def fwd(p, x):
        return arc_attention_forward(p, cfg, x)

    out = jax.block_until_ready(fwd(params, hidden_states))
    assert out.shape == (B, S, cfg.hidden_size)
    assert bool(jnp.all(jnp.isfinite(out)))
    print("KERNEL_OK")
</pallas_src>

<mosaic_0001>
module attributes {stable_mosaic.version = 11 : i64} {
  func.func @_arc_fused_kernel(%arg0: i32, %arg1: memref<1x8x32xf32, #tpu.memory_space<vmem>>, %arg2: memref<8x8xf32, #tpu.memory_space<vmem>>, %arg3: memref<8x8xf32, #tpu.memory_space<vmem>>, %arg4: memref<32x16xf32, #tpu.memory_space<vmem>>, %arg5: memref<1x16xf32, #tpu.memory_space<vmem>>, %arg6: memref<16x32xf32, #tpu.memory_space<vmem>>, %arg7: memref<32x32xf32, #tpu.memory_space<vmem>>, %arg8: memref<1x16xf32, #tpu.memory_space<vmem>>, %arg9: memref<16x32xf32, #tpu.memory_space<vmem>>, %arg10: memref<16x32xf32, #tpu.memory_space<vmem>>, %arg11: memref<2x32xf32, #tpu.memory_space<vmem>>, %arg12: memref<1x2xf32, #tpu.memory_space<vmem>>, %arg13: memref<32x96xf32, #tpu.memory_space<vmem>>, %arg14: memref<32x32xf32, #tpu.memory_space<vmem>>, %arg15: memref<1x32xf32, #tpu.memory_space<vmem>>, %arg16: memref<1x32xf32, #tpu.memory_space<vmem>>, %arg17: memref<1x8x32xf32, #tpu.memory_space<vmem>>) attributes {dimension_semantics = [#tpu.dimension_semantics<parallel>], iteration_bounds = array<i64: 2>, scalar_prefetch = 0 : i64, scratch_operands = 0 : i64, tpu.core_type = #tpu.core_type<tc>, window_params = [{transform_indices = @transform_0, window_bounds = array<i64: 1, 8, 32>}, {pipeline_mode = #tpu.pipeline_mode<synchronous>, transform_indices = @transform_1, window_bounds = array<i64: 8, 8>}, {pipeline_mode = #tpu.pipeline_mode<synchronous>, transform_indices = @transform_2, window_bounds = array<i64: 8, 8>}, {pipeline_mode = #tpu.pipeline_mode<synchronous>, transform_indices = @transform_3, window_bounds = array<i64: 32, 16>}, {pipeline_mode = #tpu.pipeline_mode<synchronous>, transform_indices = @transform_4, window_bounds = array<i64: 1, 16>}, {pipeline_mode = #tpu.pipeline_mode<synchronous>, transform_indices = @transform_5, window_bounds = array<i64: 16, 32>}, {pipeline_mode = #tpu.pipeline_mode<synchronous>, transform_indices = @transform_6, window_bounds = array<i64: 32, 32>}, {pipeline_mode = #tpu.pipeline_mode<synchronous>, transform_indices = @transform_7, window_bounds = array<i64: 1, 16>}, {pipeline_mode = #tpu.pipeline_mode<synchronous>, transform_indices = @transform_8, window_bounds = array<i64: 16, 32>}, {pipeline_mode = #tpu.pipeline_mode<synchronous>, transform_indices = @transform_9, window_bounds = array<i64: 16, 32>}, {pipeline_mode = #tpu.pipeline_mode<synchronous>, transform_indices = @transform_10, window_bounds = array<i64: 2, 32>}, {pipeline_mode = #tpu.pipeline_mode<synchronous>, transform_indices = @transform_11, window_bounds = array<i64: 1, 2>}, {pipeline_mode = #tpu.pipeline_mode<synchronous>, transform_indices = @transform_12, window_bounds = array<i64: 32, 96>}, {pipeline_mode = #tpu.pipeline_mode<synchronous>, transform_indices = @transform_13, window_bounds = array<i64: 32, 32>}, {pipeline_mode = #tpu.pipeline_mode<synchronous>, transform_indices = @transform_14, window_bounds = array<i64: 1, 32>}, {pipeline_mode = #tpu.pipeline_mode<synchronous>, transform_indices = @transform_15, window_bounds = array<i64: 1, 32>}, {transform_indices = @transform_16, window_bounds = array<i64: 1, 8, 32>}]} {
    %c0 = arith.constant 0 : index
    %c0_0 = arith.constant 0 : index
    %c0_1 = arith.constant 0 : index
    %0 = vector.load %arg1[%c0, %c0_0, %c0_1] : memref<1x8x32xf32, #tpu.memory_space<vmem>>, vector<1x8x32xf32>
    %1 = vector.shape_cast %0 : vector<1x8x32xf32> to vector<8x32xf32>
    %c0_2 = arith.constant 0 : index
    %c0_3 = arith.constant 0 : index
    %2 = vector.load %arg2[%c0_2, %c0_3] : memref<8x8xf32, #tpu.memory_space<vmem>>, vector<8x8xf32>
    %c0_4 = arith.constant 0 : index
    %c0_5 = arith.constant 0 : index
    %3 = vector.load %arg3[%c0_4, %c0_5] : memref<8x8xf32, #tpu.memory_space<vmem>>, vector<8x8xf32>
    %4 = arith.truncf %1 : vector<8x32xf32> to vector<8x32xbf16>
    %c0_6 = arith.constant 0 : index
    %c0_7 = arith.constant 0 : index
    %5 = vector.load %arg7[%c0_6, %c0_7] : memref<32x32xf32, #tpu.memory_space<vmem>>, vector<32x16xf32>
    %6 = arith.truncf %5 : vector<32x16xf32> to vector<32x16xbf16>
    %cst = arith.constant dense<0.000000e+00> : vector<8x16xf32>
    %7 = tpu.matmul %4, %6, %cst {dimension_numbers = #tpu.dot_dimension_numbers<[1], [0], [0], [1], [0, 0, 1, 1], [], []>} : vector<8x32xbf16>, vector<32x16xbf16>, vector<8x16xf32> -> vector<8x16xf32>
    %c0_8 = arith.constant 0 : index
    %c0_9 = arith.constant 0 : index
    %8 = vector.load %arg8[%c0_8, %c0_9] : memref<1x16xf32, #tpu.memory_space<vmem>>, vector<1x16xf32>
    %9 = arith.mulf %7, %7 : vector<8x16xf32>
    %cst_10 = arith.constant dense<0.000000e+00> : vector<8xf32>
    %10 = vector.multi_reduction <add>, %9, %cst_10 [1] : vector<8x16xf32> to vector<8xf32>
    %11 = vector.shape_cast %10 : vector<8xf32> to vector<8x1xf32>
    %cst_11 = arith.constant 1.600000e+01 : f32
    %12 = vector.broadcast %cst_11 : f32 to vector<8x1xf32>
    %13 = arith.divf %11, %12 : vector<8x1xf32>
    %cst_12 = arith.constant 9.99999997E-7 : f32
    %14 = vector.broadcast %cst_12 : f32 to vector<8x1xf32>
    %15 = arith.addf %13, %14 : vector<8x1xf32>
    %16 = math.rsqrt %15 : vector<8x1xf32>
    %17 = vector.broadcast %16 : vector<8x1xf32> to vector<8x16xf32>
    %18 = arith.mulf %7, %17 : vector<8x16xf32>
    %19 = vector.broadcast %8 : vector<1x16xf32> to vector<8x16xf32>
    %20 = arith.mulf %18, %19 : vector<8x16xf32>
    %21 = arith.truncf %20 : vector<8x16xf32> to vector<8x16xbf16>
    %c0_13 = arith.constant 0 : index
    %c0_14 = arith.constant 0 : index
    %22 = vector.load %arg9[%c0_13, %c0_14] : memref<16x32xf32, #tpu.memory_space<vmem>>, vector<16x8xf32>
    %23 = arith.truncf %22 : vector<16x8xf32> to vector<16x8xbf16>
    %cst_15 = arith.constant dense<0.000000e+00> : vector<8x8xf32>
    %24 = tpu.matmul %21, %23, %cst_15 {dimension_numbers = #tpu.dot_dimension_numbers<[1], [0], [0], [1], [0, 0, 1, 1], [], []>} : vector<8x16xbf16>, vector<16x8xbf16>, vector<8x8xf32> -> vector<8x8xf32>
    %c0_16 = arith.constant 0 : index
    %c8 = arith.constant 8 : index
    %25 = vector.load %arg9[%c0_16, %c8] : memref<16x32xf32, #tpu.memory_space<vmem>>, vector<16x8xf32>
    %26 = arith.truncf %25 : vector<16x8xf32> to vector<16x8xbf16>
    %cst_17 = arith.constant dense<0.000000e+00> : vector<8x8xf32>
    %27 = tpu.matmul %21, %26, %cst_17 {dimension_numbers = #tpu.dot_dimension_numbers<[1], [0], [0], [1], [0, 0, 1, 1], [], []>} : vector<8x16xbf16>, vector<16x8xbf16>, vector<8x8xf32> -> vector<8x8xf32>
    %c0_18 = arith.constant 0 : index
    %c16 = arith.constant 16 : index
    %28 = vector.load %arg7[%c0_18, %c16] : memref<32x32xf32, #tpu.memory_space<vmem>>, vector<32x8xf32>
    %29 = arith.truncf %28 : vector<32x8xf32> to vector<32x8xbf16>
    %cst_19 = arith.constant dense<0.000000e+00> : vector<8x8xf32>
    %30 = tpu.matmul %4, %29, %cst_19 {dimension_numbers = #tpu.dot_dimension_numbers<[1], [0], [0], [1], [0, 0, 1, 1], [], []>} : vector<8x32xbf16>, vector<32x8xbf16>, vector<8x8xf32> -> vector<8x8xf32>
    %31 = vector.extract_strided_slice %30 {offsets = [0, 4], sizes = [8, 4], strides = [1, 1]} : vector<8x8xf32> to vector<8x4xf32>
    %32 = vector.extract_strided_slice %30 {offsets = [0, 0], sizes = [8, 4], strides = [1, 1]} : vector<8x8xf32> to vector<8x4xf32>
    %33 = tpu.concatenate %31, %32 in 1 : vector<8x4xf32>, vector<8x4xf32> -> vector<8x8xf32>
    %34 = arith.mulf %30, %2 : vector<8x8xf32>
    %35 = arith.mulf %33, %3 : vector<8x8xf32>
    %36 = arith.addf %34, %35 : vector<8x8xf32>
    %37 = tpu.concatenate %24, %36 in 1 : vector<8x8xf32>, vector<8x8xf32> -> vector<8x16xf32>
    %38 = arith.truncf %37 : vector<8x16xf32> to vector<8x16xbf16>
    %39 = arith.truncf %27 : vector<8x8xf32> to vector<8x8xbf16>
    %c0_20 = arith.constant 0 : index
    %c16_21 = arith.constant 16 : index
    %40 = vector.load %arg9[%c0_20, %c16_21] : memref<16x32xf32, #tpu.memory_space<vmem>>, vector<16x8xf32>
    %41 = arith.truncf %40 : vector<16x8xf32> to vector<16x8xbf16>
    %cst_22 = arith.constant dense<0.000000e+00> : vector<8x8xf32>
    %42 = tpu.matmul %21, %41, %cst_22 {dimension_numbers = #tpu.dot_dimension_numbers<[1], [0], [0], [1], [0, 0, 1, 1], [], []>} : vector<8x16xbf16>, vector<16x8xbf16>, vector<8x8xf32> -> vector<8x8xf32>
    %c0_23 = arith.constant 0 : index
    %c24 = arith.constant 24 : index
    %43 = vector.load %arg9[%c0_23, %c24] : memref<16x32xf32, #tpu.memory_space<vmem>>, vector<16x8xf32>
    %44 = arith.truncf %43 : vector<16x8xf32> to vector<16x8xbf16>
    %cst_24 = arith.constant dense<0.000000e+00> : vector<8x8xf32>
    %45 = tpu.matmul %21, %44, %cst_24 {dimension_numbers = #tpu.dot_dimension_numbers<[1], [0], [0], [1], [0, 0, 1, 1], [], []>} : vector<8x16xbf16>, vector<16x8xbf16>, vector<8x8xf32> -> vector<8x8xf32>
    %c0_25 = arith.constant 0 : index
    %c24_26 = arith.constant 24 : index
    %46 = vector.load %arg7[%c0_25, %c24_26] : memref<32x32xf32, #tpu.memory_space<vmem>>, vector<32x8xf32>
    %47 = arith.truncf %46 : vector<32x8xf32> to vector<32x8xbf16>
    %cst_27 = arith.constant dense<0.000000e+00> : vector<8x8xf32>
    %48 = tpu.matmul %4, %47, %cst_27 {dimension_numbers = #tpu.dot_dimension_numbers<[1], [0], [0], [1], [0, 0, 1, 1], [], []>} : vector<8x32xbf16>, vector<32x8xbf16>, vector<8x8xf32> -> vector<8x8xf32>
    %49 = vector.extract_strided_slice %48 {offsets = [0, 4], sizes = [8, 4], strides = [1, 1]} : vector<8x8xf32> to vector<8x4xf32>
    %50 = vector.extract_strided_slice %48 {offsets = [0, 0], sizes = [8, 4], strides = [1, 1]} : vector<8x8xf32> to vector<8x4xf32>
    %51 = tpu.concatenate %49, %50 in 1 : vector<8x4xf32>, vector<8x4xf32> -> vector<8x8xf32>
    %52 = arith.mulf %48, %2 : vector<8x8xf32>
    %53 = arith.mulf %51, %3 : vector<8x8xf32>
    %54 = arith.addf %52, %53 : vector<8x8xf32>
    %55 = tpu.concatenate %42, %54 in 1 : vector<8x8xf32>, vector<8x8xf32> -> vector<8x16xf32>
    %56 = arith.truncf %55 : vector<8x16xf32> to vector<8x16xbf16>
    %57 = arith.truncf %45 : vector<8x8xf32> to vector<8x8xbf16>
    %c0_28 = arith.constant 0 : index
    %c0_29 = arith.constant 0 : index
    %58 = vector.load %arg12[%c0_28, %c0_29] : memref<1x2xf32, #tpu.memory_space<vmem>>, vector<1x2xf32>
    %c0_30 = arith.constant 0 : index
    %c0_31 = arith.constant 0 : index
    %59 = vector.load %arg11[%c0_30, %c0_31] : memref<2x32xf32, #tpu.memory_space<vmem>>, vector<1x32xf32>
    %c1 = arith.constant 1 : index
    %c0_32 = arith.constant 0 : index
    %60 = vector.load %arg11[%c1, %c0_32] : memref<2x32xf32, #tpu.memory_space<vmem>>, vector<1x32xf32>
    %61 = arith.truncf %1 : vector<8x32xf32> to vector<8x32xbf16>
    %c0_33 = arith.constant 0 : index
    %c0_34 = arith.constant 0 : index
    %62 = vector.load %arg4[%c0_33, %c0_34] : memref<32x16xf32, #tpu.memory_space<vmem>>, vector<32x16xf32>
    %63 = arith.truncf %62 : vector<32x16xf32> to vector<32x16xbf16>
    %cst_35 = arith.constant dense<0.000000e+00> : vector<8x16xf32>
    %64 = tpu.matmul %61, %63, %cst_35 {dimension_numbers = #tpu.dot_dimension_numbers<[1], [0], [0], [1], [0, 0, 1, 1], [], []>} : vector<8x32xbf16>, vector<32x16xbf16>, vector<8x16xf32> -> vector<8x16xf32>
    %c0_36 = arith.constant 0 : index
    %c0_37 = arith.constant 0 : index
    %65 = vector.load %arg5[%c0_36, %c0_37] : memref<1x16xf32, #tpu.memory_space<vmem>>, vector<1x16xf32>
    %66 = arith.mulf %64, %64 : vector<8x16xf32>
    %cst_38 = arith.constant dense<0.000000e+00> : vector<8xf32>
    %67 = vector.multi_reduction <add>, %66, %cst_38 [1] : vector<8x16xf32> to vector<8xf32>
    %68 = vector.shape_cast %67 : vector<8xf32> to vector<8x1xf32>
    %cst_39 = arith.constant 1.600000e+01 : f32
    %69 = vector.broadcast %cst_39 : f32 to vector<8x1xf32>
    %70 = arith.divf %68, %69 : vector<8x1xf32>
    %cst_40 = arith.constant 9.99999997E-7 : f32
    %71 = vector.broadcast %cst_40 : f32 to vector<8x1xf32>
    %72 = arith.addf %70, %71 : vector<8x1xf32>
    %73 = math.rsqrt %72 : vector<8x1xf32>
    %74 = vector.broadcast %73 : vector<8x1xf32> to vector<8x16xf32>
    %75 = arith.mulf %64, %74 : vector<8x16xf32>
    %76 = vector.broadcast %65 : vector<1x16xf32> to vector<8x16xf32>
    %77 = arith.mulf %75, %76 : vector<8x16xf32>
    %78 = arith.truncf %77 : vector<8x16xf32> to vector<8x16xbf16>
    %c0_41 = arith.constant 0 : index
    %c0_42 = arith.constant 0 : index
    %79 = vector.load %arg6[%c0_41, %c0_42] : memref<16x32xf32, #tpu.memory_space<vmem>>, vector<16x8xf32>
    %80 = arith.truncf %79 : vector<16x8xf32> to vector<16x8xbf16>
    %cst_43 = arith.constant dense<0.000000e+00> : vector<8x8xf32>
    %81 = tpu.matmul %78, %80, %cst_43 {dimension_numbers = #tpu.dot_dimension_numbers<[1], [0], [0], [1], [0, 0, 1, 1], [], []>} : vector<8x16xbf16>, vector<16x8xbf16>, vector<8x8xf32> -> vector<8x8xf32>
    %c0_44 = arith.constant 0 : index
    %c8_45 = arith.constant 8 : index
    %82 = vector.load %arg6[%c0_44, %c8_45] : memref<16x32xf32, #tpu.memory_space<vmem>>, vector<16x8xf32>
    %83 = arith.truncf %82 : vector<16x8xf32> to vector<16x8xbf16>
    %cst_46 = arith.constant dense<0.000000e+00> : vector<8x8xf32>
    %84 = tpu.matmul %78, %83, %cst_46 {dimension_numbers = #tpu.dot_dimension_numbers<[1], [0], [0], [1], [0, 0, 1, 1], [], []>} : vector<8x16xbf16>, vector<16x8xbf16>, vector<8x8xf32> -> vector<8x8xf32>
    %85 = vector.extract_strided_slice %84 {offsets = [0, 4], sizes = [8, 4], strides = [1, 1]} : vector<8x8xf32> to vector<8x4xf32>
    %86 = vector.extract_strided_slice %84 {offsets = [0, 0], sizes = [8, 4], strides = [1, 1]} : vector<8x8xf32> to vector<8x4xf32>
    %87 = tpu.concatenate %85, %86 in 1 : vector<8x4xf32>, vector<8x4xf32> -> vector<8x8xf32>
    %88 = arith.mulf %84, %2 : vector<8x8xf32>
    %89 = arith.mulf %87, %3 : vector<8x8xf32>
    %90 = arith.addf %88, %89 : vector<8x8xf32>
    %91 = tpu.concatenate %81, %90 in 1 : vector<8x8xf32>, vector<8x8xf32> -> vector<8x16xf32>
    %cst_47 = arith.constant 2.500000e-01 : f32
    %92 = vector.broadcast %cst_47 : f32 to vector<8x16xf32>
    %93 = arith.mulf %91, %92 : vector<8x16xf32>
    %94 = arith.truncf %93 : vector<8x16xf32> to vector<8x16xbf16>
    %cst_48 = arith.constant dense<0.000000e+00> : vector<8x8xf32>
    %95 = tpu.matmul %94, %38, %cst_48 {dimension_numbers = #tpu.dot_dimension_numbers<[1], [1], [0], [0], [0, 0, 1, 0], [], []>} : vector<8x16xbf16>, vector<8x16xbf16>, vector<8x8xf32> -> vector<8x8xf32>
    %cst_49 = arith.constant dense<0xFF800000> : vector<8xf32>
    %96 = vector.multi_reduction <maximumf>, %95, %cst_49 [1] : vector<8x8xf32> to vector<8xf32>
    %97 = vector.shape_cast %96 : vector<8xf32> to vector<8x1xf32>
    %98 = vector.broadcast %97 : vector<8x1xf32> to vector<8x8xf32>
    %99 = arith.subf %95, %98 : vector<8x8xf32>
    %100 = math.exp %99 : vector<8x8xf32>
    %cst_50 = arith.constant dense<0.000000e+00> : vector<8xf32>
    %101 = vector.multi_reduction <add>, %100, %cst_50 [1] : vector<8x8xf32> to vector<8xf32>
    %102 = vector.shape_cast %101 : vector<8xf32> to vector<8x1xf32>
    %103 = vector.broadcast %102 : vector<8x1xf32> to vector<8x8xf32>
    %104 = arith.divf %100, %103 : vector<8x8xf32>
    %105 = arith.truncf %104 : vector<8x8xf32> to vector<8x8xbf16>
    %cst_51 = arith.constant dense<0.000000e+00> : vector<8x8xf32>
    %106 = tpu.matmul %105, %39, %cst_51 {dimension_numbers = #tpu.dot_dimension_numbers<[1], [0], [0], [1], [0, 0, 1, 1], [], []>} : vector<8x8xbf16>, vector<8x8xbf16>, vector<8x8xf32> -> vector<8x8xf32>
    %c0_52 = arith.constant 0 : index
    %c16_53 = arith.constant 16 : index
    %107 = vector.load %arg6[%c0_52, %c16_53] : memref<16x32xf32, #tpu.memory_space<vmem>>, vector<16x8xf32>
    %108 = arith.truncf %107 : vector<16x8xf32> to vector<16x8xbf16>
    %cst_54 = arith.constant dense<0.000000e+00> : vector<8x8xf32>
    %109 = tpu.matmul %78, %108, %cst_54 {dimension_numbers = #tpu.dot_dimension_numbers<[1], [0], [0], [1], [0, 0, 1, 1], [], []>} : vector<8x16xbf16>, vector<16x8xbf16>, vector<8x8xf32> -> vector<8x8xf32>
    %c0_55 = arith.constant 0 : index
    %c24_56 = arith.constant 24 : index
    %110 = vector.load %arg6[%c0_55, %c24_56] : memref<16x32xf32, #tpu.memory_space<vmem>>, vector<16x8xf32>
    %111 = arith.truncf %110 : vector<16x8xf32> to vector<16x8xbf16>
    %cst_57 = arith.constant dense<0.000000e+00> : vector<8x8xf32>
    %112 = tpu.matmul %78, %111, %cst_57 {dimension_numbers = #tpu.dot_dimension_numbers<[1], [0], [0], [1], [0, 0, 1, 1], [], []>} : vector<8x16xbf16>, vector<16x8xbf16>, vector<8x8xf32> -> vector<8x8xf32>
    %113 = vector.extract_strided_slice %112 {offsets = [0, 4], sizes = [8, 4], strides = [1, 1]} : vector<8x8xf32> to vector<8x4xf32>
    %114 = vector.extract_strided_slice %112 {offsets = [0, 0], sizes = [8, 4], strides = [1, 1]} : vector<8x8xf32> to vector<8x4xf32>
    %115 = tpu.concatenate %113, %114 in 1 : vector<8x4xf32>, vector<8x4xf32> -> vector<8x8xf32>
    %116 = arith.mulf %112, %2 : vector<8x8xf32>
    %117 = arith.mulf %115, %3 : vector<8x8xf32>
    %118 = arith.addf %116, %117 : vector<8x8xf32>
    %119 = tpu.concatenate %109, %118 in 1 : vector<8x8xf32>, vector<8x8xf32> -> vector<8x16xf32>
    %cst_58 = arith.constant 2.500000e-01 : f32
    %120 = vector.broadcast %cst_58 : f32 to vector<8x16xf32>
    %121 = arith.mulf %119, %120 : vector<8x16xf32>
    %122 = arith.truncf %121 : vector<8x16xf32> to vector<8x16xbf16>
    %cst_59 = arith.constant dense<0.000000e+00> : vector<8x8xf32>
    %123 = tpu.matmul %122, %56, %cst_59 {dimension_numbers = #tpu.dot_dimension_numbers<[1], [1], [0], [0], [0, 0, 1, 0], [], []>} : vector<8x16xbf16>, vector<8x16xbf16>, vector<8x8xf32> -> vector<8x8xf32>
    %cst_60 = arith.constant dense<0xFF800000> : vector<8xf32>
    %124 = vector.multi_reduction <maximumf>, %123, %cst_60 [1] : vector<8x8xf32> to vector<8xf32>
    %125 = vector.shape_cast %124 : vector<8xf32> to vector<8x1xf32>
    %126 = vector.broadcast %125 : vector<8x1xf32> to vector<8x8xf32>
    %127 = arith.subf %123, %126 : vector<8x8xf32>
    %128 = math.exp %127 : vector<8x8xf32>
    %cst_61 = arith.constant dense<0.000000e+00> : vector<8xf32>
    %129 = vector.multi_reduction <add>, %128, %cst_61 [1] : vector<8x8xf32> to vector<8xf32>
    %130 = vector.shape_cast %129 : vector<8xf32> to vector<8x1xf32>
    %131 = vector.broadcast %130 : vector<8x1xf32> to vector<8x8xf32>
    %132 = arith.divf %128, %131 : vector<8x8xf32>
    %133 = arith.truncf %132 : vector<8x8xf32> to vector<8x8xbf16>
    %cst_62 = arith.constant dense<0.000000e+00> : vector<8x8xf32>
    %134 = tpu.matmul %133, %57, %cst_62 {dimension_numbers = #tpu.dot_dimension_numbers<[1], [0], [0], [1], [0, 0, 1, 1], [], []>} : vector<8x8xbf16>, vector<8x8xbf16>, vector<8x8xf32> -> vector<8x8xf32>
    %135 = tpu.concatenate %106, %134 in 1 : vector<8x8xf32>, vector<8x8xf32> -> vector<8x16xf32>
    %c0_63 = arith.constant 0 : index
    %c0_64 = arith.constant 0 : index
    %136 = vector.load %arg10[%c0_63, %c0_64] : memref<16x32xf32, #tpu.memory_space<vmem>>, vector<16x32xf32>
    %137 = arith.truncf %135 : vector<8x16xf32> to vector<8x16xbf16>
    %138 = arith.truncf %136 : vector<16x32xf32> to vector<16x32xbf16>
    %cst_65 = arith.constant dense<0.000000e+00> : vector<8x32xf32>
    %139 = tpu.matmul %137, %138, %cst_65 {dimension_numbers = #tpu.dot_dimension_numbers<[1], [0], [0], [1], [0, 0, 1, 1], [], []>} : vector<8x16xbf16>, vector<16x32xbf16>, vector<8x32xf32> -> vector<8x32xf32>
    %c0_66 = arith.constant 0 : index
    %c0_67 = arith.constant 0 : index
    %140 = vector.load %arg13[%c0_66, %c0_67] : memref<32x96xf32, #tpu.memory_space<vmem>>, vector<32x16xf32>
    %141 = arith.truncf %140 : vector<32x16xf32> to vector<32x16xbf16>
    %cst_68 = arith.constant dense<0.000000e+00> : vector<8x16xf32>
    %142 = tpu.matmul %61, %141, %cst_68 {dimension_numbers = #tpu.dot_dimension_numbers<[1], [0], [0], [1], [0, 0, 1, 1], [], []>} : vector<8x32xbf16>, vector<32x16xbf16>, vector<8x16xf32> -> vector<8x16xf32>
    %cst_69 = arith.constant 2.500000e-01 : f32
    %143 = vector.broadcast %cst_69 : f32 to vector<8x16xf32>
    %144 = arith.mulf %142, %143 : vector<8x16xf32>
    %c0_70 = arith.constant 0 : index
    %c32 = arith.constant 32 : index
    %145 = vector.load %arg13[%c0_70, %c32] : memref<32x96xf32, #tpu.memory_space<vmem>>, vector<32x16xf32>
    %146 = arith.truncf %145 : vector<32x16xf32> to vector<32x16xbf16>
    %cst_71 = arith.constant dense<0.000000e+00> : vector<8x16xf32>
    %147 = tpu.matmul %61, %146, %cst_71 {dimension_numbers = #tpu.dot_dimension_numbers<[1], [0], [0], [1], [0, 0, 1, 1], [], []>} : vector<8x32xbf16>, vector<32x16xbf16>, vector<8x16xf32> -> vector<8x16xf32>
    %c0_72 = arith.constant 0 : index
    %c64 = arith.constant 64 : index
    %148 = vector.load %arg13[%c0_72, %c64] : memref<32x96xf32, #tpu.memory_space<vmem>>, vector<32x16xf32>
    %149 = arith.truncf %148 : vector<32x16xf32> to vector<32x16xbf16>
    %cst_73 = arith.constant dense<0.000000e+00> : vector<8x16xf32>
    %150 = tpu.matmul %61, %149, %cst_73 {dimension_numbers = #tpu.dot_dimension_numbers<[1], [0], [0], [1], [0, 0, 1, 1], [], []>} : vector<8x32xbf16>, vector<32x16xbf16>, vector<8x16xf32> -> vector<8x16xf32>
    %151 = arith.truncf %147 : vector<8x16xf32> to vector<8x16xbf16>
    %152 = arith.truncf %150 : vector<8x16xf32> to vector<8x16xbf16>
    %153 = arith.truncf %144 : vector<8x16xf32> to vector<8x16xbf16>
    %cst_74 = arith.constant dense<0.000000e+00> : vector<8x8xf32>
    %154 = tpu.matmul %153, %151, %cst_74 {dimension_numbers = #tpu.dot_dimension_numbers<[1], [1], [0], [0], [0, 0, 1, 0], [], []>} : vector<8x16xbf16>, vector<8x16xbf16>, vector<8x8xf32> -> vector<8x8xf32>
    %cst_75 = arith.constant dense<0xFF800000> : vector<8xf32>
    %155 = vector.multi_reduction <maximumf>, %154, %cst_75 [1] : vector<8x8xf32> to vector<8xf32>
    %156 = vector.shape_cast %155 : vector<8xf32> to vector<8x1xf32>
    %157 = vector.broadcast %156 : vector<8x1xf32> to vector<8x8xf32>
    %158 = arith.subf %154, %157 : vector<8x8xf32>
    %159 = math.exp %158 : vector<8x8xf32>
    %cst_76 = arith.constant dense<0.000000e+00> : vector<8xf32>
    %160 = vector.multi_reduction <add>, %159, %cst_76 [1] : vector<8x8xf32> to vector<8xf32>
    %161 = vector.shape_cast %160 : vector<8xf32> to vector<8x1xf32>
    %162 = vector.broadcast %161 : vector<8x1xf32> to vector<8x8xf32>
    %163 = arith.divf %159, %162 : vector<8x8xf32>
    %164 = arith.truncf %163 : vector<8x8xf32> to vector<8x8xbf16>
    %cst_77 = arith.constant dense<0.000000e+00> : vector<8x16xf32>
    %165 = tpu.matmul %164, %152, %cst_77 {dimension_numbers = #tpu.dot_dimension_numbers<[1], [0], [0], [1], [0, 0, 1, 1], [], []>} : vector<8x8xbf16>, vector<8x16xbf16>, vector<8x16xf32> -> vector<8x16xf32>
    %c0_78 = arith.constant 0 : index
    %c16_79 = arith.constant 16 : index
    %166 = vector.load %arg13[%c0_78, %c16_79] : memref<32x96xf32, #tpu.memory_space<vmem>>, vector<32x16xf32>
    %167 = arith.truncf %166 : vector<32x16xf32> to vector<32x16xbf16>
    %cst_80 = arith.constant dense<0.000000e+00> : vector<8x16xf32>
    %168 = tpu.matmul %61, %167, %cst_80 {dimension_numbers = #tpu.dot_dimension_numbers<[1], [0], [0], [1], [0, 0, 1, 1], [], []>} : vector<8x32xbf16>, vector<32x16xbf16>, vector<8x16xf32> -> vector<8x16xf32>
    %cst_81 = arith.constant 2.500000e-01 : f32
    %169 = vector.broadcast %cst_81 : f32 to vector<8x16xf32>
    %170 = arith.mulf %168, %169 : vector<8x16xf32>
    %c0_82 = arith.constant 0 : index
    %c48 = arith.constant 48 : index
    %171 = vector.load %arg13[%c0_82, %c48] : memref<32x96xf32, #tpu.memory_space<vmem>>, vector<32x16xf32>
    %172 = arith.truncf %171 : vector<32x16xf32> to vector<32x16xbf16>
    %cst_83 = arith.constant dense<0.000000e+00> : vector<8x16xf32>
    %173 = tpu.matmul %61, %172, %cst_83 {dimension_numbers = #tpu.dot_dimension_numbers<[1], [0], [0], [1], [0, 0, 1, 1], [], []>} : vector<8x32xbf16>, vector<32x16xbf16>, vector<8x16xf32> -> vector<8x16xf32>
    %c0_84 = arith.constant 0 : index
    %c80 = arith.constant 80 : index
    %174 = vector.load %arg13[%c0_84, %c80] : memref<32x96xf32, #tpu.memory_space<vmem>>, vector<32x16xf32>
    %175 = arith.truncf %174 : vector<32x16xf32> to vector<32x16xbf16>
    %cst_85 = arith.constant dense<0.000000e+00> : vector<8x16xf32>
    %176 = tpu.matmul %61, %175, %cst_85 {dimension_numbers = #tpu.dot_dimension_numbers<[1], [0], [0], [1], [0, 0, 1, 1], [], []>} : vector<8x32xbf16>, vector<32x16xbf16>, vector<8x16xf32> -> vector<8x16xf32>
    %177 = arith.truncf %173 : vector<8x16xf32> to vector<8x16xbf16>
    %178 = arith.truncf %176 : vector<8x16xf32> to vector<8x16xbf16>
    %179 = arith.truncf %170 : vector<8x16xf32> to vector<8x16xbf16>
    %cst_86 = arith.constant dense<0.000000e+00> : vector<8x8xf32>
    %180 = tpu.matmul %179, %177, %cst_86 {dimension_numbers = #tpu.dot_dimension_numbers<[1], [1], [0], [0], [0, 0, 1, 0], [], []>} : vector<8x16xbf16>, vector<8x16xbf16>, vector<8x8xf32> -> vector<8x8xf32>
    %cst_87 = arith.constant dense<0xFF800000> : vector<8xf32>
    %181 = vector.multi_reduction <maximumf>, %180, %cst_87 [1] : vector<8x8xf32> to vector<8xf32>
    %182 = vector.shape_cast %181 : vector<8xf32> to vector<8x1xf32>
    %183 = vector.broadcast %182 : vector<8x1xf32> to vector<8x8xf32>
    %184 = arith.subf %180, %183 : vector<8x8xf32>
    %185 = math.exp %184 : vector<8x8xf32>
    %cst_88 = arith.constant dense<0.000000e+00> : vector<8xf32>
    %186 = vector.multi_reduction <add>, %185, %cst_88 [1] : vector<8x8xf32> to vector<8xf32>
    %187 = vector.shape_cast %186 : vector<8xf32> to vector<8x1xf32>
    %188 = vector.broadcast %187 : vector<8x1xf32> to vector<8x8xf32>
    %189 = arith.divf %185, %188 : vector<8x8xf32>
    %190 = arith.truncf %189 : vector<8x8xf32> to vector<8x8xbf16>
    %cst_89 = arith.constant dense<0.000000e+00> : vector<8x16xf32>
    %191 = tpu.matmul %190, %178, %cst_89 {dimension_numbers = #tpu.dot_dimension_numbers<[1], [0], [0], [1], [0, 0, 1, 1], [], []>} : vector<8x8xbf16>, vector<8x16xbf16>, vector<8x16xf32> -> vector<8x16xf32>
    %192 = tpu.concatenate %165, %191 in 1 : vector<8x16xf32>, vector<8x16xf32> -> vector<8x32xf32>
    %c0_90 = arith.constant 0 : index
    %c0_91 = arith.constant 0 : index
    %193 = vector.load %arg14[%c0_90, %c0_91] : memref<32x32xf32, #tpu.memory_space<vmem>>, vector<32x32xf32>
    %194 = arith.truncf %192 : vector<8x32xf32> to vector<8x32xbf16>
    %195 = arith.truncf %193 : vector<32x32xf32> to vector<32x32xbf16>
    %cst_92 = arith.constant dense<0.000000e+00> : vector<8x32xf32>
    %196 = tpu.matmul %194, %195, %cst_92 {dimension_numbers = #tpu.dot_dimension_numbers<[1], [0], [0], [1], [0, 0, 1, 1], [], []>} : vector<8x32xbf16>, vector<32x32xbf16>, vector<8x32xf32> -> vector<8x32xf32>
    %c0_93 = arith.constant 0 : index
    %c0_94 = arith.constant 0 : index
    %197 = vector.load %arg15[%c0_93, %c0_94] : memref<1x32xf32, #tpu.memory_space<vmem>>, vector<1x32xf32>
    %198 = vector.broadcast %197 : vector<1x32xf32> to vector<8x32xf32>
    %199 = arith.addf %196, %198 : vector<8x32xf32>
    %200 = vector.broadcast %59 : vector<1x32xf32> to vector<8x32xf32>
    %201 = arith.mulf %1, %200 : vector<8x32xf32>
    %cst_95 = arith.constant dense<0.000000e+00> : vector<8xf32>
    %202 = vector.multi_reduction <add>, %201, %cst_95 [1] : vector<8x32xf32> to vector<8xf32>
    %203 = vector.shape_cast %202 : vector<8xf32> to vector<8x1xf32>
    %204 = vector.extract_strided_slice %58 {offsets = [0, 0], sizes = [1, 1], strides = [1, 1]} : vector<1x2xf32> to vector<1x1xf32>
    %205 = vector.broadcast %204 : vector<1x1xf32> to vector<8x1xf32>
    %206 = arith.addf %203, %205 : vector<8x1xf32>
    %207 = vector.broadcast %60 : vector<1x32xf32> to vector<8x32xf32>
    %208 = arith.mulf %1, %207 : vector<8x32xf32>
    %cst_96 = arith.constant dense<0.000000e+00> : vector<8xf32>
    %209 = vector.multi_reduction <add>, %208, %cst_96 [1] : vector<8x32xf32> to vector<8xf32>
    %210 = vector.shape_cast %209 : vector<8xf32> to vector<8x1xf32>
    %211 = vector.extract_strided_slice %58 {offsets = [0, 1], sizes = [1, 1], strides = [1, 1]} : vector<1x2xf32> to vector<1x1xf32>
    %212 = vector.broadcast %211 : vector<1x1xf32> to vector<8x1xf32>
    %213 = arith.addf %210, %212 : vector<8x1xf32>
    %214 = arith.maximumf %206, %213 : vector<8x1xf32>
    %215 = arith.subf %206, %214 : vector<8x1xf32>
    %216 = math.exp %215 : vector<8x1xf32>
    %217 = arith.subf %213, %214 : vector<8x1xf32>
    %218 = math.exp %217 : vector<8x1xf32>
    %219 = arith.addf %216, %218 : vector<8x1xf32>
    %cst_97 = arith.constant 1.000000e+00 : f32
    %220 = vector.broadcast %cst_97 : f32 to vector<8x1xf32>
    %221 = arith.divf %220, %219 : vector<8x1xf32>
    %222 = arith.mulf %216, %221 : vector<8x1xf32>
    %223 = vector.broadcast %222 : vector<8x1xf32> to vector<8x32xf32>
    %224 = arith.mulf %139, %223 : vector<8x32xf32>
    %225 = arith.addf %1, %224 : vector<8x32xf32>
    %226 = arith.mulf %218, %221 : vector<8x1xf32>
    %227 = vector.broadcast %226 : vector<8x1xf32> to vector<8x32xf32>
    %228 = arith.mulf %199, %227 : vector<8x32xf32>
    %229 = arith.addf %225, %228 : vector<8x32xf32>
    %c0_98 = arith.constant 0 : index
    %c0_99 = arith.constant 0 : index
    %230 = vector.load %arg16[%c0_98, %c0_99] : memref<1x32xf32, #tpu.memory_space<vmem>>, vector<1x32xf32>
    %231 = arith.mulf %229, %229 : vector<8x32xf32>
    %cst_100 = arith.constant dense<0.000000e+00> : vector<8xf32>
    %232 = vector.multi_reduction <add>, %231, %cst_100 [1] : vector<8x32xf32> to vector<8xf32>
    %233 = vector.shape_cast %232 : vector<8xf32> to vector<8x1xf32>
    %cst_101 = arith.constant 3.200000e+01 : f32
    %234 = vector.broadcast %cst_101 : f32 to vector<8x1xf32>
    %235 = arith.divf %233, %234 : vector<8x1xf32>
    %cst_102 = arith.constant 9.99999997E-7 : f32
    %236 = vector.broadcast %cst_102 : f32 to vector<8x1xf32>
    %237 = arith.addf %235, %236 : vector<8x1xf32>
    %238 = math.rsqrt %237 : vector<8x1xf32>
    %239 = vector.broadcast %238 : vector<8x1xf32> to vector<8x32xf32>
    %240 = arith.mulf %229, %239 : vector<8x32xf32>
    %241 = vector.broadcast %230 : vector<1x32xf32> to vector<8x32xf32>
    %242 = arith.mulf %240, %241 : vector<8x32xf32>
    %243 = arith.truncf %242 : vector<8x32xf32> to vector<8x32xbf16>
    %c0_103 = arith.constant 0 : index
    %c0_104 = arith.constant 0 : index
    %244 = vector.load %arg4[%c0_103, %c0_104] : memref<32x16xf32, #tpu.memory_space<vmem>>, vector<32x16xf32>
    %245 = arith.truncf %244 : vector<32x16xf32> to vector<32x16xbf16>
    %cst_105 = arith.constant dense<0.000000e+00> : vector<8x16xf32>
    %246 = tpu.matmul %243, %245, %cst_105 {dimension_numbers = #tpu.dot_dimension_numbers<[1], [0], [0], [1], [0, 0, 1, 1], [], []>} : vector<8x32xbf16>, vector<32x16xbf16>, vector<8x16xf32> -> vector<8x16xf32>
    %c0_106 = arith.constant 0 : index
    %c0_107 = arith.constant 0 : index
    %247 = vector.load %arg5[%c0_106, %c0_107] : memref<1x16xf32, #tpu.memory_space<vmem>>, vector<1x16xf32>
    %248 = arith.mulf %246, %246 : vector<8x16xf32>
    %cst_108 = arith.constant dense<0.000000e+00> : vector<8xf32>
    %249 = vector.multi_reduction <add>, %248, %cst_108 [1] : vector<8x16xf32> to vector<8xf32>
    %250 = vector.shape_cast %249 : vector<8xf32> to vector<8x1xf32>
    %cst_109 = arith.constant 1.600000e+01 : f32
    %251 = vector.broadcast %cst_109 : f32 to vector<8x1xf32>
    %252 = arith.divf %250, %251 : vector<8x1xf32>
    %cst_110 = arith.constant 9.99999997E-7 : f32
    %253 = vector.broadcast %cst_110 : f32 to vector<8x1xf32>
    %254 = arith.addf %252, %253 : vector<8x1xf32>
    %255 = math.rsqrt %254 : vector<8x1xf32>
    %256 = vector.broadcast %255 : vector<8x1xf32> to vector<8x16xf32>
    %257 = arith.mulf %246, %256 : vector<8x16xf32>
    %258 = vector.broadcast %247 : vector<1x16xf32> to vector<8x16xf32>
    %259 = arith.mulf %257, %258 : vector<8x16xf32>
    %260 = arith.truncf %259 : vector<8x16xf32> to vector<8x16xbf16>
    %c0_111 = arith.constant 0 : index
    %c0_112 = arith.constant 0 : index
    %261 = vector.load %arg6[%c0_111, %c0_112] : memref<16x32xf32, #tpu.memory_space<vmem>>, vector<16x8xf32>
    %262 = arith.truncf %261 : vector<16x8xf32> to vector<16x8xbf16>
    %cst_113 = arith.constant dense<0.000000e+00> : vector<8x8xf32>
    %263 = tpu.matmul %260, %262, %cst_113 {dimension_numbers = #tpu.dot_dimension_numbers<[1], [0], [0], [1], [0, 0, 1, 1], [], []>} : vector<8x16xbf16>, vector<16x8xbf16>, vector<8x8xf32> -> vector<8x8xf32>
    %c0_114 = arith.constant 0 : index
    %c8_115 = arith.constant 8 : index
    %264 = vector.load %arg6[%c0_114, %c8_115] : memref<16x32xf32, #tpu.memory_space<vmem>>, vector<16x8xf32>
    %265 = arith.truncf %264 : vector<16x8xf32> to vector<16x8xbf16>
    %cst_116 = arith.constant dense<0.000000e+00> : vector<8x8xf32>
    %266 = tpu.matmul %260, %265, %cst_116 {dimension_numbers = #tpu.dot_dimension_numbers<[1], [0], [0], [1], [0, 0, 1, 1], [], []>} : vector<8x16xbf16>, vector<16x8xbf16>, vector<8x8xf32> -> vector<8x8xf32>
    %267 = vector.extract_strided_slice %266 {offsets = [0, 4], sizes = [8, 4], strides = [1, 1]} : vector<8x8xf32> to vector<8x4xf32>
    %268 = vector.extract_strided_slice %266 {offsets = [0, 0], sizes = [8, 4], strides = [1, 1]} : vector<8x8xf32> to vector<8x4xf32>
    %269 = tpu.concatenate %267, %268 in 1 : vector<8x4xf32>, vector<8x4xf32> -> vector<8x8xf32>
    %270 = arith.mulf %266, %2 : vector<8x8xf32>
    %271 = arith.mulf %269, %3 : vector<8x8xf32>
    %272 = arith.addf %270, %271 : vector<8x8xf32>
    %273 = tpu.concatenate %263, %272 in 1 : vector<8x8xf32>, vector<8x8xf32> -> vector<8x16xf32>
    %cst_117 = arith.constant 2.500000e-01 : f32
    %274 = vector.broadcast %cst_117 : f32 to vector<8x16xf32>
    %275 = arith.mulf %273, %274 : vector<8x16xf32>
    %276 = arith.truncf %275 : vector<8x16xf32> to vector<8x16xbf16>
    %cst_118 = arith.constant dense<0.000000e+00> : vector<8x8xf32>
    %277 = tpu.matmul %276, %38, %cst_118 {dimension_numbers = #tpu.dot_dimension_numbers<[1], [1], [0], [0], [0, 0, 1, 0], [], []>} : vector<8x16xbf16>, vector<8x16xbf16>, vector<8x8xf32> -> vector<8x8xf32>
    %cst_119 = arith.constant dense<0xFF800000> : vector<8xf32>
    %278 = vector.multi_reduction <maximumf>, %277, %cst_119 [1] : vector<8x8xf32> to vector<8xf32>
    %279 = vector.shape_cast %278 : vector<8xf32> to vector<8x1xf32>
    %280 = vector.broadcast %279 : vector<8x1xf32> to vector<8x8xf32>
    %281 = arith.subf %277, %280 : vector<8x8xf32>
    %282 = math.exp %281 : vector<8x8xf32>
    %cst_120 = arith.constant dense<0.000000e+00> : vector<8xf32>
    %283 = vector.multi_reduction <add>, %282, %cst_120 [1] : vector<8x8xf32> to vector<8xf32>
    %284 = vector.shape_cast %283 : vector<8xf32> to vector<8x1xf32>
    %285 = vector.broadcast %284 : vector<8x1xf32> to vector<8x8xf32>
    %286 = arith.divf %282, %285 : vector<8x8xf32>
    %287 = arith.truncf %286 : vector<8x8xf32> to vector<8x8xbf16>
    %cst_121 = arith.constant dense<0.000000e+00> : vector<8x8xf32>
    %288 = tpu.matmul %287, %39, %cst_121 {dimension_numbers = #tpu.dot_dimension_numbers<[1], [0], [0], [1], [0, 0, 1, 1], [], []>} : vector<8x8xbf16>, vector<8x8xbf16>, vector<8x8xf32> -> vector<8x8xf32>
    %c0_122 = arith.constant 0 : index
    %c16_123 = arith.constant 16 : index
    %289 = vector.load %arg6[%c0_122, %c16_123] : memref<16x32xf32, #tpu.memory_space<vmem>>, vector<16x8xf32>
    %290 = arith.truncf %289 : vector<16x8xf32> to vector<16x8xbf16>
    %cst_124 = arith.constant dense<0.000000e+00> : vector<8x8xf32>
    %291 = tpu.matmul %260, %290, %cst_124 {dimension_numbers = #tpu.dot_dimension_numbers<[1], [0], [0], [1], [0, 0, 1, 1], [], []>} : vector<8x16xbf16>, vector<16x8xbf16>, vector<8x8xf32> -> vector<8x8xf32>
    %c0_125 = arith.constant 0 : index
    %c24_126 = arith.constant 24 : index
    %292 = vector.load %arg6[%c0_125, %c24_126] : memref<16x32xf32, #tpu.memory_space<vmem>>, vector<16x8xf32>
    %293 = arith.truncf %292 : vector<16x8xf32> to vector<16x8xbf16>
    %cst_127 = arith.constant dense<0.000000e+00> : vector<8x8xf32>
    %294 = tpu.matmul %260, %293, %cst_127 {dimension_numbers = #tpu.dot_dimension_numbers<[1], [0], [0], [1], [0, 0, 1, 1], [], []>} : vector<8x16xbf16>, vector<16x8xbf16>, vector<8x8xf32> -> vector<8x8xf32>
    %295 = vector.extract_strided_slice %294 {offsets = [0, 4], sizes = [8, 4], strides = [1, 1]} : vector<8x8xf32> to vector<8x4xf32>
    %296 = vector.extract_strided_slice %294 {offsets = [0, 0], sizes = [8, 4], strides = [1, 1]} : vector<8x8xf32> to vector<8x4xf32>
    %297 = tpu.concatenate %295, %296 in 1 : vector<8x4xf32>, vector<8x4xf32> -> vector<8x8xf32>
    %298 = arith.mulf %294, %2 : vector<8x8xf32>
    %299 = arith.mulf %297, %3 : vector<8x8xf32>
    %300 = arith.addf %298, %299 : vector<8x8xf32>
    %301 = tpu.concatenate %291, %300 in 1 : vector<8x8xf32>, vector<8x8xf32> -> vector<8x16xf32>
    %cst_128 = arith.constant 2.500000e-01 : f32
    %302 = vector.broadcast %cst_128 : f32 to vector<8x16xf32>
    %303 = arith.mulf %301, %302 : vector<8x16xf32>
    %304 = arith.truncf %303 : vector<8x16xf32> to vector<8x16xbf16>
    %cst_129 = arith.constant dense<0.000000e+00> : vector<8x8xf32>
    %305 = tpu.matmul %304, %56, %cst_129 {dimension_numbers = #tpu.dot_dimension_numbers<[1], [1], [0], [0], [0, 0, 1, 0], [], []>} : vector<8x16xbf16>, vector<8x16xbf16>, vector<8x8xf32> -> vector<8x8xf32>
    %cst_130 = arith.constant dense<0xFF800000> : vector<8xf32>
    %306 = vector.multi_reduction <maximumf>, %305, %cst_130 [1] : vector<8x8xf32> to vector<8xf32>
    %307 = vector.shape_cast %306 : vector<8xf32> to vector<8x1xf32>
    %308 = vector.broadcast %307 : vector<8x1xf32> to vector<8x8xf32>
    %309 = arith.subf %305, %308 : vector<8x8xf32>
    %310 = math.exp %309 : vector<8x8xf32>
    %cst_131 = arith.constant dense<0.000000e+00> : vector<8xf32>
    %311 = vector.multi_reduction <add>, %310, %cst_131 [1] : vector<8x8xf32> to vector<8xf32>
    %312 = vector.shape_cast %311 : vector<8xf32> to vector<8x1xf32>
    %313 = vector.broadcast %312 : vector<8x1xf32> to vector<8x8xf32>
    %314 = arith.divf %310, %313 : vector<8x8xf32>
    %315 = arith.truncf %314 : vector<8x8xf32> to vector<8x8xbf16>
    %cst_132 = arith.constant dense<0.000000e+00> : vector<8x8xf32>
    %316 = tpu.matmul %315, %57, %cst_132 {dimension_numbers = #tpu.dot_dimension_numbers<[1], [0], [0], [1], [0, 0, 1, 1], [], []>} : vector<8x8xbf16>, vector<8x8xbf16>, vector<8x8xf32> -> vector<8x8xf32>
    %317 = tpu.concatenate %288, %316 in 1 : vector<8x8xf32>, vector<8x8xf32> -> vector<8x16xf32>
    %c0_133 = arith.constant 0 : index
    %c0_134 = arith.constant 0 : index
    %318 = vector.load %arg10[%c0_133, %c0_134] : memref<16x32xf32, #tpu.memory_space<vmem>>, vector<16x32xf32>
    %319 = arith.truncf %317 : vector<8x16xf32> to vector<8x16xbf16>
    %320 = arith.truncf %318 : vector<16x32xf32> to vector<16x32xbf16>
    %cst_135 = arith.constant dense<0.000000e+00> : vector<8x32xf32>
    %321 = tpu.matmul %319, %320, %cst_135 {dimension_numbers = #tpu.dot_dimension_numbers<[1], [0], [0], [1], [0, 0, 1, 1], [], []>} : vector<8x16xbf16>, vector<16x32xbf16>, vector<8x32xf32> -> vector<8x32xf32>
    %c0_136 = arith.constant 0 : index
    %c0_137 = arith.constant 0 : index
    %322 = vector.load %arg13[%c0_136, %c0_137] : memref<32x96xf32, #tpu.memory_space<vmem>>, vector<32x16xf32>
    %323 = arith.truncf %322 : vector<32x16xf32> to vector<32x16xbf16>
    %cst_138 = arith.constant dense<0.000000e+00> : vector<8x16xf32>
    %324 = tpu.matmul %243, %323, %cst_138 {dimension_numbers = #tpu.dot_dimension_numbers<[1], [0], [0], [1], [0, 0, 1, 1], [], []>} : vector<8x32xbf16>, vector<32x16xbf16>, vector<8x16xf32> -> vector<8x16xf32>
    %cst_139 = arith.constant 2.500000e-01 : f32
    %325 = vector.broadcast %cst_139 : f32 to vector<8x16xf32>
    %326 = arith.mulf %324, %325 : vector<8x16xf32>
    %c0_140 = arith.constant 0 : index
    %c32_141 = arith.constant 32 : index
    %327 = vector.load %arg13[%c0_140, %c32_141] : memref<32x96xf32, #tpu.memory_space<vmem>>, vector<32x16xf32>
    %328 = arith.truncf %327 : vector<32x16xf32> to vector<32x16xbf16>
    %cst_142 = arith.constant dense<0.000000e+00> : vector<8x16xf32>
    %329 = tpu.matmul %243, %328, %cst_142 {dimension_numbers = #tpu.dot_dimension_numbers<[1], [0], [0], [1], [0, 0, 1, 1], [], []>} : vector<8x32xbf16>, vector<32x16xbf16>, vector<8x16xf32> -> vector<8x16xf32>
    %c0_143 = arith.constant 0 : index
    %c64_144 = arith.constant 64 : index
    %330 = vector.load %arg13[%c0_143, %c64_144] : memref<32x96xf32, #tpu.memory_space<vmem>>, vector<32x16xf32>
    %331 = arith.truncf %330 : vector<32x16xf32> to vector<32x16xbf16>
    %cst_145 = arith.constant dense<0.000000e+00> : vector<8x16xf32>
    %332 = tpu.matmul %243, %331, %cst_145 {dimension_numbers = #tpu.dot_dimension_numbers<[1], [0], [0], [1], [0, 0, 1, 1], [], []>} : vector<8x32xbf16>, vector<32x16xbf16>, vector<8x16xf32> -> vector<8x16xf32>
    %333 = arith.truncf %329 : vector<8x16xf32> to vector<8x16xbf16>
    %334 = arith.truncf %332 : vector<8x16xf32> to vector<8x16xbf16>
    %335 = arith.truncf %326 : vector<8x16xf32> to vector<8x16xbf16>
    %cst_146 = arith.constant dense<0.000000e+00> : vector<8x8xf32>
    %336 = tpu.matmul %335, %333, %cst_146 {dimension_numbers = #tpu.dot_dimension_numbers<[1], [1], [0], [0], [0, 0, 1, 0], [], []>} : vector<8x16xbf16>, vector<8x16xbf16>, vector<8x8xf32> -> vector<8x8xf32>
    %cst_147 = arith.constant dense<0xFF800000> : vector<8xf32>
    %337 = vector.multi_reduction <maximumf>, %336, %cst_147 [1] : vector<8x8xf32> to vector<8xf32>
    %338 = vector.shape_cast %337 : vector<8xf32> to vector<8x1xf32>
    %339 = vector.broadcast %338 : vector<8x1xf32> to vector<8x8xf32>
    %340 = arith.subf %336, %339 : vector<8x8xf32>
    %341 = math.exp %340 : vector<8x8xf32>
    %cst_148 = arith.constant dense<0.000000e+00> : vector<8xf32>
    %342 = vector.multi_reduction <add>, %341, %cst_148 [1] : vector<8x8xf32> to vector<8xf32>
    %343 = vector.shape_cast %342 : vector<8xf32> to vector<8x1xf32>
    %344 = vector.broadcast %343 : vector<8x1xf32> to vector<8x8xf32>
    %345 = arith.divf %341, %344 : vector<8x8xf32>
    %346 = arith.truncf %345 : vector<8x8xf32> to vector<8x8xbf16>
    %cst_149 = arith.constant dense<0.000000e+00> : vector<8x16xf32>
    %347 = tpu.matmul %346, %334, %cst_149 {dimension_numbers = #tpu.dot_dimension_numbers<[1], [0], [0], [1], [0, 0, 1, 1], [], []>} : vector<8x8xbf16>, vector<8x16xbf16>, vector<8x16xf32> -> vector<8x16xf32>
    %c0_150 = arith.constant 0 : index
    %c16_151 = arith.constant 16 : index
    %348 = vector.load %arg13[%c0_150, %c16_151] : memref<32x96xf32, #tpu.memory_space<vmem>>, vector<32x16xf32>
    %349 = arith.truncf %348 : vector<32x16xf32> to vector<32x16xbf16>
    %cst_152 = arith.constant dense<0.000000e+00> : vector<8x16xf32>
    %350 = tpu.matmul %243, %349, %cst_152 {dimension_numbers = #tpu.dot_dimension_numbers<[1], [0], [0], [1], [0, 0, 1, 1], [], []>} : vector<8x32xbf16>, vector<32x16xbf16>, vector<8x16xf32> -> vector<8x16xf32>
    %cst_153 = arith.constant 2.500000e-01 : f32
    %351 = vector.broadcast %cst_153 : f32 to vector<8x16xf32>
    %352 = arith.mulf %350, %351 : vector<8x16xf32>
    %c0_154 = arith.constant 0 : index
    %c48_155 = arith.constant 48 : index
    %353 = vector.load %arg13[%c0_154, %c48_155] : memref<32x96xf32, #tpu.memory_space<vmem>>, vector<32x16xf32>
    %354 = arith.truncf %353 : vector<32x16xf32> to vector<32x16xbf16>
    %cst_156 = arith.constant dense<0.000000e+00> : vector<8x16xf32>
    %355 = tpu.matmul %243, %354, %cst_156 {dimension_numbers = #tpu.dot_dimension_numbers<[1], [0], [0], [1], [0, 0, 1, 1], [], []>} : vector<8x32xbf16>, vector<32x16xbf16>, vector<8x16xf32> -> vector<8x16xf32>
    %c0_157 = arith.constant 0 : index
    %c80_158 = arith.constant 80 : index
    %356 = vector.load %arg13[%c0_157, %c80_158] : memref<32x96xf32, #tpu.memory_space<vmem>>, vector<32x16xf32>
    %357 = arith.truncf %356 : vector<32x16xf32> to vector<32x16xbf16>
    %cst_159 = arith.constant dense<0.000000e+00> : vector<8x16xf32>
    %358 = tpu.matmul %243, %357, %cst_159 {dimension_numbers = #tpu.dot_dimension_numbers<[1], [0], [0], [1], [0, 0, 1, 1], [], []>} : vector<8x32xbf16>, vector<32x16xbf16>, vector<8x16xf32> -> vector<8x16xf32>
    %359 = arith.truncf %355 : vector<8x16xf32> to vector<8x16xbf16>
    %360 = arith.truncf %358 : vector<8x16xf32> to vector<8x16xbf16>
    %361 = arith.truncf %352 : vector<8x16xf32> to vector<8x16xbf16>
    %cst_160 = arith.constant dense<0.000000e+00> : vector<8x8xf32>
    %362 = tpu.matmul %361, %359, %cst_160 {dimension_numbers = #tpu.dot_dimension_numbers<[1], [1], [0], [0], [0, 0, 1, 0], [], []>} : vector<8x16xbf16>, vector<8x16xbf16>, vector<8x8xf32> -> vector<8x8xf32>
    %cst_161 = arith.constant dense<0xFF800000> : vector<8xf32>
    %363 = vector.multi_reduction <maximumf>, %362, %cst_161 [1] : vector<8x8xf32> to vector<8xf32>
    %364 = vector.shape_cast %363 : vector<8xf32> to vector<8x1xf32>
    %365 = vector.broadcast %364 : vector<8x1xf32> to vector<8x8xf32>
    %366 = arith.subf %362, %365 : vector<8x8xf32>
    %367 = math.exp %366 : vector<8x8xf32>
    %cst_162 = arith.constant dense<0.000000e+00> : vector<8xf32>
    %368 = vector.multi_reduction <add>, %367, %cst_162 [1] : vector<8x8xf32> to vector<8xf32>
    %369 = vector.shape_cast %368 : vector<8xf32> to vector<8x1xf32>
    %370 = vector.broadcast %369 : vector<8x1xf32> to vector<8x8xf32>
    %371 = arith.divf %367, %370 : vector<8x8xf32>
    %372 = arith.truncf %371 : vector<8x8xf32> to vector<8x8xbf16>
    %cst_163 = arith.constant dense<0.000000e+00> : vector<8x16xf32>
    %373 = tpu.matmul %372, %360, %cst_163 {dimension_numbers = #tpu.dot_dimension_numbers<[1], [0], [0], [1], [0, 0, 1, 1], [], []>} : vector<8x8xbf16>, vector<8x16xbf16>, vector<8x16xf32> -> vector<8x16xf32>
    %374 = tpu.concatenate %347, %373 in 1 : vector<8x16xf32>, vector<8x16xf32> -> vector<8x32xf32>
    %c0_164 = arith.constant 0 : index
    %c0_165 = arith.constant 0 : index
    %375 = vector.load %arg14[%c0_164, %c0_165] : memref<32x32xf32, #tpu.memory_space<vmem>>, vector<32x32xf32>
    %376 = arith.truncf %374 : vector<8x32xf32> to vector<8x32xbf16>
    %377 = arith.truncf %375 : vector<32x32xf32> to vector<32x32xbf16>
    %cst_166 = arith.constant dense<0.000000e+00> : vector<8x32xf32>
    %378 = tpu.matmul %376, %377, %cst_166 {dimension_numbers = #tpu.dot_dimension_numbers<[1], [0], [0], [1], [0, 0, 1, 1], [], []>} : vector<8x32xbf16>, vector<32x32xbf16>, vector<8x32xf32> -> vector<8x32xf32>
    %c0_167 = arith.constant 0 : index
    %c0_168 = arith.constant 0 : index
    %379 = vector.load %arg15[%c0_167, %c0_168] : memref<1x32xf32, #tpu.memory_space<vmem>>, vector<1x32xf32>
    %380 = vector.broadcast %379 : vector<1x32xf32> to vector<8x32xf32>
    %381 = arith.addf %378, %380 : vector<8x32xf32>
    %382 = vector.broadcast %59 : vector<1x32xf32> to vector<8x32xf32>
    %383 = arith.mulf %242, %382 : vector<8x32xf32>
    %cst_169 = arith.constant dense<0.000000e+00> : vector<8xf32>
    %384 = vector.multi_reduction <add>, %383, %cst_169 [1] : vector<8x32xf32> to vector<8xf32>
    %385 = vector.shape_cast %384 : vector<8xf32> to vector<8x1xf32>
    %386 = vector.extract_strided_slice %58 {offsets = [0, 0], sizes = [1, 1], strides = [1, 1]} : vector<1x2xf32> to vector<1x1xf32>
    %387 = vector.broadcast %386 : vector<1x1xf32> to vector<8x1xf32>
    %388 = arith.addf %385, %387 : vector<8x1xf32>
    %389 = vector.broadcast %60 : vector<1x32xf32> to vector<8x32xf32>
    %390 = arith.mulf %242, %389 : vector<8x32xf32>
    %cst_170 = arith.constant dense<0.000000e+00> : vector<8xf32>
    %391 = vector.multi_reduction <add>, %390, %cst_170 [1] : vector<8x32xf32> to vector<8xf32>
    %392 = vector.shape_cast %391 : vector<8xf32> to vector<8x1xf32>
    %393 = vector.extract_strided_slice %58 {offsets = [0, 1], sizes = [1, 1], strides = [1, 1]} : vector<1x2xf32> to vector<1x1xf32>
    %394 = vector.broadcast %393 : vector<1x1xf32> to vector<8x1xf32>
    %395 = arith.addf %392, %394 : vector<8x1xf32>
    %396 = arith.maximumf %388, %395 : vector<8x1xf32>
    %397 = arith.subf %388, %396 : vector<8x1xf32>
    %398 = math.exp %397 : vector<8x1xf32>
    %399 = arith.subf %395, %396 : vector<8x1xf32>
    %400 = math.exp %399 : vector<8x1xf32>
    %401 = arith.addf %398, %400 : vector<8x1xf32>
    %cst_171 = arith.constant 1.000000e+00 : f32
    %402 = vector.broadcast %cst_171 : f32 to vector<8x1xf32>
    %403 = arith.divf %402, %401 : vector<8x1xf32>
    %404 = arith.mulf %398, %403 : vector<8x1xf32>
    %405 = vector.broadcast %404 : vector<8x1xf32> to vector<8x32xf32>
    %406 = arith.mulf %321, %405 : vector<8x32xf32>
    %407 = arith.addf %242, %406 : vector<8x32xf32>
    %408 = arith.mulf %400, %403 : vector<8x1xf32>
    %409 = vector.broadcast %408 : vector<8x1xf32> to vector<8x32xf32>
    %410 = arith.mulf %381, %409 : vector<8x32xf32>
    %411 = arith.addf %407, %410 : vector<8x32xf32>
    %c0_172 = arith.constant 0 : index
    %c0_173 = arith.constant 0 : index
    %c0_174 = arith.constant 0 : index
    %412 = vector.load %arg17[%c0_172, %c0_173, %c0_174] : memref<1x8x32xf32, #tpu.memory_space<vmem>>, vector<1x8x32xf32>
    %413 = vector.shape_cast %412 : vector<1x8x32xf32> to vector<8x32xf32>
    %414 = vector.shape_cast %411 : vector<8x32xf32> to vector<1x8x32xf32>
    tpu.vector_store %arg17[%c0_172, %c0_173, %c0_174], %414 {strides = array<i32>} : memref<1x8x32xf32, #tpu.memory_space<vmem>>, vector<1x8x32xf32>,
    return
  }
  func.func @transform_0(%arg0: i32) -> (i32, i32, i32) {
    %c0_i32 = arith.constant 0 : i32
    %c0_i32_0 = arith.constant 0 : i32
    %c0_i32_1 = arith.constant 0 : i32
    return %arg0, %c0_i32, %c0_i32_0 : i32, i32, i32
  }
  func.func @transform_1(%arg0: i32) -> (i32, i32) {
    %c0_i32 = arith.constant 0 : i32
    %c0_i32_0 = arith.constant 0 : i32
    %c0_i32_1 = arith.constant 0 : i32
    return %c0_i32, %c0_i32_0 : i32, i32
  }
  func.func @transform_2(%arg0: i32) -> (i32, i32) {
    %c0_i32 = arith.constant 0 : i32
    %c0_i32_0 = arith.constant 0 : i32
    %c0_i32_1 = arith.constant 0 : i32
    return %c0_i32, %c0_i32_0 : i32, i32
  }
  func.func @transform_3(%arg0: i32) -> (i32, i32) {
    %c0_i32 = arith.constant 0 : i32
    %c0_i32_0 = arith.constant 0 : i32
    %c0_i32_1 = arith.constant 0 : i32
    return %c0_i32, %c0_i32_0 : i32, i32
  }
  func.func @transform_4(%arg0: i32) -> (i32, i32) {
    %c0_i32 = arith.constant 0 : i32
    %c0_i32_0 = arith.constant 0 : i32
    %c0_i32_1 = arith.constant 0 : i32
    return %c0_i32, %c0_i32_0 : i32, i32
  }
  func.func @transform_5(%arg0: i32) -> (i32, i32) {
    %c0_i32 = arith.constant 0 : i32
    %c0_i32_0 = arith.constant 0 : i32
    %c0_i32_1 = arith.constant 0 : i32
    return %c0_i32, %c0_i32_0 : i32, i32
  }
  func.func @transform_6(%arg0: i32) -> (i32, i32) {
    %c0_i32 = arith.constant 0 : i32
    %c0_i32_0 = arith.constant 0 : i32
    %c0_i32_1 = arith.constant 0 : i32
    return %c0_i32, %c0_i32_0 : i32, i32
  }
  func.func @transform_7(%arg0: i32) -> (i32, i32) {
    %c0_i32 = arith.constant 0 : i32
    %c0_i32_0 = arith.constant 0 : i32
    %c0_i32_1 = arith.constant 0 : i32
    return %c0_i32, %c0_i32_0 : i32, i32
  }
  func.func @transform_8(%arg0: i32) -> (i32, i32) {
    %c0_i32 = arith.constant 0 : i32
    %c0_i32_0 = arith.constant 0 : i32
    %c0_i32_1 = arith.constant 0 : i32
    return %c0_i32, %c0_i32_0 : i32, i32
  }
  func.func @transform_9(%arg0: i32) -> (i32, i32) {
    %c0_i32 = arith.constant 0 : i32
    %c0_i32_0 = arith.constant 0 : i32
    %c0_i32_1 = arith.constant 0 : i32
    return %c0_i32, %c0_i32_0 : i32, i32
  }
  func.func @transform_10(%arg0: i32) -> (i32, i32) {
    %c0_i32 = arith.constant 0 : i32
    %c0_i32_0 = arith.constant 0 : i32
    %c0_i32_1 = arith.constant 0 : i32
    return %c0_i32, %c0_i32_0 : i32, i32
  }
  func.func @transform_11(%arg0: i32) -> (i32, i32) {
    %c0_i32 = arith.constant 0 : i32
    %c0_i32_0 = arith.constant 0 : i32
    %c0_i32_1 = arith.constant 0 : i32
    return %c0_i32, %c0_i32_0 : i32, i32
  }
  func.func @transform_12(%arg0: i32) -> (i32, i32) {
    %c0_i32 = arith.constant 0 : i32
    %c0_i32_0 = arith.constant 0 : i32
    %c0_i32_1 = arith.constant 0 : i32
    return %c0_i32, %c0_i32_0 : i32, i32
  }
  func.func @transform_13(%arg0: i32) -> (i32, i32) {
    %c0_i32 = arith.constant 0 : i32
    %c0_i32_0 = arith.constant 0 : i32
    %c0_i32_1 = arith.constant 0 : i32
    return %c0_i32, %c0_i32_0 : i32, i32
  }
  func.func @transform_14(%arg0: i32) -> (i32, i32) {
    %c0_i32 = arith.constant 0 : i32
    %c0_i32_0 = arith.constant 0 : i32
    %c0_i32_1 = arith.constant 0 : i32
    return %c0_i32, %c0_i32_0 : i32, i32
  }
  func.func @transform_15(%arg0: i32) -> (i32, i32) {
    %c0_i32 = arith.constant 0 : i32
    %c0_i32_0 = arith.constant 0 : i32
    %c0_i32_1 = arith.constant 0 : i32
    return %c0_i32, %c0_i32_0 : i32, i32
  }
  func.func @transform_16(%arg0: i32) -> (i32, i32, i32) {
    %c0_i32 = arith.constant 0 : i32
    %c0_i32_0 = arith.constant 0 : i32
    %c0_i32_1 = arith.constant 0 : i32
    return %arg0, %c0_i32, %c0_i32_0 : i32, i32, i32
  }
}

</mosaic_0001>

<bundles_post_ra>
// kernel: fwd.1
= control target key start
LH: loop header
LB: loop body
LE: loop exit
PB: predicated region body
PF: predicated region fallthrough
CT: control target
= control target key end

     0   :  { %s5440_s0 = inlined_call_operand.hbm [shape: f32[2,8,32], index: 0, kind: input, shape index: {}]   ;;  %s5441_s1 = inlined_call_operand.vmem [shape: f32[8,8], index: 1, kind: input, shape index: {}]   ;;  %s5442_s2 = inlined_call_operand.vmem [shape: f32[8,8], index: 2, kind: input, shape index: {}]   ;;  %s5443_s3 = inlined_call_operand.vmem [shape: f32[32,16], index: 3, kind: input, shape index: {}]   ;;  %s5444_s4 = inlined_call_operand.hbm [shape: f32[1,16], index: 4, kind: input, shape index: {}]   ;;  %s5445_s5 = inlined_call_operand.hbm [shape: f32[16,32], index: 5, kind: input, shape index: {}]   ;;  %s5446_s6 = inlined_call_operand.vmem [shape: f32[32,32], index: 6, kind: input, shape index: {}]   ;;  %s5447_s7 = inlined_call_operand.hbm [shape: f32[1,16], index: 7, kind: input, shape index: {}]   ;;  %s5448_s8 = inlined_call_operand.hbm [shape: f32[16,32], index: 8, kind: input, shape index: {}]   ;;  %s5449_s9 = inlined_call_operand.hbm [shape: f32[16,32], index: 9, kind: input, shape index: {}]   ;;  %s5450_s10 = inlined_call_operand.hbm [shape: f32[2,32], index: 10, kind: input, shape index: {}]   ;;  %s5451_s11 = inlined_call_operand.hbm [shape: f32[1,2], index: 11, kind: input, shape index: {}]   ;;  %s5452_s12 = inlined_call_operand.vmem [shape: f32[32,96], index: 12, kind: input, shape index: {}]   ;;  %s5453_s13 = inlined_call_operand.vmem [shape: f32[32,32], index: 13, kind: input, shape index: {}]   ;;  %s5454_s14 = inlined_call_operand.vmem [shape: f32[1,32], index: 14, kind: input, shape index: {}]   ;;  %s5455_s15 = inlined_call_operand.hbm [shape: f32[1,32], index: 15, kind: input, shape index: {}]   ;;  %s5456_s16 = inlined_call_operand.hbm [shape: f32[2,8,32], index: 16, kind: output, shape index: {}]  }
   0x1   :  { %5463 = sst [smem:[#allocation25_spill]] %s5440_s0 }
   0x2   :  { %5464 = sst [smem:[#allocation26_spill]] %s5444_s4 }
   0x3   :  { %5465 = sst [smem:[#allocation27_spill]] %s5445_s5 }
   0x4   :  { %5466 = sst [smem:[#allocation28_spill]] %s5447_s7 }
   0x5   :  { %5467 = sst [smem:[#allocation29_spill]] %s5448_s8 }
   0x6   :  { %5468 = sst [smem:[#allocation30_spill]] %s5449_s9 }
   0x7   :  { %5469 = sst [smem:[#allocation31_spill]] %s5450_s10 }
   0x8   :  { %5470 = sst [smem:[#allocation32_spill]] %s5451_s11 }
   0x9   :  { %5471 = sst [smem:[#allocation33_spill]] %s5454_s14 }
   0xa   :  { %5472 = sst [smem:[#allocation34_spill]] %s5455_s15 }
   0xb   :  { %5473 = sst [smem:[#allocation35_spill]] %s5456_s16 }
   0xc   :  { %21 = vsyncpa [#allocation3], 0 }
   0xd   :  { %23 = vsyncpa [#allocation3 + $0x1], 0 }
   0xe   :  { %24 = vsyncpa [#allocation6], 0 }
   0xf   :  { %25 = vsyncpa [#allocation9], 0 }
  0x10   :  { %26 = vsyncpa [#allocation12], 0 }
  0x11   :  { %27 = vsyncpa [#allocation15], 0 }
  0x12   :  { %28 = vsyncpa [#allocation4], 0 }
  0x13   :  { %30 = vsyncpa [#allocation4 + $0x1], 0  ;;  %s4588_s21 = smov 0   ;;  %s4590_s22 = smov 0  }
  0x14   :  { %s4592_s23 = smov 0   ;;  %s4594_s24 = smov 0  }
  0x15 LB: > { %s4474_s25 = smov [#allocation5]   ;;  %s4609_s27 = sadd.s32 4294967295, %s4472_s24   ;;  %s4472_s24 = sphi %s4594_s24, %s5512_s24   ;;  %s4468_s23 = sphi %s4592_s23, %s5511_s23   ;;  %s4464_s22 = sphi %s4590_s22, %s5510_s22   ;;  %s4460_s21 = sphi %s4588_s21, %s5509_s21  }
  0x16   : > { %s430_s26 = sshll.u32 %s4474_s25, 4  ;;  %p3420_p0 = scmp.ge.s32.totalorder %s4472_s24, 1  ;;  %s431_s26 = int_to_ptr.vmem [resolvable:$true] %s430_s26 }
  0x17   : > { %p5459_p1 = scmp.eq.s32.totalorder %s4609_s27, 0  ;;  %p408_p2 = scmp.lt.s32.totalorder %s4472_s24, 3 }
  0x18   : > { %s4475_s29 = smov [#allocation8]   ;;  %s4476_s17 = smov [#allocation11]  }
  0x19   : > { %p4614_p3 = pnand %p3420_p0, %p408_p2  ;;  %s457_s30 = sshll.u32 %s4475_s29, 4  ;;  %s458_s30 = int_to_ptr.vmem [resolvable:$true] %s457_s30 }
  0x1a   : > { %s480_s18 = sshll.u32 %s4476_s17, 4  ;;  %s4167_s20 = scalar_lea.vmem %s431_s26, 16  ;;  %s4627_s18 = int_to_ptr.vmem [resolvable:$true] %s480_s18 }
  0x1b   : > { %s5474_s28 = scalar_select %p4614_p3, 1, 0 }
  0x1c   : > { %p3988_p5 = pneg %p4614_p3  ;;  %p4168_p8 = scmp.ne.s32.totalorder %s431_s26, %s4167_s20 }
  0x1d   : > { %s4174_s25 = scalar_lea.vmem %s431_s26, 32  ;;  %p4175_p11 = scmp.lt.s32.totalorder %s431_s26, %s431_s26 }
  0x1e   : > { %p4623_p6 = pnand %p3988_p5, %p5459_p1  ;;  %p4176_p12 = scmp.lt.s32.totalorder %s4174_s25, %s4167_s20 }
  0x20   : > { %p4631_p7 = pneg %p4623_p6  ;;  %p4177_p13 = por %p4176_p12, %p4175_p11 }
  0x22   : > { %p4170_p9 = pnand %p4168_p8, %p4631_p7 }
  0x24   : > { %p4171_p10 = pneg %p4170_p9 }
  0x26   : > { %p4178_p0 = pnand %p4177_p13, %p4171_p10 }
  0x28   : > { %4181 = shalt.err (!%p4178_p0)
}
  0x29   : > { %s5477_s4 = sld [smem:[#allocation26_spill]]  ;;  %s4193_s16 = scalar_lea.vmem %s458_s30, 16 }
  0x2a   : > { %p4194_p2 = scmp.ne.s32.totalorder %s458_s30, %s4193_s16  ;;  %s4200_s14 = scalar_lea.vmem %s458_s30, 32 }
  0x2b   : > { %p4201_p8 = scmp.lt.s32.totalorder %s458_s30, %s458_s30  ;;  %p4202_p9 = scmp.lt.s32.totalorder %s4200_s14, %s4193_s16 }
  0x2c   : > { %p4196_p5 = pnand %p4194_p2, %p4631_p7 }
  0x2d   : > { %p4203_p1 = por %p4202_p9, %p4201_p8 }
  0x2e   : > { %p4197_p4 = pneg %p4196_p5 }
  0x2f   : > { %3991 = dma.hbm_to_vmem [thread:$0]  (!%p4623_p6), %s5477_s4, 16, %s431_s26, [#allocation6]  }
  0x30   : > { %p4204_p3 = pnand %p4203_p1, %p4197_p4 }
  0x32   : > { %4207 = shalt.err (!%p4204_p3)
}
  0x33   : > { %s5478_s7 = sld [smem:[#allocation28_spill]]  ;;  %s4219_s26 = scalar_lea.vmem %s4627_s18, 256 }
  0x34   : > { %p4220_p10 = scmp.ne.s32.totalorder %s4627_s18, %s4219_s26  ;;  %p4227_p13 = scmp.lt.s32.totalorder %s4627_s18, %s4627_s18 }
  0x35   : > { %p4228_p0 = scmp.lt.s32.totalorder %s4219_s26, %s4219_s26 }
  0x36   : > { %p4222_p11 = pnand %p4220_p10, %p4631_p7 }
  0x37   : > { %p4229_p1 = por %p4228_p0, %p4227_p13 }
  0x38   : > { %p4223_p12 = pneg %p4222_p11 }
  0x39   : > { %3997 = dma.hbm_to_vmem [thread:$0]  (!%p4623_p6), %s5478_s7, 16, %s458_s30, [#allocation9]  }
  0x3a   : > { %p4230_p3 = pnand %p4229_p1, %p4223_p12 }
  0x3c   : > { %4233 = shalt.err (!%p4230_p3)
}
  0x3d   : > { %s4477_s14 = smov 128   ;;  %s4478_s16 = smov 8  }
  0x3e   : > { %s5479_s9 = sld [smem:[#allocation30_spill]]  ;;  %s4479_s17 = smov [#allocation14]  }
  0x3f   : > { %s505_s20 = sshll.u32 %s4479_s17, 4  ;;  %s4480_s25 = smov [#allocation7]   ;;  %s506_s20 = int_to_ptr.vmem [resolvable:$true] %s505_s20 }
  0x40   : > { %s440_s26 = sshll.u32 %s4480_s25, 4  ;;  %s4245_s4 = scalar_lea.vmem %s506_s20, 16  ;;  %s441_s26 = int_to_ptr.vmem [resolvable:$true] %s440_s26 }
  0x41   : > { %p4246_p4 = scmp.ne.s32.totalorder %s506_s20, %s4245_s4  ;;  %s4252_s7 = scalar_lea.vmem %s506_s20, 32 }
  0x42   : > { %p4253_p8 = scmp.lt.s32.totalorder %s506_s20, %s506_s20  ;;  %p4254_p9 = scmp.lt.s32.totalorder %s4252_s7, %s4245_s4 }
  0x43   : > { %p4248_p2 = pnand %p4246_p4, %p4631_p7 }
  0x44   : > { %4003 = dma.hbm_to_vmem [thread:$0]  (!%p4623_p6), %s5479_s9, 256, %s4627_s18, [#allocation12], %s4477_s14, %s4477_s14, %s4478_s16  }
  0x45   : > { %p4249_p5 = pneg %p4248_p2  ;;  %p4255_p10 = por %p4254_p9, %p4253_p8 }
  0x47   : > { %p4256_p11 = pnand %p4255_p10, %p4249_p5 }
  0x49   : > { %4259 = shalt.err (!%p4256_p11)
}
  0x4a   : > { %s5480_s11 = sld [smem:[#allocation32_spill]]  ;;  %s4271_s29 = scalar_lea.vmem %s441_s26, 256 }
  0x4b   : > { %p4272_p12 = scmp.ne.s32.totalorder %s441_s26, %s4271_s29  ;;  %p4279_p1 = scmp.lt.s32.totalorder %s441_s26, %s441_s26 }
  0x4c   : > { %p4280_p3 = scmp.lt.s32.totalorder %s4271_s29, %s4271_s29 }
  0x4d   : > { %p4274_p13 = pnand %p4272_p12, %p4631_p7 }
  0x4e   : > { %p4281_p4 = por %p4280_p3, %p4279_p1 }
  0x4f   : > { %p4275_p0 = pneg %p4274_p13 }
  0x50   : > { %4009 = dma.hbm_to_vmem [thread:$0]  (!%p4623_p6), %s5480_s11, 16, %s506_s20, [#allocation15]  }
  0x51   : > { %p4282_p2 = pnand %p4281_p4, %p4275_p0 }
  0x53   : > { %4285 = shalt.err (!%p4282_p2)
}
  0x54   : > { %s5481_s5 = sld [smem:[#allocation27_spill]]  ;;  %s4481_s17 = smov [#allocation10]  }
  0x55   : > { %s467_s20 = sshll.u32 %s4481_s17, 4  ;;  %s4482_s25 = smov [#allocation13]   ;;  %s468_s20 = int_to_ptr.vmem [resolvable:$true] %s467_s20 }
  0x56   : > { %s494_s30 = sshll.u32 %s4482_s25, 4  ;;  %s4297_s18 = scalar_lea.vmem %s468_s20, 256  ;;  %s495_s30 = int_to_ptr.vmem [resolvable:$true] %s494_s30 }
  0x57   : > { %p4298_p5 = scmp.ne.s32.totalorder %s468_s20, %s4297_s18  ;;  %p4305_p10 = scmp.lt.s32.totalorder %s468_s20, %s468_s20 }
  0x58   : > { %p4306_p11 = scmp.lt.s32.totalorder %s4297_s18, %s4297_s18 }
  0x59   : > { %p4300_p8 = pnand %p4298_p5, %p4631_p7 }
  0x5a   : > { %3994 = dma.hbm_to_vmem [thread:$0]  (!%p4623_p6), %s5481_s5, 256, %s441_s26, [#allocation6], %s4477_s14, %s4477_s14, %s4478_s16  }
  0x5b   : > { %p4301_p9 = pneg %p4300_p8  ;;  %p4307_p12 = por %p4306_p11, %p4305_p10 }
  0x5d   : > { %p4308_p13 = pnand %p4307_p12, %p4301_p9 }
  0x5f   : > { %4311 = shalt.err (!%p4308_p13)
}
  0x60   : > { %s5482_s8 = sld [smem:[#allocation29_spill]]  ;;  %s4323_s4 = scalar_lea.vmem %s495_s30, 32 }
  0x61   : > { %p4324_p0 = scmp.ne.s32.totalorder %s495_s30, %s4323_s4  ;;  %p4331_p4 = scmp.lt.s32.totalorder %s495_s30, %s495_s30 }
  0x62   : > { %p4332_p2 = scmp.lt.s32.totalorder %s4323_s4, %s4323_s4 }
  0x63   : > { %p4326_p1 = pnand %p4324_p0, %p4631_p7 }
  0x64   : > { %p4333_p5 = por %p4332_p2, %p4331_p4 }
  0x65   : > { %p4327_p3 = pneg %p4326_p1 }
  0x66   : > { %4000 = dma.hbm_to_vmem [thread:$0]  (!%p4623_p6), %s5482_s8, 256, %s468_s20, [#allocation9], %s4477_s14, %s4477_s14, %s4478_s16  }
  0x67   : > { %p4334_p8 = pnand %p4333_p5, %p4327_p3 }
  0x69   : > { %4337 = shalt.err (!%p4334_p8)
}
  0x6a   : > { %s5483_s10 = sld [smem:[#allocation31_spill]]  ;;  %s4483_s25 = smov [#allocation16]  }
  0x6b   : > { %s525_s14 = sshll.u32 %s4483_s25, 4  ;;  %s526_s14 = int_to_ptr.vmem [resolvable:$true] %s525_s14 }
  0x6c   : > { %s4349_s16 = scalar_lea.vmem %s526_s14, 16  ;;  %s4356_s20 = scalar_lea.vmem %s526_s14, 32 }
  0x6d   : > { %p4350_p9 = scmp.ne.s32.totalorder %s526_s14, %s4349_s16  ;;  %p4357_p12 = scmp.lt.s32.totalorder %s526_s14, %s526_s14 }
  0x6e   : > { %p4358_p13 = scmp.lt.s32.totalorder %s4356_s20, %s4349_s16 }
  0x6f   : > { %p4352_p10 = pnand %p4350_p9, %p4631_p7 }
  0x70   : > { %4006 = dma.hbm_to_vmem [thread:$0]  (!%p4623_p6), %s5483_s10, 32, %s495_s30, [#allocation12]  }
  0x71   : > { %p4353_p11 = pneg %p4352_p10  ;;  %p4359_p0 = por %p4358_p13, %p4357_p12 }
  0x73   : > { %p4360_p1 = pnand %p4359_p0, %p4353_p11 }
  0x75   : > { %4363 = shalt.err (!%p4360_p1)
}
  0x76   : > { %s5484_s15 = sld [smem:[#allocation34_spill]]  ;;  %s3419_s19 = sadd.s32 4294967294, %s4472_s24  }
  0x77   : > { %s4707_s0 = sadd.s32 1, %s4472_s24   ;;  %s43_s29 = sadd.s32 1, %s4468_s23 }
  0x78   : > { %s40_s30 = ssub.s32 %s4472_s24, %s4707_s0  ;;  %p50_p3 = scmp.ne.s32.totalorder %s4468_s23, %s4464_s22 }
  0x79   : > { %p41_p7 = scmp.eq.s32.totalorder %s40_s30, 0  ;;  %p51_p4 = scmp.eq.s32.totalorder %s4472_s24, 0 }
  0x7a   : > { %p56_p2 = scmp.ne.s32.totalorder %s4464_s22, %s4460_s21  ;;  %p5487_p8 = scmp.eq.s32.totalorder %s4609_s27, 0 }
  0x7b   : > { %s4718_s4 = scalar_select %p41_p7, %s4468_s23, %s43_s29  }
  0x7c   : > { %4012 = dma.hbm_to_vmem [thread:$0]  (!%p4623_p6), %s5484_s15, 16, %s526_s14, [#allocation15]  }
  0x7d   : > { %5485 = sst [smem:[#allocation24_spill]] %s4718_s4  ;;  %p4720_p5 = por %p51_p4, %p50_p3 }
  0x7e   : > { %p4726_p6 = por %p5487_p8, %p56_p2  ;;  %p395_p9 = scmp.eq.s32.totalorder %s4609_s27, 1 }
  0x7f   : > { %p401_p10 = scmp.eq.s32.totalorder %s3419_s19, 1  ;;  %p4029_p11 = scmp.lt.s32.totalorder %s4472_s24, 2 }
  0x80   : > { %s5488_s17 = scalar_select %p4726_p6, 1, 0 }
  0x81   : > { %s536_s25 = sand.u32 1, %s4468_s23   ;;  %p4733_p12 = por %p395_p9, %p50_p3 }
  0x82   : > { %p4737_p13 = por %p401_p10, %p56_p2  ;;  %s3430_s20 = sshll.u32 %s536_s25, 3 }
  0x83   : > { %s5489_s14 = scalar_select %p4733_p12, 1, 0 }
  0x84   : > { %s5490_s16 = scalar_select %p4737_p13, 1, 0 }
  0x85   : > { %s3431_s18 = sshll.u32 %s4472_s24, 7  ;;  %s5491_s29 = sld [smem:[#allocation25_spill]] }
  0x86   : > { %s540_s19 = scalar_lea.vmem [#allocation2], %s3430_s20  ;;  %p4749_p0 = pnand %p4029_p11, %p4720_p5 }
  0x87   : > { %s547_s8 = sshll.u32 %s540_s19, 4  ;;  %s537_s10 = scalar_lea.sflag [#allocation3], %s536_s25  ;;  %s548_s8 = int_to_ptr.vmem [resolvable:$true] %s547_s8 }
  0x88   : > { %p4366_p7 = pneg %p4749_p0 }
  0x8b   : > { %s4745_s5 = scalar_lea.hbm %s5491_s29, %s3431_s18  ;;  %s4369_s30 = scalar_lea.hbm %s5491_s29, 256 }
  0x8c   : > { %s4364_s11 = scalar_lea.hbm %s4745_s5, 128  ;;  %p4370_p2 = scmp.lt.s32.totalorder %s4745_s5, %s5491_s29 }
  0x8d   : > { %p4365_p1 = scmp.ne.s32.totalorder %s4745_s5, %s4364_s11  ;;  %p4371_p5 = scmp.lt.s32.totalorder %s4369_s30, %s4364_s11 }
  0x8f   : > { %p4367_p3 = pnand %p4366_p7, %p4365_p1  ;;  %p4372_p8 = por %p4371_p5, %p4370_p2 }
  0x91   : > { %p4368_p4 = pneg %p4367_p3 }
  0x93   : > { %p4373_p9 = pnand %p4372_p8, %p4368_p4 }
  0x95   : > { %4376 = shalt.err (!%p4373_p9)
}
  0x96   : > { %s4377_s7 = scalar_lea.vmem %s548_s8, 128  ;;  %s4484_s25 = smov [#allocation2]  }
  0x97   : > { %p4378_p10 = scmp.ne.s32.totalorder %s548_s8, %s4377_s7  ;;  %s4382_s15 = sshll.u32 %s4484_s25, 4  ;;  %s4383_s15 = int_to_ptr.vmem [resolvable:$false] %s4382_s15 }
  0x98   : > { %s4384_s4 = scalar_lea.vmem %s4383_s15, 256  ;;  %p4385_p1 = scmp.lt.s32.totalorder %s548_s8, %s4383_s15 }
  0x99   : > { %p4380_p11 = pnand %p4378_p10, %p4366_p7  ;;  %p4386_p3 = scmp.lt.s32.totalorder %s4384_s4, %s4377_s7 }
  0x9b   : > { %p4381_p13 = pneg %p4380_p11  ;;  %p4387_p12 = por %p4386_p3, %p4385_p1 }
  0x9d   : > { %p4388_p6 = pnand %p4387_p12, %p4381_p13 }
  0x9f   : > { %4391 = shalt.err (!%p4388_p6)
}
  0xa0   : > { %4016 = dma.hbm_to_vmem [thread:$0]  (!%p4749_p0), %s4745_s5, 128, %s548_s8, %s537_s10  }
  0xa1   : > { %p5493_p4 = scmp.ne.s32.totalorder %s5474_s28, 0 }
  0xa2   : > { %s4770_s11 = sand.u32 (!%p5493_p4), 1, %s4464_s22   ;;  %p5494_p6 = scmp.ne.s32.totalorder (!%p5493_p4), %s5488_s17, 0 }
  0xa3   : > { %556 = sbr.rel (%p5493_p4) target bundleno = 9953 (0x26e1), region = 84  ;;  %s3433_s18 = sshll.u32 (!%p5493_p4), %s4770_s11, 3 }
  0xa4   : > { %s559_s15 = scalar_lea.sflag (!%p5493_p4), [#allocation3], %s4770_s11  ;;  %s4776_s4 = scalar_lea.vmem (!%p5493_p4), [#allocation2], %s3433_s18 }
  0xa8   : > { %4435 = dma.done.wait (%p5494_p6), %s559_s15, 128  }
  0xa9   : > { %4437 = vsyncadd (%p5494_p6), %s559_s15, 4294967168  ;;  %p5495_p12 = scmp.eq.s32.totalorder %s4609_s27, 0 }
  0xab   : > { %4439 = dma.done.wait (%p5495_p12), [#allocation6], 272   ;;  %p5496_p13 = pmov %p5495_p12 }
  0xac   : > { %p5497_p0 = pmov %p5495_p12 }
  0xad   : > { %4441 = vsyncadd (%p5496_p13), [#allocation6], 4294967024 }
  0xae   : > { %4443 = dma.done.wait (%p5497_p0), [#allocation9], 272   ;;  %p5498_p7 = pmov %p5497_p0 }
  0xaf   : > { %p5499_p2 = pmov %p5497_p0 }
  0xb0   : > { %4445 = vsyncadd (%p5498_p7), [#allocation9], 4294967024 }
  0xb1   : > { %4447 = dma.done.wait (%p5499_p2), [#allocation12], 288   ;;  %p5500_p5 = pmov %p5497_p0 }
  0xb2   : > { %p5501_p8 = pmov %p5497_p0 }
  0xb3   : > { %4449 = vsyncadd (%p5500_p5), [#allocation12], 4294967008 }
  0xb4   : > { %4451 = dma.done.wait (%p5501_p8), [#allocation15], 32   ;;  %p5502_p9 = pmov %p5497_p0 }
  0xb5   : > { %v4485_v0 = vmov 0.0   ;;  %vm4486_vm0 = vmmov 0   ;;  %v650_v1 = vld [vmem:[%s5446_s6 + $0x10] sm:$0xff]  ;;  %v651_v2 = vld [vmem:[%s5446_s6 + $0x18] sm:$0xff]  ;;  %v648_v3 = vld [vmem:[%s5446_s6] sm:$0xff]  ;;  %vm654_vm1 = vcmask 261120  }
  0xb6   : > { %4453 = vsyncadd (%p5502_p9), [#allocation15], 4294967264  ;;  %3620 = vmatprep.subr.bf16.mxu0 %v4485_v0  ;;  %3624 = vmatprep.mubr.msk.bf16.mxu0 %vm4486_vm0, %v4485_v0  ;;  %v653_v4 = vpack.c.bf16 %v651_v2, %v650_v1  ;;  %v649_v5 = vld [vmem:[%s5446_s6 + $0x8] sm:$0xff]  ;;  %s4487_s20 = smov 112   ;;  %s4488_s19 = smov 104   ;;  %vm700_vm2 = vcmask 130048  }
  0xb7   : > { %3628 = vmatprep.subr.bf16.mxu1 %v4485_v0  ;;  %3630 = vmatprep.mubr.msk.bf16.mxu1 %vm4486_vm0, %v4485_v0  ;;  %v652_v6 = vpack.c.bf16 %v649_v5, %v648_v3  ;;  %v4817_v7 = vld [vmem:[%s4776_s4] sm:$0xff]  ;;  %v1091_v18 = vld [vmem:[#allocation7] sm:$0xff]  ;;  %s4489_s7 = smov 120   ;;  %s4490_s26 = smov 4   ;;  %vm1260_vm3 = vcmask 1043456   ;;  %vm862_vm4 = vcmask 31744  }
  0xb8   : > { %3621 = vmatpush3.bf16.msra.mxu0 %v653_v4  ;;  %v4822_v8 = vpack.c.bf16 %v4817_v7, %v4817_v7  ;;  %v717_v9 = vld [vmem:[#allocation10] sm:$0xff]  ;;  %v718_v10 = vld [vmem:[#allocation10 + $0x8] sm:$0xff]  ;;  %v1092_v19 = vld [vmem:[#allocation7 + $0x8] sm:$0xff]  ;;  %s4491_s30 = smov 124   ;;  %s4492_s8 = smov 8   ;;  %vm871_vm5 = vcmask 64512  }
  0xb9   : > { %3622 = vmatprep.subr.bf16.mxu0 %v4485_v0  ;;  %809 = vrot.lane.b32.xlu1 %v652_v6, %s4487_s20  ;;  %v719_v11 = vpack.c.bf16 %v718_v10, %v717_v9  ;;  %v4834_v20 = vpack.c.bf16 %v1092_v19, %v1091_v18  ;;  %v3444_v29 = vld [vmem:[#allocation8] ss:$0 sm:$0xff]  ;;  %v1030_v31 = vld [vmem:[%s5443_s3 + $0x10] sm:$0xff]  ;;  %v1031_v32 = vld [vmem:[%s5443_s3 + $0x18] sm:$0xff]  ;;  %s4493_s17 = smov 96   ;;  %s4495_s9 = smov 80  }
  0xba   : > { %v4855_v34 = vpack.c.bf16 %v1031_v32, %v1030_v31  ;;  %v1028_v37 = vld [vmem:[%s5443_s3] sm:$0xff]  ;;  %v1029_v38 = vld [vmem:[%s5443_s3 + $0x8] sm:$0xff]  ;;  %s4497_s10 = smov 127   ;;  %s4498_s28 = smov 1  }
  0xbb   : > { %3629 = vmatpush3.bf16.msra.mxu1 %v719_v11  ;;  %v4866_v39 = vpack.c.bf16 %v1029_v38, %v1028_v37  ;;  %s5503_s15 = sld [smem:[#allocation33_spill]]  ;;  %p5505_p11 = scmp.ne.s32.totalorder %s5489_s14, 0 }
  0xbc   : > { %3623 = vmatpush3.bf16.msra.mxu0 %v652_v6  ;;  %3634 = vmatprep.subr.bf16.mxu1 %v4485_v0 }
  0xbd   : > { %3640 = vmatprep.subr.bf16.mxu0 %v4485_v0  ;;  %918 = vrot.lane.b32.xlu1 %v719_v11, %s4488_s19 }
  0xbf   : > { %3625 = vmatmul.mubr.msk.bf16.vlgmr.msra.gmra.mxu0 %vm654_vm1, %v4822_v8 }
  0xc0   : > { %3644 = vmatprep.mubr.msk.bf16.mxu0 %vm4486_vm0, %v4485_v0 }
 0x12b   : > { %v810_v25 = vpop.permute.xlu1 %809 }
 0x12f   : > { %v919_v26 = vpop.permute.xlu1 %918 }
 0x17f   : > { %v692_v12 = vpop.f32.mrf.mxu0 }
 0x180   : > { %v699_v13 = vmul.f32 %v692_v12, %v692_v12 }
 0x181   : > { %v3626_v14 = vpop.f32.mrf.mxu0 }
 0x182   : > { %v701_v15 = vsel %vm700_vm2, %v699_v13, 0.0 }
 0x183   : > { %702 = vadd.xlane.f32.xlu0 %v701_v15  ;;  %v695_v16 = vpop.f32.mrf.mxu0 }
 0x184   : > { %v4912_v16 = vld [vmem:[#allocation5] ss:$0 sm:$0xff] }
 0x185   : > { %v3627_v17 = vpop.f32.mrf.mxu0 }
 0x199   : > { %811 = vrot.lane.b32.xlu0 %v653_v4, %s4487_s20 }
 0x19d   : > { %1138 = vrot.lane.b32.xlu0 %v4834_v20, %s4489_s7 }
 0x1a1   : > { %764 = vrot.lane.b32.xlu0 %v719_v11, %s4489_s7 }
 0x1a5   : > { %875 = vrot.lane.b32.xlu0 %v719_v11, %s4487_s20 }
 0x1a9   : > { %963 = vrot.lane.b32.xlu0 %v653_v4, %s4488_s19 }
 0x1ad   : > { %961 = vrot.lane.b32.xlu0 %v652_v6, %s4488_s19 }
 0x20c   : > { %v703_v21 = vpop.xlane.xlu0 %702 }
 0x20d   : > { %v705_v22 = vmul.f32 0.0625, %v703_v21 }
 0x20f   : > { %v706_v23 = vadd.f32 1e-06, %v705_v22 }
 0x210   : > { %v812_v24 = vpop.permute.xlu0 %811 }
 0x211   : > { %4103 = vrsqrt.f32 %v706_v23  ;;  %3641 = vmatpush3.bf16.msra.mxu0 %v812_v24 }
 0x212   : > { %3642 = vmatprep.subr.bf16.mxu0 %v4485_v0 }
 0x214   : > { %v4847_v27 = vpop.permute.xlu0 %1138 }
 0x215   : > { %3643 = vmatpush3.bf16.msra.mxu0 %v810_v25  ;;  %v4933_v25 = vld [vmem:[%s5442_s2] sm:$0xff] }
 0x216   : > { %3654 = vmatprep.subr.bf16.mxu0 %v4485_v0 }
 0x218   : > { %3645 = vmatmul.mubr.msk.bf16.vlgmr.msra.gmra.mxu0 %vm654_vm1, %v4822_v8  ;;  %v765_v36 = vpop.permute.xlu0 %764 }
 0x219   : > { %3655 = vmatpush3.bf16.msra.mxu0 %v919_v26  ;;  %3656 = vmatprep.mubr.msk.bf16.mxu0 %vm4486_vm0, %v4485_v0 }
 0x21a   : > { %3668 = vmatprep.subr.bf16.mxu0 %v4485_v0 }
 0x21c   : > { %v876_v40 = vpop.permute.xlu0 %875 }
 0x21e   : > { %v4104_v28 = vpop.eup %4103 }
 0x21f   : > { %v708_v30 = vmul.f32 %v4104_v28, %v692_v12 }
 0x220   : > { %v964_v41 = vpop.permute.xlu0 %963 }
 0x221   : > { %v715_v33 = vmul.f32 %v3444_v29, %v708_v30  ;;  %v4940_v30 = vld [vmem:[%s5441_s1] sm:$0xff] }
 0x223   : > { %v716_v35 = vpack.c.bf16 %v715_v33, %v715_v33 }
 0x224   : > { %v962_v42 = vpop.permute.xlu0 %961 }
 0x225   : > { %3631 = vmatmul.mubr.msk.bf16.vlgmr.msra.gmra.mxu1 %vm700_vm2, %v716_v35  ;;  %3657 = vmatmul.mubr.msk.bf16.vlgmr.msra.gmra.mxu0 %vm700_vm2, %v716_v35 }
 0x226   : > { %3669 = vmatpush3.bf16.msra.mxu0 %v4855_v34  ;;  %3635 = vmatpush3.bf16.msra.mxu1 %v765_v36 }
 0x227   : > { %3670 = vmatprep.subr.bf16.mxu0 %v4485_v0  ;;  %3636 = vmatprep.mubr.msk.bf16.mxu1 %vm4486_vm0, %v4485_v0 }
 0x228   : > { %3672 = vmatprep.mubr.msk.bf16.mxu0 %vm4486_vm0, %v4485_v0  ;;  %3648 = vmatprep.subr.bf16.mxu1 %v4485_v0 }
 0x22a   : > { %3671 = vmatpush3.bf16.msra.mxu0 %v4866_v39 }
 0x22b   : > { %3682 = vmatprep.subr.bf16.mxu0 %v4485_v0 }
 0x22d   : > { %3637 = vmatmul.mubr.msk.bf16.vlgmr.msra.gmra.mxu1 %vm700_vm2, %v716_v35  ;;  %3673 = vmatmul.mubr.msk.bf16.vlgmr.msra.gmra.mxu0 %vm654_vm1, %v4822_v8 }
 0x22e   : > { %3649 = vmatpush3.bf16.msra.mxu1 %v876_v40  ;;  %3650 = vmatprep.mubr.msk.bf16.mxu1 %vm4486_vm0, %v4485_v0 }
 0x22f   : > { %3660 = vmatprep.subr.bf16.mxu1 %v4485_v0  ;;  %3683 = vmatpush3.bf16.msra.mxu0 %v4847_v27 }
 0x230   : > { %3684 = vmatprep.mubr.msk.bf16.mxu0 %vm4486_vm0, %v4485_v0  ;;  %3694 = vmatprep.subr.bf16.mxu0 %v4485_v0 }
 0x235   : > { %3651 = vmatmul.mubr.msk.bf16.vlgmr.msra.gmra.mxu1 %vm700_vm2, %v716_v35 }
 0x236   : > { %3664 = vmatprep.mubr.msk.bf16.mxu1 %vm4486_vm0, %v4485_v0  ;;  %3661 = vmatpush3.bf16.msra.mxu1 %v964_v41 }
 0x237   : > { %3662 = vmatprep.subr.bf16.mxu1 %v4485_v0 }
 0x23a   : > { %3663 = vmatpush3.bf16.msra.mxu1 %v962_v42 }
 0x23b   : > { %3676 = vmatprep.subr.bf16.mxu1 %v4485_v0 }
 0x23d   : > { %3665 = vmatmul.mubr.msk.bf16.vlgmr.msra.gmra.mxu1 %vm654_vm1, %v4822_v8 }
 0x23e   : > { %3677 = vmatpush3.bf16.msra.mxu1 %v4834_v20  ;;  %3678 = vmatprep.mubr.msk.bf16.mxu1 %vm4486_vm0, %v4485_v0 }
 0x23f   : > { %3688 = vmatprep.subr.bf16.mxu1 %v4485_v0 }
 0x2d8   : > { %v4897_v43 = vpop.f32.mrf.mxu0 }
 0x2d9   : > { %859 = vrot.lane.b32.xlu0 %v4897_v43, %s4490_s26  ;;  %v864_v37 = vmul.f32 %v4897_v43, %v4940_v30 }
 0x2da   : > { %v3646_v44 = vpop.f32.mrf.mxu0 }
 0x2dc   : > { %v852_v45 = vpop.f32.mrf.mxu0 }
 0x2de   : > { %v3647_v46 = vpop.f32.mrf.mxu0 }
 0x2e5   : > { %v4901_v47 = vpop.f32.mrf.mxu1  ;;  %v4903_v48 = vpop.f32.mrf.mxu0 }
 0x2e7   : > { %v3632_v49 = vpop.f32.mrf.mxu1  ;;  %v3658_v50 = vpop.f32.mrf.mxu0 }
 0x2e9   : > { %v760_v51 = vpop.f32.mrf.mxu1  ;;  %v958_v52 = vpop.f32.mrf.mxu0 }
 0x2eb   : > { %v3633_v53 = vpop.f32.mrf.mxu1  ;;  %v3659_v54 = vpop.f32.mrf.mxu0 }
 0x2ed   : > { %v801_v55 = vpop.f32.mrf.mxu1  ;;  %v1068_v56 = vpop.f32.mrf.mxu0 }
 0x2ee   : > { %v1075_v57 = vmul.f32 %v1068_v56, %v1068_v56  ;;  %v874_v18 = vpack.c.bf16 %v801_v55, %v801_v55 }
 0x2ef   : > { %v3638_v58 = vpop.f32.mrf.mxu1  ;;  %v3674_v59 = vpop.f32.mrf.mxu0 }
 0x2f0   : > { %v1076_v60 = vsel %vm700_vm2, %v1075_v57, 0.0  ;;  %v4918_v22 = vsel %vm1260_vm3, %v874_v18, 0 }
 0x2f1   : > { %v804_v61 = vpop.f32.mrf.mxu1  ;;  %1077 = vadd.xlane.f32.xlu1 %v1076_v60  ;;  %v1071_v62 = vpop.f32.mrf.mxu0 }
 0x2f3   : > { %v3639_v63 = vpop.f32.mrf.mxu1  ;;  %v3675_v1 = vpop.f32.mrf.mxu0 }
 0x2f5   : > { %v4906_v2 = vpop.f32.mrf.mxu1 }
 0x2f7   : > { %v3652_v3 = vpop.f32.mrf.mxu1 }
 0x2f9   : > { %v915_v4 = vpop.f32.mrf.mxu1 }
 0x2fb   : > { %v3653_v5 = vpop.f32.mrf.mxu1 }
 0x2fd   : > { %v4910_v6 = vpop.f32.mrf.mxu1 }
 0x2ff   : > { %v3666_v9 = vpop.f32.mrf.mxu1 }
 0x301   : > { %v1004_v10 = vpop.f32.mrf.mxu1 }
 0x302   : > { %856 = vrot.lane.b32.xlu1 %v4897_v43, %s4491_s30 }
 0x303   : > { %v3667_v11 = vpop.f32.mrf.mxu1 }
 0x34b   : > { %v860_v24 = vpop.permute.xlu0 %859 }
 0x37a   : > { %v1078_v12 = vpop.xlane.xlu1 %1077 }
 0x37b   : > { %v1079_v13 = vmul.f32 0.0625, %v1078_v12 }
 0x37d   : > { %v1080_v14 = vadd.f32 1e-06, %v1079_v13 }
 0x37e   : > { %v857_v23 = vpop.permute.xlu1 %856 }
 0x37f   : > { %4105 = vrsqrt.f32 %v1080_v14  ;;  %v863_v26 = vsel %vm862_vm4, %v857_v23, %v860_v24  ;;  %v1024_v14 = vpack.c.bf16 %v4903_v48, %v4903_v48 }
 0x380   : > { %v865_v33 = vmul.f32 %v863_v26, %v4933_v25 }
 0x382   : > { %v866_v41 = vadd.f32 %v865_v33, %v864_v37 }
 0x38c   : > { %v4106_v15 = vpop.eup %4105 }
 0x38d   : > { %v1082_v17 = vmul.f32 %v4106_v15, %v1068_v56  ;;  %v4990_v15 = vsel %vm1260_vm3, %v1024_v14, 0 }
 0x38f   : > { %v1089_v19 = vmul.f32 %v4912_v16, %v1082_v17 }
 0x391   : > { %v4915_v21 = vpack.c.bf16 %v1089_v19, %v1089_v19 }
 0x393   : > { %3679 = vmatmul.mubr.msk.bf16.vlgmr.msra.gmra.mxu1 %vm700_vm2, %v4915_v21  ;;  %3685 = vmatmul.mubr.msk.bf16.vlgmr.msra.gmra.mxu0 %vm700_vm2, %v4915_v21 }
 0x394   : > { %3695 = vmatpush3.bf16.msra.mxu0 %v4918_v22  ;;  %3690 = vmatprep.mubr.msk.bf16.mxu1 %vm4486_vm0, %v4485_v0 }
 0x395   : > { %3696 = vmatprep.mubr.msk.bf16.mxu0 %vm4486_vm0, %v4485_v0  ;;  %3706 = vmatprep.subr.bf16.mxu0 %v4485_v0 }
 0x453   : > { %v1131_v28 = vpop.f32.mrf.mxu1  ;;  %v1175_v29 = vpop.f32.mrf.mxu0 }
 0x454   : > { %1182 = vrot.lane.b32.xlu0 %v1175_v29, %s4491_s30  ;;  %v1189_v46 = vmul.f32 %v1175_v29, %v4940_v30 }
 0x455   : > { %v3680_v31 = vpop.f32.mrf.mxu1  ;;  %v3686_v32 = vpop.f32.mrf.mxu0 }
 0x457   : > { %v1134_v35 = vpop.f32.mrf.mxu1  ;;  %v1178_v36 = vpop.f32.mrf.mxu0 }
 0x458   : > { %1185 = vrot.lane.b32.xlu0 %v1175_v29, %s4490_s26  ;;  %v1015_v35 = vmul.f32 %v4910_v6, %v4940_v30 }
 0x459   : > { %v3681_v38 = vpop.f32.mrf.mxu1  ;;  %v3687_v40 = vpop.f32.mrf.mxu0 }
 0x45c   : > { %868 = vrot.lane.b32.xlu0 %v866_v41, %s4492_s8 }
 0x4c6   : > { %v1183_v42 = vpop.permute.xlu0 %1182 }
 0x4ca   : > { %v1186_v44 = vpop.permute.xlu0 %1185 }
 0x4cb   : > { %v1188_v45 = vsel %vm862_vm4, %v1183_v42, %v1186_v44 }
 0x4cc   : > { %v1190_v49 = vmul.f32 %v1188_v45, %v4933_v25 }
 0x4ce   : > { %v869_v50 = vpop.permute.xlu0 %868  ;;  %v1191_v51 = vadd.f32 %v1190_v49, %v1189_v46 }
 0x4cf   : > { %v872_v43 = vsel %vm871_vm5, %v4901_v47, %v869_v50 }
 0x4d0   : > { %v873_v52 = vpack.c.bf16 %v872_v43, %v872_v43  ;;  %1193 = vrot.lane.b32.xlu1 %v1191_v51, %s4492_s8 }
 0x4d2   : > { %v4954_v53 = vsel %vm700_vm2, %v873_v52, 0 }
 0x4d3   : > { %3689 = vmatpush3.bf16.xpose.msra.mxu1 %v4954_v53 }
 0x4d4   : > { %3700 = vmatprep.subr.bf16.mxu1 %v4485_v0 }
 0x542   : > { %v1194_v54 = vpop.permute.xlu1 %1193 }
 0x543   : > { %v1196_v55 = vsel %vm871_vm5, %v1131_v28, %v1194_v54 }
 0x544   : > { %v1197_v56 = vmul.f32 0.25, %v1196_v55 }
 0x546   : > { %v1198_v57 = vpack.c.bf16 %v1197_v56, %v1197_v56 }
 0x548   : > { %3691 = vmatmul.mubr.msk.bf16.vlgmr.msra.gmra.mxu1 %vm700_vm2, %v1198_v57 }
 0x549   : > { %3702 = vmatprep.mubr.msk.bf16.mxu1 %vm4486_vm0, %v4485_v0 }
 0x608   : > { %v1239_v47 = vpop.f32.mrf.mxu1 }
 0x609   : > { %v1245_v58 = vsel %vm871_vm5, %v1239_v47, -inf }
 0x60a   : > { %1246 = vmax.xlane.f32.xlu0 %v1245_v58  ;;  %v3692_v59 = vpop.f32.mrf.mxu1 }
 0x60c   : > { %v1242_v60 = vpop.f32.mrf.mxu1 }
 0x60e   : > { %v3693_v61 = vpop.f32.mrf.mxu1 }
 0x620   : > { %1347 = vrot.lane.b32.xlu0 %v4834_v20, %s4488_s19  ;;  %s4494_s19 = smov 64  }
 0x624   : > { %1008 = vrot.lane.b32.xlu0 %v4910_v6, %s4491_s30 }
 0x693   : > { %v1247_v62 = vpop.xlane.xlu0 %1246 }
 0x694   : > { %v1248_v63 = vsub.f32 %v1239_v47, %v1247_v62 }
 0x696   : > { %v1249_v1 = vmul.f32 1.442695, %v1248_v63 }
 0x697   : > { %v4980_v13 = vpop.permute.xlu0 %1347 }
 0x698   : > { %4107 = vpow2.f32 %v1249_v1 }
 0x69b   : > { %v1009_v28 = vpop.permute.xlu0 %1008 }
 0x6a5   : > { %v4108_v3 = vpop.eup %4107 }
 0x6a6   : > { %v1251_v4 = vsel %vm871_vm5, %v4108_v3, 0.0 }
 0x6a7   : > { %1252 = vadd.xlane.f32.xlu1 %v1251_v4 }
 0x6b8   : > { %1304 = vrot.lane.b32.xlu1 %v4834_v20, %s4487_s20 }
 0x6bc   : > { %1011 = vrot.lane.b32.xlu1 %v4910_v6, %s4490_s26 }
 0x730   : > { %v1253_v5 = vpop.xlane.xlu1 %1252 }
 0x731   : > { %4109 = vrcp.f32 %v1253_v5 }
 0x734   : > { %v4972_v9 = vpop.permute.xlu1 %1304 }
 0x735   : > { %3701 = vmatpush3.bf16.msra.mxu1 %v4972_v9 }
 0x736   : > { %3712 = vmatprep.subr.bf16.mxu1 %v4485_v0 }
 0x738   : > { %3703 = vmatmul.mubr.msk.bf16.vlgmr.msra.gmra.mxu1 %vm700_vm2, %v4915_v21  ;;  %v1012_v48 = vpop.permute.xlu1 %1011 }
 0x739   : > { %3714 = vmatprep.mubr.msk.bf16.mxu1 %vm4486_vm0, %v4485_v0  ;;  %v1014_v29 = vsel %vm862_vm4, %v1009_v28, %v1012_v48 }
 0x73a   : > { %v1016_v32 = vmul.f32 %v1014_v29, %v4933_v25 }
 0x73c   : > { %v1017_v37 = vadd.f32 %v1016_v32, %v1015_v35 }
 0x73e   : > { %v4110_v10 = vpop.eup %4109 }
 0x73f   : > { %v1255_v11 = vmul.f32 %v4110_v10, %v4108_v3 }
 0x741   : > { %v1256_v12 = vpack.c.bf16 %v1255_v11, %v1255_v11  ;;  %v1566_v11 = vld [vmem:[%s5452_s12 + $0x10] sm:$0xff] }
 0x743   : > { %3697 = vmatmul.mubr.msk.bf16.vlgmr.msra.gmra.mxu0 %vm871_vm5, %v1256_v12  ;;  %v1567_v12 = vld [vmem:[%s5452_s12 + $0x18] sm:$0xff] }
 0x744   : > { %3707 = vmatpush3.bf16.msra.mxu0 %v4980_v13  ;;  %3708 = vmatprep.mubr.msk.bf16.mxu0 %vm4486_vm0, %v4485_v0  ;;  %v5033_v14 = vpack.c.bf16 %v1567_v12, %v1566_v11 }
 0x745   : > { %3718 = vmatprep.subr.bf16.mxu0 %v4485_v0 }
 0x74b   : > { %3709 = vmatmul.mubr.msk.bf16.vlgmr.msra.gmra.mxu0 %vm700_vm2, %v4915_v21 }
 0x74c   : > { %3719 = vmatpush3.bf16.msra.mxu0 %v4990_v15  ;;  %3720 = vmatprep.mubr.msk.bf16.mxu0 %vm4486_vm0, %v4485_v0 }
 0x74d   : > { %3730 = vmatprep.subr.bf16.mxu0 %v4485_v0 }
 0x7f8   : > { %v1341_v17 = vpop.f32.mrf.mxu1 }
 0x7fa   : > { %v3704_v18 = vpop.f32.mrf.mxu1 }
 0x7fb   : > { %v1565_v18 = vld [vmem:[%s5452_s12 + $0x8] sm:$0xff] }
 0x7fc   : > { %v1344_v19 = vpop.f32.mrf.mxu1 }
 0x7fd   : > { %v1517_v19 = vld [vmem:[#allocation11] sm:$0xff] }
 0x7fe   : > { %v3705_v23 = vpop.f32.mrf.mxu1 }
 0x7ff   : > { %v1518_v23 = vld [vmem:[#allocation11 + $0x8] sm:$0xff] }
 0x803   : > { %v4998_v24 = vpop.f32.mrf.mxu0 }
 0x805   : > { %v3698_v26 = vpop.f32.mrf.mxu0 }
 0x806   : > { %v5046_v26 = vpack.c.bf16 %v1518_v23, %v1517_v19 }
 0x807   : > { %v1301_v31 = vpop.f32.mrf.mxu0 }
 0x809   : > { %v3699_v21 = vpop.f32.mrf.mxu0 }
 0x80b   : > { %v1384_v33 = vpop.f32.mrf.mxu0 }
 0x80c   : > { %1394 = vrot.lane.b32.xlu1 %v1384_v33, %s4490_s26  ;;  %1391 = vrot.lane.b32.xlu0 %v1384_v33, %s4491_s30  ;;  %v1398_v45 = vmul.f32 %v1384_v33, %v4940_v30 }
 0x80d   : > { %v3710_v36 = vpop.f32.mrf.mxu0 }
 0x80f   : > { %v1387_v38 = vpop.f32.mrf.mxu0 }
 0x810   : > { %1019 = vrot.lane.b32.xlu0 %v1017_v37, %s4492_s8 }
 0x811   : > { %v3711_v40 = vpop.f32.mrf.mxu0 }
 0x87e   : > { %v1395_v41 = vpop.permute.xlu1 %1394  ;;  %v1392_v42 = vpop.permute.xlu0 %1391 }
 0x87f   : > { %v1397_v44 = vsel %vm862_vm4, %v1392_v42, %v1395_v41 }
 0x880   : > { %v1399_v46 = vmul.f32 %v1397_v44, %v4933_v25 }
 0x882   : > { %v1020_v49 = vpop.permute.xlu0 %1019  ;;  %v1400_v6 = vadd.f32 %v1399_v46, %v1398_v45 }
 0x883   : > { %v1022_v50 = vsel %vm871_vm5, %v4906_v2, %v1020_v49 }
 0x884   : > { %v1023_v51 = vpack.c.bf16 %v1022_v50, %v1022_v50  ;;  %1402 = vrot.lane.b32.xlu1 %v1400_v6, %s4492_s8 }
 0x886   : > { %v5014_v43 = vsel %vm700_vm2, %v1023_v51, 0 }
 0x887   : > { %3713 = vmatpush3.bf16.xpose.msra.mxu1 %v5014_v43 }
 0x888   : > { %3724 = vmatprep.subr.bf16.mxu1 %v4485_v0 }
 0x8f6   : > { %v1403_v52 = vpop.permute.xlu1 %1402 }
 0x8f7   : > { %v1405_v54 = vsel %vm871_vm5, %v1341_v17, %v1403_v52  ;;  %v1564_v17 = vld [vmem:[%s5452_s12] sm:$0xff] }
 0x8f8   : > { %v1406_v55 = vmul.f32 0.25, %v1405_v54  ;;  %v5044_v48 = vpack.c.bf16 %v1565_v18, %v1564_v17 }
 0x8fa   : > { %v1407_v56 = vpack.c.bf16 %v1406_v55, %v1406_v55 }
 0x8fc   : > { %3715 = vmatmul.mubr.msk.bf16.vlgmr.msra.gmra.mxu1 %vm700_vm2, %v1407_v56 }
 0x8fd   : > { %3726 = vmatprep.mubr.msk.bf16.mxu1 %vm4486_vm0, %v4485_v0  ;;  %3725 = vmatpush3.bf16.msra.mxu1 %v5046_v26 }
 0x8fe   : > { %3738 = vmatprep.subr.bf16.mxu1 %v4485_v0 }
 0x9bc   : > { %v1448_v2 = vpop.f32.mrf.mxu1 }
 0x9bd   : > { %v1454_v57 = vsel %vm871_vm5, %v1448_v2, -inf }
 0x9be   : > { %1455 = vmax.xlane.f32.xlu0 %v1454_v57  ;;  %v3716_v47 = vpop.f32.mrf.mxu1 }
 0x9c0   : > { %v1451_v58 = vpop.f32.mrf.mxu1 }
 0x9c2   : > { %v3717_v59 = vpop.f32.mrf.mxu1 }
 0xa47   : > { %v1456_v60 = vpop.xlane.xlu0 %1455 }
 0xa48   : > { %v1457_v61 = vsub.f32 %v1448_v2, %v1456_v60 }
 0xa4a   : > { %v1458_v62 = vmul.f32 1.442695, %v1457_v61 }
 0xa4c   : > { %4111 = vpow2.f32 %v1458_v62 }
 0xa59   : > { %v4112_v63 = vpop.eup %4111 }
 0xa5a   : > { %v1460_v1 = vsel %vm871_vm5, %v4112_v63, 0.0 }
 0xa5b   : > { %1461 = vadd.xlane.f32.xlu1 %v1460_v1 }
 0xa6c   : > { %1615 = vrot.lane.b32.xlu1 %v5033_v14, %s4493_s17 }
 0xa70   : > { %1661 = vrot.lane.b32.xlu1 %v5033_v14, %s4494_s19 }
 0xae4   : > { %v1462_v3 = vpop.xlane.xlu1 %1461 }
 0xae5   : > { %4113 = vrcp.f32 %v1462_v3 }
 0xae8   : > { %v5060_v36 = vpop.permute.xlu1 %1615 }
 0xaec   : > { %v5084_v2 = vpop.permute.xlu1 %1661 }
 0xaf2   : > { %v4114_v4 = vpop.eup %4113 }
 0xaf3   : > { %v1464_v5 = vmul.f32 %v4114_v4, %v4112_v63 }
 0xaf5   : > { %v1465_v10 = vpack.c.bf16 %v1464_v5, %v1464_v5 }
 0xaf7   : > { %3721 = vmatmul.mubr.msk.bf16.vlgmr.msra.gmra.mxu0 %vm871_vm5, %v1465_v10 }
 0xaf8   : > { %3734 = vmatprep.mubr.msk.bf16.mxu0 %vm4486_vm0, %v4485_v0  ;;  %3731 = vmatpush3.bf16.msra.mxu0 %v5033_v14 }
 0xaf9   : > { %3732 = vmatprep.subr.bf16.mxu0 %v4485_v0 }
 0xafc   : > { %3733 = vmatpush3.bf16.msra.mxu0 %v5044_v48 }
 0xafd   : > { %3746 = vmatprep.subr.bf16.mxu0 %v4485_v0 }
 0xaff   : > { %3735 = vmatmul.mubr.msk.bf16.vlgmr.msra.gmra.mxu0 %vm654_vm1, %v4822_v8 }
 0xb00   : > { %3750 = vmatprep.mubr.msk.bf16.mxu0 %vm4486_vm0, %v4485_v0  ;;  %3747 = vmatpush3.bf16.msra.mxu0 %v5084_v2 }
 0xb01   : > { %3748 = vmatprep.subr.bf16.mxu0 %v4485_v0 }
 0xbb7   : > { %v1506_v28 = vpop.f32.mrf.mxu0 }
 0xbb8   : > { %1513 = vrot.lane.b32.xlu0 %v1506_v28, %s4492_s8 }
 0xbb9   : > { %v3722_v29 = vpop.f32.mrf.mxu0 }
 0xbbb   : > { %v1509_v31 = vpop.f32.mrf.mxu0 }
 0xbbc   : > { %1613 = vrot.lane.b32.xlu0 %v5044_v48, %s4493_s17  ;;  %s4499_s17 = smov 16  }
 0xbbd   : > { %v3723_v21 = vpop.f32.mrf.mxu0 }
 0xbc0   : > { %1659 = vrot.lane.b32.xlu0 %v5044_v48, %s4494_s19  ;;  %s3260_s19 = scalar_lea.sflag [#allocation4], %s4770_s11 }
 0xc2a   : > { %v1514_v32 = vpop.permute.xlu0 %1513 }
 0xc2b   : > { %v1516_v33 = vsel %vm871_vm5, %v4998_v24, %v1514_v32  ;;  %v1604_v24 = vpop.f32.mrf.mxu0 }
 0xc2c   : > { %v1519_v35 = vpack.c.bf16 %v1516_v33, %v1516_v33  ;;  %v1610_v51 = vmul.f32 0.25, %v1604_v24 }
 0xc2d   : > { %v3736_v38 = vpop.f32.mrf.mxu0 }
 0xc2e   : > { %3727 = vmatmul.mubr.msk.bf16.vlgmr.msra.gmra.mxu1 %vm700_vm2, %v1519_v35  ;;  %v5067_v37 = vpop.permute.xlu0 %1613  ;;  %v1707_v56 = vpack.c.bf16 %v1610_v51, %v1610_v51 }
 0xc2f   : > { %3739 = vmatpush3.bf16.msra.mxu1 %v5060_v36  ;;  %3742 = vmatprep.mubr.msk.bf16.mxu1 %vm4486_vm0, %v4485_v0  ;;  %v1607_v40 = vpop.f32.mrf.mxu0 }
 0xc30   : > { %3740 = vmatprep.subr.bf16.mxu1 %v4485_v0 }
 0xc31   : > { %v3737_v41 = vpop.f32.mrf.mxu0 }
 0xc32   : > { %v5088_v57 = vpop.permute.xlu0 %1659 }
 0xc33   : > { %3741 = vmatpush3.bf16.msra.mxu1 %v5067_v37  ;;  %3749 = vmatpush3.bf16.msra.mxu0 %v5088_v57 }
 0xc34   : > { %3754 = vmatprep.subr.bf16.mxu1 %v4485_v0  ;;  %3760 = vmatprep.subr.bf16.mxu0 %v4485_v0 }
 0xc36   : > { %3743 = vmatmul.mubr.msk.bf16.vlgmr.msra.gmra.mxu1 %vm654_vm1, %v4822_v8  ;;  %3751 = vmatmul.mubr.msk.bf16.vlgmr.msra.gmra.mxu0 %vm654_vm1, %v4822_v8 }
 0xc37   : > { %3756 = vmatprep.mubr.msk.bf16.mxu1 %vm4486_vm0, %v4485_v0  ;;  %3762 = vmatprep.mubr.msk.bf16.mxu0 %vm4486_vm0, %v4485_v0 }
 0xcee   : > { %v5077_v42 = vpop.f32.mrf.mxu1 }
 0xcf0   : > { %v3728_v44 = vpop.f32.mrf.mxu1 }
 0xcf2   : > { %v1561_v45 = vpop.f32.mrf.mxu1 }
 0xcf4   : > { %v3729_v46 = vpop.f32.mrf.mxu1 }
 0xcf6   : > { %v1653_v49 = vpop.f32.mrf.mxu1  ;;  %v1699_v5 = vpop.f32.mrf.mxu0 }
 0xcf7   : > { %v1705_v6 = vpack.c.bf16 %v1653_v49, %v1653_v49  ;;  %v1706_v11 = vpack.c.bf16 %v1699_v5, %v1699_v5  ;;  %v5155_v5 = vld [vmem:[#allocation13 + $0x1] ss:$0 sm:$0xff] }
 0xcf8   : > { %v3744_v50 = vpop.f32.mrf.mxu1  ;;  %v3752_v12 = vpop.f32.mrf.mxu0 }
 0xcf9   : > { %v1712_v52 = vsel %vm700_vm2, %v1705_v6, 0  ;;  %v1770_v17 = vsel %vm1260_vm3, %v1706_v11, 0  ;;  %v2139_v11 = vmul.f32 %v5155_v5, %v4817_v7  ;;  %v5159_v12 = vld [vmem:[#allocation13] ss:$0 sm:$0xff] }
 0xcfa   : > { %v1656_v54 = vpop.f32.mrf.mxu1  ;;  %3755 = vmatpush3.bf16.xpose.msra.mxu1 %v1712_v52  ;;  %v1702_v18 = vpop.f32.mrf.mxu0  ;;  %3761 = vmatpush3.bf16.msra.mxu0 %v1770_v17 }
 0xcfb   : > { %3766 = vmatprep.subr.bf16.mxu1 %v4485_v0  ;;  %3774 = vmatprep.subr.bf16.mxu0 %v4485_v0  ;;  %v2140_v18 = vsel %vm654_vm1, %v2139_v11, 0.0 }
 0xcfc   : > { %v3745_v55 = vpop.f32.mrf.mxu1  ;;  %v3753_v23 = vpop.f32.mrf.mxu0 }
 0xcfd   : > { %v2124_v23 = vmul.f32 %v5159_v12, %v4817_v7 }
 0xd01   : > { %3757 = vmatmul.mubr.msk.bf16.vlgmr.msra.gmra.mxu1 %vm700_vm2, %v1707_v56 }
 0xd02   : > { %3770 = vmatprep.mubr.msk.bf16.mxu1 %vm4486_vm0, %v4485_v0 }
 0xdc1   : > { %v1748_v47 = vpop.f32.mrf.mxu1 }
 0xdc2   : > { %v1754_v58 = vsel %vm871_vm5, %v1748_v47, -inf }
 0xdc3   : > { %1755 = vmax.xlane.f32.xlu1 %v1754_v58  ;;  %v3758_v59 = vpop.f32.mrf.mxu1 }
 0xdc5   : > { %v1751_v60 = vpop.f32.mrf.mxu1 }
 0xdc7   : > { %v3759_v61 = vpop.f32.mrf.mxu1 }
 0xdd4   : > { %1859 = vrot.lane.b32.xlu1 %v5044_v48, %s4495_s9 }
 0xdd8   : > { %1814 = vrot.lane.b32.xlu1 %v5033_v14, %s4487_s20 }
 0xe4c   : > { %v1756_v62 = vpop.xlane.xlu1 %1755 }
 0xe4d   : > { %v1757_v63 = vsub.f32 %v1748_v47, %v1756_v62 }
 0xe4f   : > { %v1758_v1 = vmul.f32 1.442695, %v1757_v63 }
 0xe50   : > { %v5101_v10 = vpop.permute.xlu1 %1859 }
 0xe51   : > { %4115 = vpow2.f32 %v1758_v1 }
 0xe54   : > { %v5104_v19 = vpop.permute.xlu1 %1814 }
 0xe55   : > { %3767 = vmatpush3.bf16.msra.mxu1 %v5104_v19 }
 0xe56   : > { %3768 = vmatprep.subr.bf16.mxu1 %v4485_v0 }
 0xe5e   : > { %v4116_v3 = vpop.eup %4115 }
 0xe5f   : > { %v1760_v4 = vsel %vm871_vm5, %v4116_v3, 0.0 }
 0xe60   : > { %1761 = vadd.xlane.f32.xlu0 %v1760_v4 }
 0xe76   : > { %1861 = vrot.lane.b32.xlu0 %v5033_v14, %s4495_s9 }
 0xe7a   : > { %1812 = vrot.lane.b32.xlu0 %v5044_v48, %s4487_s20  ;;  %s4496_s20 = smov 48  }
 0xe7b   : > { %1907 = vrot.lane.b32.xlu1 %v5033_v14, %s4496_s20 }
 0xe7e   : > { %1905 = vrot.lane.b32.xlu0 %v5044_v48, %s4496_s20 }
 0xee9   : > { %v1762_v28 = vpop.xlane.xlu0 %1761 }
 0xeea   : > { %4117 = vrcp.f32 %v1762_v28  ;;  %v2125_v28 = vsel %vm654_vm1, %v2124_v23, 0.0 }
 0xeed   : > { %v5112_v29 = vpop.permute.xlu0 %1861  ;;  %v5142_v47 = vpop.permute.xlu1 %1907 }
 0xef1   : > { %v5114_v31 = vpop.permute.xlu0 %1812 }
 0xef2   : > { %3769 = vmatpush3.bf16.msra.mxu1 %v5114_v31 }
 0xef3   : > { %3782 = vmatprep.subr.bf16.mxu1 %v4485_v0 }
 0xef5   : > { %3771 = vmatmul.mubr.msk.bf16.vlgmr.msra.gmra.mxu1 %vm654_vm1, %v4822_v8  ;;  %v5145_v58 = vpop.permute.xlu0 %1905 }
 0xef6   : > { %3786 = vmatprep.mubr.msk.bf16.mxu1 %vm4486_vm0, %v4485_v0  ;;  %3783 = vmatpush3.bf16.msra.mxu1 %v5142_v47 }
 0xef7   : > { %v4118_v21 = vpop.eup %4117  ;;  %3784 = vmatprep.subr.bf16.mxu1 %v4485_v0 }
 0xef8   : > { %v1764_v32 = vmul.f32 %v4118_v21, %v4116_v3 }
 0xefa   : > { %v1765_v33 = vpack.c.bf16 %v1764_v32, %v1764_v32  ;;  %3785 = vmatpush3.bf16.msra.mxu1 %v5145_v58 }
 0xefb   : > { %3796 = vmatprep.subr.bf16.mxu1 %v4485_v0 }
 0xefc   : > { %3763 = vmatmul.mubr.msk.bf16.vlgmr.msra.gmra.mxu0 %vm871_vm5, %v1765_v33 }
 0xefd   : > { %3775 = vmatpush3.bf16.msra.mxu0 %v5112_v29  ;;  %3778 = vmatprep.mubr.msk.bf16.mxu0 %vm4486_vm0, %v4485_v0 }
 0xefe   : > { %3776 = vmatprep.subr.bf16.mxu0 %v4485_v0  ;;  %3787 = vmatmul.mubr.msk.bf16.vlgmr.msra.gmra.mxu1 %vm654_vm1, %v4822_v8 }
 0xeff   : > { %3798 = vmatprep.mubr.msk.bf16.mxu1 %vm4486_vm0, %v4485_v0 }
 0xf01   : > { %3777 = vmatpush3.bf16.msra.mxu0 %v5101_v10 }
 0xf02   : > { %3790 = vmatprep.subr.bf16.mxu0 %v4485_v0 }
 0xf04   : > { %3779 = vmatmul.mubr.msk.bf16.vlgmr.msra.gmra.mxu0 %vm654_vm1, %v4822_v8 }
 0xf05   : > { %3792 = vmatprep.mubr.msk.bf16.mxu0 %vm4486_vm0, %v4485_v0 }
 0xfb5   : > { %v1852_v35 = vpop.f32.mrf.mxu1 }
 0xfb6   : > { %v1858_v51 = vmul.f32 0.25, %v1852_v35 }
 0xfb7   : > { %v3772_v24 = vpop.f32.mrf.mxu1 }
 0xfb8   : > { %v1953_v56 = vpack.c.bf16 %v1858_v51, %v1858_v51 }
 0xfb9   : > { %v1855_v38 = vpop.f32.mrf.mxu1 }
 0xfbb   : > { %v3773_v40 = vpop.f32.mrf.mxu1 }
 0xfbc   : > { %v5135_v41 = vpop.f32.mrf.mxu0 }
 0xfbe   : > { %v3764_v44 = vpop.f32.mrf.mxu0  ;;  %v1945_v21 = vpop.f32.mrf.mxu1 }
 0xfbf   : > { %v1952_v32 = vpack.c.bf16 %v1945_v21, %v1945_v21  ;;  %v5168_v44 = vld [vmem:[#allocation14] ss:$0 sm:$0xff] }
 0xfc0   : > { %v1809_v45 = vpop.f32.mrf.mxu0  ;;  %v3788_v33 = vpop.f32.mrf.mxu1 }
 0xfc1   : > { %v2016_v35 = vsel %vm1260_vm3, %v1952_v32, 0 }
 0xfc2   : > { %v3765_v46 = vpop.f32.mrf.mxu0  ;;  %3797 = vmatpush3.bf16.msra.mxu1 %v2016_v35  ;;  %v1948_v24 = vpop.f32.mrf.mxu1 }
 0xfc3   : > { %3810 = vmatprep.subr.bf16.mxu1 %v4485_v0 }
 0xfc4   : > { %v1899_v49 = vpop.f32.mrf.mxu0  ;;  %v3789_v38 = vpop.f32.mrf.mxu1 }
 0xfc5   : > { %v1951_v6 = vpack.c.bf16 %v1899_v49, %v1899_v49  ;;  %v4501_v38 = vmov 1  }
 0xfc6   : > { %v3780_v50 = vpop.f32.mrf.mxu0  ;;  %4099 = vset.pattern.permute.xlu1 %v4501_v38 }
 0xfc7   : > { %v1958_v52 = vsel %vm700_vm2, %v1951_v6, 0 }
 0xfc8   : > { %v1902_v54 = vpop.f32.mrf.mxu0  ;;  %3791 = vmatpush3.bf16.xpose.msra.mxu0 %v1958_v52 }
 0xfc9   : > { %3802 = vmatprep.subr.bf16.mxu0 %v4485_v0 }
 0xfca   : > { %v3781_v55 = vpop.f32.mrf.mxu0 }
 0xfcf   : > { %3793 = vmatmul.mubr.msk.bf16.vlgmr.msra.gmra.mxu0 %vm700_vm2, %v1953_v56  ;;  %v2066_v56 = vld [vmem:[%s5453_s13 + $0x18] sm:$0xff] }
 0xfd0   : > { %3806 = vmatprep.mubr.msk.bf16.mxu0 %vm4486_vm0, %v4485_v0 }
0x108f   : > { %v1994_v59 = vpop.f32.mrf.mxu0 }
0x1090   : > { %v2000_v60 = vsel %vm871_vm5, %v1994_v59, -inf }
0x1091   : > { %2001 = vmax.xlane.f32.xlu1 %v2000_v60  ;;  %v3794_v61 = vpop.f32.mrf.mxu0  ;;  %v2064_v60 = vld [vmem:[%s5453_s13 + $0x8] sm:$0xff] }
0x1093   : > { %v1997_v62 = vpop.f32.mrf.mxu0 }
0x1095   : > { %v3795_v63 = vpop.f32.mrf.mxu0 }
0x111a   : > { %v2002_v1 = vpop.xlane.xlu1 %2001 }
0x111b   : > { %v2003_v3 = vsub.f32 %v1994_v59, %v2002_v1  ;;  %v2063_v59 = vld [vmem:[%s5453_s13] sm:$0xff] }
0x111c   : > { %v5197_v61 = vpack.c.bf16 %v2064_v60, %v2063_v59 }
0x111d   : > { %v2004_v4 = vmul.f32 1.442695, %v2003_v3 }
0x111f   : > { %4119 = vpow2.f32 %v2004_v4 }
0x112c   : > { %v4120_v8 = vpop.eup %4119 }
0x112d   : > { %v2006_v17 = vsel %vm871_vm5, %v4120_v8, 0.0 }
0x112e   : > { %2007 = vadd.xlane.f32.xlu0 %v2006_v17 }
0x1132   : > { %2141 = vadd.xlane.f32.xlu0 %v2140_v18  ;;  %v4500_v18 = vmov 0  }
0x1133   : > { %4098 = vset.pattern.permute.xlu0 %v4500_v18 }
0x1136   : > { %2126 = vadd.xlane.f32.xlu0 %v2125_v28 }
0x11b7   : > { %v2008_v40 = vpop.xlane.xlu0 %2007 }
0x11b8   : > { %4121 = vrcp.f32 %v2008_v40 }
0x11bb   : > { %v2142_v45 = vpop.xlane.xlu0 %2141 }
0x11bc   : > { %v2143_v7 = vadd.f32 %v5168_v44, %v2142_v45 }
0x11be   : > { %2145 = vrot.lane.b32.xlu1 %v2143_v7, %s4497_s10 }
0x11bf   : > { %v2127_v50 = vpop.xlane.xlu0 %2126 }
0x11c0   : > { %v2134_v51 = vadd.f32 %v5168_v44, %v2127_v50 }
0x11c5   : > { %v4122_v46 = vpop.eup %4121 }
0x11c6   : > { %v2010_v49 = vmul.f32 %v4122_v46, %v4120_v8 }
0x11c8   : > { %v2011_v6 = vpack.c.bf16 %v2010_v49, %v2010_v49 }
0x11ca   : > { %3799 = vmatmul.mubr.msk.bf16.vlgmr.msra.gmra.mxu1 %vm871_vm5, %v2011_v6 }
0x11cb   : > { %3811 = vmatpush3.bf16.msra.mxu1 %v4855_v34  ;;  %3814 = vmatprep.mubr.msk.bf16.mxu1 %vm4486_vm0, %v4485_v0  ;;  %v2065_v34 = vld [vmem:[%s5453_s13 + $0x10] sm:$0xff] }
0x11cc   : > { %3812 = vmatprep.subr.bf16.mxu1 %v4485_v0 }
0x11cf   : > { %3813 = vmatpush3.bf16.msra.mxu1 %v4866_v39  ;;  %v5187_v39 = vpack.c.bf16 %v2066_v56, %v2065_v34  ;;  %v4155_v34 = vld [vmem:[%s4776_s4] sm:$0xff]  ;;  %s3500_s4 = sshll.u32 %s4609_s27, 7  ;;  %s4502_s27 = smov [#allocation17]  }
0x11d0   : > { %3824 = vmatprep.subr.bf16.mxu1 %v4485_v0 }
0x11d1   : > { %3803 = vmatpush3.bf16.msra.mxu0 %v5187_v39 }
0x11d2   : > { %3804 = vmatprep.subr.bf16.mxu0 %v4485_v0 }
0x11d5   : > { %3805 = vmatpush3.bf16.msra.mxu0 %v5197_v61 }
0x11d6   : > { %3818 = vmatprep.subr.bf16.mxu0 %v4485_v0 }
0x1230   : > { %v2146_v52 = vpop.permute.xlu1 %2145 }
0x1231   : > { %v2148_v54 = vmax.f32 %v2134_v51, %v2146_v52 }
0x1233   : > { %v2149_v55 = vsub.f32 %v2134_v51, %v2148_v54  ;;  %2153 = vrot.lane.b32.xlu0 %v2148_v54, %s4498_s28  ;;  %v5216_v51 = vld [vmem:[%s5503_s15] ss:$0 sm:$0xff] }
0x1235   : > { %v2150_v32 = vmul.f32 1.442695, %v2149_v55 }
0x128a   : > { %v2052_v62 = vpop.f32.mrf.mxu1 }
0x128b   : > { %2059 = vrot.lane.b32.xlu1 %v2052_v62, %s4499_s17 }
0x128c   : > { %v3800_v63 = vpop.f32.mrf.mxu1 }
0x128e   : > { %v2055_v1 = vpop.f32.mrf.mxu1 }
0x1290   : > { %v3801_v3 = vpop.f32.mrf.mxu1 }
0x12a5   : > { %v2154_v4 = vpop.permute.xlu0 %2153 }
0x12a6   : > { %v2156_v11 = vsub.f32 %v2143_v7, %v2154_v4 }
0x12a8   : > { %v2157_v8 = vmul.f32 1.442695, %v2156_v11 }
0x12aa   : > { %4123 = vpow2.f32 %v2157_v8  ;;  %v3477_v8 = vld [vmem:[#allocation16] ss:$0 sm:$0xff] }
0x12ab   : > { %4125 = vpow2.f32 %v2150_v32 }
0x12b7   : > { %v4124_v17 = vpop.eup %4123 }
0x12b8   : > { %2160 = vrot.lane.b32.xlu1 %v4124_v17, %s4497_s10  ;;  %v4126_v33 = vpop.eup %4125 }
0x12fd   : > { %v2060_v23 = vpop.permute.xlu1 %2059 }
0x12fe   : > { %v2062_v28 = vsel %vm700_vm2, %v5135_v41, %v2060_v23 }
0x12ff   : > { %v2067_v21 = vpack.c.bf16 %v2062_v28, %v2062_v28 }
0x1301   : > { %3807 = vmatmul.mubr.msk.bf16.vlgmr.msra.gmra.mxu0 %vm654_vm1, %v2067_v21 }
0x1302   : > { %3819 = vmatpush3.bf16.msra.mxu0 %v4834_v20  ;;  %3820 = vmatprep.mubr.msk.bf16.mxu0 %vm4486_vm0, %v4485_v0 }
0x1303   : > { %3830 = vmatprep.subr.bf16.mxu0 %v4485_v0 }
0x132a   : > { %v2161_v35 = vpop.permute.xlu1 %2160 }
0x132b   : > { %v2163_v24 = vadd.f32 %v4126_v33, %v2161_v35 }
0x132d   : > { %4127 = vrcp.f32 %v2163_v24 }
0x133a   : > { %v4128_v41 = vpop.eup %4127 }
0x133b   : > { %2175 = vrot.lane.b32.xlu1 %v4128_v41, %s4498_s28  ;;  %v2166_v40 = vmul.f32 %v4128_v41, %v4126_v33 }
0x133d   : > { %2169 = vperm.xlu0 %4098, %v2166_v40  }
0x1341   : > { %4102 = vset.pattern.permute.xlu0 %v4501_v38 }
0x13ad   : > { %v2176_v20 = vpop.permute.xlu1 %2175 }
0x13ae   : > { %v2178_v45 = vmul.f32 %v4124_v17, %v2176_v20 }
0x13b0   : > { %2181 = vperm.xlu1 %4099, %v2178_v45  }
0x13b4   : > { %4100 = vset.pattern.permute.xlu1 %v4500_v18 }
0x13b8   : > { %v2170_v50 = vpop.permute.xlu0 %2169 }
0x13b9   : > { %v2172_v52 = vmul.f32 %v2170_v50, %v5077_v42 }
0x13bb   : > { %v2173_v56 = vadd.f32 %v4155_v34, %v2172_v52 }
0x13c1   : > { %v2114_v7 = vpop.f32.mrf.mxu0 }
0x13c2   : > { %v2115_v54 = vadd.f32 %v5216_v51, %v2114_v7 }
0x13c3   : > { %v3808_v46 = vpop.f32.mrf.mxu0 }
0x13c5   : > { %v2117_v49 = vpop.f32.mrf.mxu0 }
0x13c7   : > { %v3809_v6 = vpop.f32.mrf.mxu0 }
0x142b   : > { %v2182_v55 = vpop.permute.xlu1 %2181 }
0x142c   : > { %v2184_v59 = vmul.f32 %v2182_v55, %v2115_v54 }
0x142e   : > { %v2185_v60 = vadd.f32 %v2184_v59, %v2173_v56 }
0x1430   : > { %v2187_v62 = vmul.f32 %v2185_v60, %v2185_v60 }
0x1432   : > { %v2188_v63 = vsel %vm654_vm1, %v2187_v62, 0.0 }
0x1433   : > { %2189 = vadd.xlane.f32.xlu1 %v2188_v63 }
0x14bc   : > { %v2190_v1 = vpop.xlane.xlu1 %2189 }
0x14bd   : > { %v2192_v3 = vmul.f32 0.03125, %v2190_v1 }
0x14bf   : > { %v2193_v4 = vadd.f32 1e-06, %v2192_v3 }
0x14c1   : > { %4129 = vrsqrt.f32 %v2193_v4 }
0x14ce   : > { %v4130_v11 = vpop.eup %4129 }
0x14cf   : > { %v2195_v17 = vmul.f32 %v4130_v11, %v2185_v60 }
0x14d1   : > { %v5222_v18 = vmul.f32 %v3477_v8, %v2195_v17 }
0x14d3   : > { %v5226_v42 = vpack.c.bf16 %v5222_v18, %v5222_v18 }
0x14d5   : > { %3815 = vmatmul.mubr.msk.bf16.vlgmr.msra.gmra.mxu1 %vm654_vm1, %v5226_v42 }
0x14d6   : > { %3825 = vmatpush3.bf16.msra.mxu1 %v4847_v27  ;;  %3826 = vmatprep.mubr.msk.bf16.mxu1 %vm4486_vm0, %v4485_v0 }
0x14d7   : > { %3836 = vmatprep.subr.bf16.mxu1 %v4485_v0 }
0x1595   : > { %v2241_v23 = vpop.f32.mrf.mxu1 }
0x1596   : > { %v2247_v28 = vmul.f32 %v2241_v23, %v2241_v23 }
0x1597   : > { %v3816_v21 = vpop.f32.mrf.mxu1 }
0x1598   : > { %v2248_v32 = vsel %vm700_vm2, %v2247_v28, 0.0 }
0x1599   : > { %2249 = vadd.xlane.f32.xlu0 %v2248_v32  ;;  %v2244_v33 = vpop.f32.mrf.mxu1 }
0x159b   : > { %v3817_v35 = vpop.f32.mrf.mxu1 }
0x1622   : > { %v2250_v24 = vpop.xlane.xlu0 %2249 }
0x1623   : > { %v2251_v41 = vmul.f32 0.0625, %v2250_v24 }
0x1625   : > { %v2252_v40 = vadd.f32 1e-06, %v2251_v41 }
0x1627   : > { %4131 = vrsqrt.f32 %v2252_v40 }
0x1634   : > { %v4132_v20 = vpop.eup %4131 }
0x1635   : > { %v2254_v45 = vmul.f32 %v4132_v20, %v2241_v23 }
0x1637   : > { %v2255_v27 = vmul.f32 %v4912_v16, %v2254_v45 }
0x1639   : > { %v5236_v7 = vpack.c.bf16 %v2255_v27, %v2255_v27 }
0x163b   : > { %3821 = vmatmul.mubr.msk.bf16.vlgmr.msra.gmra.mxu0 %vm700_vm2, %v5236_v7  ;;  %3827 = vmatmul.mubr.msk.bf16.vlgmr.msra.gmra.mxu1 %vm700_vm2, %v5236_v7 }
0x163c   : > { %3831 = vmatpush3.bf16.xpose.msra.mxu0 %v4954_v53  ;;  %3837 = vmatpush3.bf16.msra.mxu1 %v4918_v22 }
0x163d   : > { %3832 = vmatprep.mubr.msk.bf16.mxu0 %vm4486_vm0, %v4485_v0  ;;  %3842 = vmatprep.subr.bf16.mxu0 %v4485_v0 }
0x163e   : > { %3838 = vmatprep.mubr.msk.bf16.mxu1 %vm4486_vm0, %v4485_v0  ;;  %3848 = vmatprep.subr.bf16.mxu1 %v4485_v0 }
0x16fb   : > { %v2294_v16 = vpop.f32.mrf.mxu0  ;;  %v2334_v46 = vpop.f32.mrf.mxu1 }
0x16fc   : > { %2344 = vrot.lane.b32.xlu1 %v2334_v46, %s4490_s26  ;;  %2341 = vrot.lane.b32.xlu0 %v2334_v46, %s4491_s30  ;;  %v2348_v56 = vmul.f32 %v2334_v46, %v4940_v30 }
0x16fd   : > { %v3822_v49 = vpop.f32.mrf.mxu0  ;;  %v3828_v53 = vpop.f32.mrf.mxu1 }
0x16ff   : > { %v2297_v6 = vpop.f32.mrf.mxu0  ;;  %v2337_v22 = vpop.f32.mrf.mxu1 }
0x1701   : > { %v3823_v50 = vpop.f32.mrf.mxu0  ;;  %v3829_v52 = vpop.f32.mrf.mxu1 }
0x176e   : > { %v2345_v54 = vpop.permute.xlu1 %2344  ;;  %v2342_v55 = vpop.permute.xlu0 %2341 }
0x176f   : > { %v2347_v34 = vsel %vm862_vm4, %v2342_v55, %v2345_v54 }
0x1770   : > { %v2349_v59 = vmul.f32 %v2347_v34, %v4933_v25 }
0x1772   : > { %v2350_v60 = vadd.f32 %v2349_v59, %v2348_v56 }
0x1774   : > { %2352 = vrot.lane.b32.xlu1 %v2350_v60, %s4492_s8 }
0x17e6   : > { %v2353_v62 = vpop.permute.xlu1 %2352 }
0x17e7   : > { %v2355_v63 = vsel %vm871_vm5, %v2294_v16, %v2353_v62 }
0x17e8   : > { %v2356_v1 = vmul.f32 0.25, %v2355_v63 }
0x17ea   : > { %v2357_v3 = vpack.c.bf16 %v2356_v1, %v2356_v1 }
0x17ec   : > { %3833 = vmatmul.mubr.msk.bf16.vlgmr.msra.gmra.mxu0 %vm700_vm2, %v2357_v3 }
0x17ed   : > { %3843 = vmatpush3.bf16.msra.mxu0 %v4972_v9  ;;  %3844 = vmatprep.mubr.msk.bf16.mxu0 %vm4486_vm0, %v4485_v0 }
0x17ee   : > { %3854 = vmatprep.subr.bf16.mxu0 %v4485_v0 }
0x17f4   : > { %3845 = vmatmul.mubr.msk.bf16.vlgmr.msra.gmra.mxu0 %vm700_vm2, %v5236_v7 }
0x17f5   : > { %3855 = vmatpush3.bf16.xpose.msra.mxu0 %v5014_v43  ;;  %3856 = vmatprep.mubr.msk.bf16.mxu0 %vm4486_vm0, %v4485_v0 }
0x17f6   : > { %3866 = vmatprep.subr.bf16.mxu0 %v4485_v0 }
0x18ac   : > { %v2395_v4 = vpop.f32.mrf.mxu0 }
0x18ad   : > { %v2401_v11 = vsel %vm871_vm5, %v2395_v4, -inf }
0x18ae   : > { %2402 = vmax.xlane.f32.xlu0 %v2401_v11  ;;  %v3834_v9 = vpop.f32.mrf.mxu0 }
0x18b0   : > { %v2398_v8 = vpop.f32.mrf.mxu0 }
0x18b2   : > { %v3835_v17 = vpop.f32.mrf.mxu0 }
0x18b4   : > { %v2490_v23 = vpop.f32.mrf.mxu0 }
0x18b6   : > { %v3846_v28 = vpop.f32.mrf.mxu0 }
0x18b8   : > { %v2493_v21 = vpop.f32.mrf.mxu0 }
0x18ba   : > { %v3847_v32 = vpop.f32.mrf.mxu0 }
0x1937   : > { %v2403_v33 = vpop.xlane.xlu0 %2402 }
0x1938   : > { %v2404_v35 = vsub.f32 %v2395_v4, %v2403_v33 }
0x193a   : > { %v2405_v24 = vmul.f32 1.442695, %v2404_v35 }
0x193c   : > { %4133 = vpow2.f32 %v2405_v24 }
0x1949   : > { %v4134_v43 = vpop.eup %4133 }
0x194a   : > { %v2407_v41 = vsel %vm871_vm5, %v4134_v43, 0.0 }
0x194b   : > { %2408 = vadd.xlane.f32.xlu1 %v2407_v41 }
0x19d4   : > { %v2409_v40 = vpop.xlane.xlu1 %2408 }
0x19d5   : > { %4135 = vrcp.f32 %v2409_v40 }
0x19e2   : > { %v4136_v20 = vpop.eup %4135 }
0x19e3   : > { %v2411_v45 = vmul.f32 %v4136_v20, %v4134_v43 }
0x19e5   : > { %v2412_v27 = vpack.c.bf16 %v2411_v45, %v2411_v45 }
0x19e7   : > { %3839 = vmatmul.mubr.msk.bf16.vlgmr.msra.gmra.mxu1 %vm871_vm5, %v2412_v27 }
0x19e8   : > { %3849 = vmatpush3.bf16.msra.mxu1 %v4980_v13  ;;  %3850 = vmatprep.mubr.msk.bf16.mxu1 %vm4486_vm0, %v4485_v0 }
0x19e9   : > { %3860 = vmatprep.subr.bf16.mxu1 %v4485_v0 }
0x19ef   : > { %3851 = vmatmul.mubr.msk.bf16.vlgmr.msra.gmra.mxu1 %vm700_vm2, %v5236_v7 }
0x19f0   : > { %3861 = vmatpush3.bf16.msra.mxu1 %v4990_v15  ;;  %3862 = vmatprep.mubr.msk.bf16.mxu1 %vm4486_vm0, %v4485_v0 }
0x19f1   : > { %3872 = vmatprep.subr.bf16.mxu1 %v4485_v0 }
0x1aa7   : > { %v5281_v16 = vpop.f32.mrf.mxu1 }
0x1aa9   : > { %v3840_v46 = vpop.f32.mrf.mxu1 }
0x1aaa   : > { %v3206_v46 = vmul.f32 %v5159_v12, %v5222_v18 }
0x1aab   : > { %v2453_v49 = vpop.f32.mrf.mxu1 }
0x1aac   : > { %v3207_v49 = vsel %vm654_vm1, %v3206_v46, 0.0 }
0x1aad   : > { %v3841_v13 = vpop.f32.mrf.mxu1 }
0x1aaf   : > { %v2530_v53 = vpop.f32.mrf.mxu1 }
0x1ab0   : > { %2540 = vrot.lane.b32.xlu1 %v2530_v53, %s4490_s26  ;;  %2537 = vrot.lane.b32.xlu0 %v2530_v53, %s4491_s30  ;;  %v2544_v54 = vmul.f32 %v2530_v53, %v4940_v30  ;;  %s642_s26 = scalar_lea.vmem [#allocation17], %s3433_s18  ;;  %s4396_s18 = sshll.u32 %s4502_s27, 4  ;;  %s4397_s18 = int_to_ptr.vmem [resolvable:$false] %s4396_s18 }
0x1ab1   : > { %v3852_v6 = vpop.f32.mrf.mxu1  ;;  %s3273_s30 = sshll.u32 %s642_s26, 4  ;;  %s4398_s20 = scalar_lea.vmem %s4397_s18, 256  ;;  %s3274_s30 = int_to_ptr.vmem [resolvable:$true] %s3273_s30 }
0x1ab2   : > { %s4392_s9 = scalar_lea.vmem %s3274_s30, 128  ;;  %p4399_p4 = scmp.lt.s32.totalorder %s3274_s30, %s4397_s18 }
0x1ab3   : > { %v2533_v22 = vpop.f32.mrf.mxu1  ;;  %p4393_p10 = scmp.ne.s32.totalorder %s3274_s30, %s4392_s9  ;;  %p4400_p6 = scmp.lt.s32.totalorder %s4398_s20, %s4392_s9 }
0x1ab5   : > { %v3853_v7 = vpop.f32.mrf.mxu1  ;;  %p4394_p1 = pnand %p4393_p10, %p5505_p11  ;;  %p4401_p12 = por %p4400_p6, %p4399_p4 }
0x1ab7   : > { %p4395_p3 = pneg %p4394_p1 }
0x1ab9   : > { %p4402_p13 = pnand %p4401_p12, %p4395_p3 }
0x1b22   : > { %v2541_v50 = vpop.permute.xlu1 %2540  ;;  %v2538_v15 = vpop.permute.xlu0 %2537 }
0x1b23   : > { %v2543_v52 = vsel %vm862_vm4, %v2538_v15, %v2541_v50 }
0x1b24   : > { %v2545_v55 = vmul.f32 %v2543_v52, %v4933_v25 }
0x1b26   : > { %v2546_v34 = vadd.f32 %v2545_v55, %v2544_v54 }
0x1b28   : > { %2548 = vrot.lane.b32.xlu0 %v2546_v34, %s4492_s8 }
0x1b9a   : > { %v2549_v56 = vpop.permute.xlu0 %2548 }
0x1b9b   : > { %v2551_v59 = vsel %vm871_vm5, %v2490_v23, %v2549_v56 }
0x1b9c   : > { %v2552_v60 = vmul.f32 0.25, %v2551_v59 }
0x1b9e   : > { %v2553_v62 = vpack.c.bf16 %v2552_v60, %v2552_v60 }
0x1ba0   : > { %3857 = vmatmul.mubr.msk.bf16.vlgmr.msra.gmra.mxu0 %vm700_vm2, %v2553_v62 }
0x1ba1   : > { %3867 = vmatpush3.bf16.msra.mxu0 %v5046_v26  ;;  %3868 = vmatprep.mubr.msk.bf16.mxu0 %vm4486_vm0, %v4485_v0 }
0x1ba2   : > { %3880 = vmatprep.subr.bf16.mxu0 %v4485_v0 }
0x1c60   : > { %v2591_v30 = vpop.f32.mrf.mxu0 }
0x1c61   : > { %v2597_v25 = vsel %vm871_vm5, %v2591_v30, -inf }
0x1c62   : > { %2598 = vmax.xlane.f32.xlu1 %v2597_v25  ;;  %v3858_v63 = vpop.f32.mrf.mxu0 }
0x1c64   : > { %v2594_v1 = vpop.f32.mrf.mxu0 }
0x1c66   : > { %v3859_v3 = vpop.f32.mrf.mxu0 }
0x1ceb   : > { %v2599_v4 = vpop.xlane.xlu1 %2598 }
0x1cec   : > { %v2600_v11 = vsub.f32 %v2591_v30, %v2599_v4 }
0x1cee   : > { %v2601_v9 = vmul.f32 1.442695, %v2600_v11 }
0x1cf0   : > { %4137 = vpow2.f32 %v2601_v9 }
0x1cfd   : > { %v4138_v8 = vpop.eup %4137 }
0x1cfe   : > { %v2603_v17 = vsel %vm871_vm5, %v4138_v8, 0.0 }
0x1cff   : > { %2604 = vadd.xlane.f32.xlu0 %v2603_v17 }
0x1d88   : > { %v2605_v26 = vpop.xlane.xlu0 %2604 }
0x1d89   : > { %4139 = vrcp.f32 %v2605_v26 }
0x1d96   : > { %v4140_v23 = vpop.eup %4139 }
0x1d97   : > { %v2607_v28 = vmul.f32 %v4140_v23, %v4138_v8 }
0x1d99   : > { %v2608_v21 = vpack.c.bf16 %v2607_v28, %v2607_v28 }
0x1d9b   : > { %3863 = vmatmul.mubr.msk.bf16.vlgmr.msra.gmra.mxu1 %vm871_vm5, %v2608_v21 }
0x1d9c   : > { %3873 = vmatpush3.bf16.msra.mxu1 %v5033_v14  ;;  %3876 = vmatprep.mubr.msk.bf16.mxu1 %vm4486_vm0, %v4485_v0 }
0x1d9d   : > { %3874 = vmatprep.subr.bf16.mxu1 %v4485_v0 }
0x1da0   : > { %3875 = vmatpush3.bf16.msra.mxu1 %v5044_v48 }
0x1da1   : > { %3888 = vmatprep.subr.bf16.mxu1 %v4485_v0 }
0x1da3   : > { %3877 = vmatmul.mubr.msk.bf16.vlgmr.msra.gmra.mxu1 %vm654_vm1, %v5226_v42 }
0x1da4   : > { %3889 = vmatpush3.bf16.msra.mxu1 %v5084_v2  ;;  %3892 = vmatprep.mubr.msk.bf16.mxu1 %vm4486_vm0, %v4485_v0 }
0x1da5   : > { %3890 = vmatprep.subr.bf16.mxu1 %v4485_v0 }
0x1da8   : > { %3891 = vmatpush3.bf16.msra.mxu1 %v5088_v57 }
0x1da9   : > { %3902 = vmatprep.subr.bf16.mxu1 %v4485_v0 }
0x1dab   : > { %3893 = vmatmul.mubr.msk.bf16.vlgmr.msra.gmra.mxu1 %vm654_vm1, %v5226_v42 }
0x1dac   : > { %3904 = vmatprep.mubr.msk.bf16.mxu1 %vm4486_vm0, %v4485_v0 }
0x1e5b   : > { %v2646_v14 = vpop.f32.mrf.mxu1 }
0x1e5c   : > { %2653 = vrot.lane.b32.xlu0 %v2646_v14, %s4492_s8 }
0x1e5d   : > { %v3864_v48 = vpop.f32.mrf.mxu1 }
0x1e5f   : > { %v2649_v2 = vpop.f32.mrf.mxu1 }
0x1e61   : > { %v3865_v32 = vpop.f32.mrf.mxu1 }
0x1e63   : > { %v2735_v33 = vpop.f32.mrf.mxu1 }
0x1e65   : > { %v3878_v35 = vpop.f32.mrf.mxu1 }
0x1e67   : > { %v2738_v24 = vpop.f32.mrf.mxu1 }
0x1e69   : > { %v3879_v43 = vpop.f32.mrf.mxu1 }
0x1e6b   : > { %v2816_v41 = vpop.f32.mrf.mxu1 }
0x1e6c   : > { %v2823_v57 = vpack.c.bf16 %v2816_v41, %v2816_v41 }
0x1e6d   : > { %v3894_v40 = vpop.f32.mrf.mxu1 }
0x1e6e   : > { %v2887_v20 = vsel %vm1260_vm3, %v2823_v57, 0 }
0x1e6f   : > { %v2819_v45 = vpop.f32.mrf.mxu1  ;;  %3903 = vmatpush3.bf16.msra.mxu1 %v2887_v20 }
0x1e70   : > { %3916 = vmatprep.subr.bf16.mxu1 %v4485_v0 }
0x1e71   : > { %v3895_v27 = vpop.f32.mrf.mxu1 }
0x1e7b   : > { %3208 = vadd.xlane.f32.xlu0 %v3207_v49 }
0x1ece   : > { %v2654_v13 = vpop.permute.xlu0 %2653 }
0x1ecf   : > { %v2656_v53 = vsel %vm871_vm5, %v5281_v16, %v2654_v13 }
0x1ed0   : > { %v2657_v6 = vpack.c.bf16 %v2656_v53, %v2656_v53 }
0x1ed2   : > { %3869 = vmatmul.mubr.msk.bf16.vlgmr.msra.gmra.mxu0 %vm700_vm2, %v2657_v6 }
0x1ed3   : > { %3881 = vmatpush3.bf16.msra.mxu0 %v5060_v36  ;;  %3884 = vmatprep.mubr.msk.bf16.mxu0 %vm4486_vm0, %v4485_v0 }
0x1ed4   : > { %3882 = vmatprep.subr.bf16.mxu0 %v4485_v0 }
0x1ed7   : > { %3883 = vmatpush3.bf16.msra.mxu0 %v5067_v37  ;;  %v2741_v37 = vmul.f32 0.25, %v2735_v33 }
0x1ed8   : > { %3896 = vmatprep.subr.bf16.mxu0 %v4485_v0 }
0x1ed9   : > { %v2824_v34 = vpack.c.bf16 %v2741_v37, %v2741_v37 }
0x1eda   : > { %3885 = vmatmul.mubr.msk.bf16.vlgmr.msra.gmra.mxu0 %vm654_vm1, %v5226_v42 }
0x1edb   : > { %3898 = vmatprep.mubr.msk.bf16.mxu0 %vm4486_vm0, %v4485_v0 }
0x1f92   : > { %v5335_v12 = vpop.f32.mrf.mxu0 }
0x1f94   : > { %v3870_v16 = vpop.f32.mrf.mxu0 }
0x1f96   : > { %v2698_v22 = vpop.f32.mrf.mxu0 }
0x1f97   : > { %v3211_v22 = vmul.f32 %v5155_v5, %v5222_v18 }
0x1f98   : > { %v3871_v36 = vpop.f32.mrf.mxu0 }
0x1f9a   : > { %v2776_v7 = vpop.f32.mrf.mxu0 }
0x1f9b   : > { %v2822_v50 = vpack.c.bf16 %v2776_v7, %v2776_v7 }
0x1f9c   : > { %v3886_v15 = vpop.f32.mrf.mxu0 }
0x1f9d   : > { %v2829_v52 = vsel %vm700_vm2, %v2822_v50, 0 }
0x1f9e   : > { %v2779_v54 = vpop.f32.mrf.mxu0  ;;  %3897 = vmatpush3.bf16.xpose.msra.mxu0 %v2829_v52 }
0x1f9f   : > { %3908 = vmatprep.subr.bf16.mxu0 %v4485_v0  ;;  %v3209_v54 = vpop.xlane.xlu0 %3208 }
0x1fa0   : > { %v3887_v55 = vpop.f32.mrf.mxu0  ;;  %v3210_v37 = vadd.f32 %v5168_v44, %v3209_v54 }
0x1fa5   : > { %3899 = vmatmul.mubr.msk.bf16.vlgmr.msra.gmra.mxu0 %vm700_vm2, %v2824_v34 }
0x1fa6   : > { %3909 = vmatpush3.bf16.msra.mxu0 %v5104_v19  ;;  %3912 = vmatprep.mubr.msk.bf16.mxu0 %vm4486_vm0, %v4485_v0 }
0x1fa7   : > { %3910 = vmatprep.subr.bf16.mxu0 %v4485_v0 }
0x1faa   : > { %3911 = vmatpush3.bf16.msra.mxu0 %v5114_v31 }
0x1fab   : > { %3924 = vmatprep.subr.bf16.mxu0 %v4485_v0 }
0x1fad   : > { %3913 = vmatmul.mubr.msk.bf16.vlgmr.msra.gmra.mxu0 %vm654_vm1, %v5226_v42 }
0x1fae   : > { %3925 = vmatpush3.bf16.msra.mxu0 %v5142_v47  ;;  %3928 = vmatprep.mubr.msk.bf16.mxu0 %vm4486_vm0, %v4485_v0 }
0x1faf   : > { %3926 = vmatprep.subr.bf16.mxu0 %v4485_v0 }
0x1fb2   : > { %3927 = vmatpush3.bf16.msra.mxu0 %v5145_v58 }
0x1fb3   : > { %3938 = vmatprep.subr.bf16.mxu0 %v4485_v0 }
0x1fb5   : > { %3929 = vmatmul.mubr.msk.bf16.vlgmr.msra.gmra.mxu0 %vm654_vm1, %v5226_v42 }
0x1fb6   : > { %3940 = vmatprep.mubr.msk.bf16.mxu0 %vm4486_vm0, %v4485_v0 }
0x2065   : > { %v2865_v19 = vpop.f32.mrf.mxu0 }
0x2066   : > { %v2871_v31 = vsel %vm871_vm5, %v2865_v19, -inf }
0x2067   : > { %2872 = vmax.xlane.f32.xlu1 %v2871_v31  ;;  %v3900_v47 = vpop.f32.mrf.mxu0 }
0x2069   : > { %v2868_v56 = vpop.f32.mrf.mxu0 }
0x206b   : > { %v3901_v59 = vpop.f32.mrf.mxu0 }
0x206d   : > { %v2963_v60 = vpop.f32.mrf.mxu0 }
0x206f   : > { %v3914_v62 = vpop.f32.mrf.mxu0 }
0x2071   : > { %v2966_v30 = vpop.f32.mrf.mxu0 }
0x2073   : > { %v3915_v25 = vpop.f32.mrf.mxu0 }
0x2075   : > { %v3044_v58 = vpop.f32.mrf.mxu0 }
0x2076   : > { %v3051_v63 = vpack.c.bf16 %v3044_v58, %v3044_v58 }
0x2077   : > { %v3930_v1 = vpop.f32.mrf.mxu0 }
0x2078   : > { %v3115_v3 = vsel %vm1260_vm3, %v3051_v63, 0 }
0x2079   : > { %v3047_v4 = vpop.f32.mrf.mxu0  ;;  %3939 = vmatpush3.bf16.msra.mxu0 %v3115_v3 }
0x207b   : > { %v3931_v11 = vpop.f32.mrf.mxu0 }
0x20f0   : > { %v2873_v9 = vpop.xlane.xlu1 %2872 }
0x20f1   : > { %v2874_v8 = vsub.f32 %v2865_v19, %v2873_v9 }
0x20f3   : > { %v2875_v17 = vmul.f32 1.442695, %v2874_v8 }
0x20f5   : > { %4141 = vpow2.f32 %v2875_v17 }
0x2102   : > { %v4142_v26 = vpop.eup %4141 }
0x2103   : > { %v2877_v23 = vsel %vm871_vm5, %v4142_v26, 0.0 }
0x2104   : > { %2878 = vadd.xlane.f32.xlu1 %v2877_v23 }
0x218d   : > { %v2879_v28 = vpop.xlane.xlu1 %2878 }
0x218e   : > { %4143 = vrcp.f32 %v2879_v28 }
0x219b   : > { %v4144_v21 = vpop.eup %4143 }
0x219c   : > { %v2881_v14 = vmul.f32 %v4144_v21, %v4142_v26 }
0x219e   : > { %v2882_v48 = vpack.c.bf16 %v2881_v14, %v2881_v14 }
0x21a0   : > { %3905 = vmatmul.mubr.msk.bf16.vlgmr.msra.gmra.mxu1 %vm871_vm5, %v2882_v48 }
0x21a1   : > { %3917 = vmatpush3.bf16.msra.mxu1 %v5112_v29  ;;  %3920 = vmatprep.mubr.msk.bf16.mxu1 %vm4486_vm0, %v4485_v0 }
0x21a2   : > { %3918 = vmatprep.subr.bf16.mxu1 %v4485_v0 }
0x21a5   : > { %3919 = vmatpush3.bf16.msra.mxu1 %v5101_v10  ;;  %v2969_v10 = vmul.f32 0.25, %v2963_v60 }
0x21a6   : > { %3932 = vmatprep.subr.bf16.mxu1 %v4485_v0 }
0x21a8   : > { %3921 = vmatmul.mubr.msk.bf16.vlgmr.msra.gmra.mxu1 %vm654_vm1, %v5226_v42  ;;  %v3052_v42 = vpack.c.bf16 %v2969_v10, %v2969_v10 }
0x21a9   : > { %3934 = vmatprep.mubr.msk.bf16.mxu1 %vm4486_vm0, %v4485_v0 }
0x2260   : > { %v5372_v2 = vpop.f32.mrf.mxu1 }
0x2262   : > { %v3906_v32 = vpop.f32.mrf.mxu1 }
0x2264   : > { %v2926_v33 = vpop.f32.mrf.mxu1 }
0x2266   : > { %v3907_v29 = vpop.f32.mrf.mxu1 }
0x2268   : > { %v3004_v35 = vpop.f32.mrf.mxu1 }
0x2269   : > { %v3050_v24 = vpack.c.bf16 %v3004_v35, %v3004_v35 }
0x226a   : > { %v3922_v43 = vpop.f32.mrf.mxu1 }
0x226b   : > { %v3057_v41 = vsel %vm700_vm2, %v3050_v24, 0 }
0x226c   : > { %v3007_v57 = vpop.f32.mrf.mxu1  ;;  %3933 = vmatpush3.bf16.xpose.msra.mxu1 %v3057_v41 }
0x226d   : > { %3944 = vmatprep.subr.bf16.mxu1 %v4485_v0 }
0x226e   : > { %v3923_v40 = vpop.f32.mrf.mxu1 }
0x2273   : > { %3935 = vmatmul.mubr.msk.bf16.vlgmr.msra.gmra.mxu1 %vm700_vm2, %v3052_v42 }
0x2274   : > { %3945 = vmatpush3.bf16.msra.mxu1 %v5187_v39  ;;  %3948 = vmatprep.mubr.msk.bf16.mxu1 %vm4486_vm0, %v4485_v0 }
0x2275   : > { %3946 = vmatprep.subr.bf16.mxu1 %v4485_v0  ;;  %v3212_v0 = vsel %vm654_vm1, %v3211_v22, 0.0 }
0x2278   : > { %3947 = vmatpush3.bf16.msra.mxu1 %v5197_v61 }
0x2333   : > { %v3093_v20 = vpop.f32.mrf.mxu1 }
0x2334   : > { %v3099_v45 = vsel %vm871_vm5, %v3093_v20, -inf }
0x2335   : > { %3100 = vmax.xlane.f32.xlu1 %v3099_v45  ;;  %v3936_v27 = vpop.f32.mrf.mxu1 }
0x2337   : > { %v3096_v46 = vpop.f32.mrf.mxu1 }
0x2339   : > { %v3937_v49 = vpop.f32.mrf.mxu1 }
0x23be   : > { %v3101_v13 = vpop.xlane.xlu1 %3100 }
0x23bf   : > { %v3102_v53 = vsub.f32 %v3093_v20, %v3101_v13 }
0x23c1   : > { %v3103_v6 = vmul.f32 1.442695, %v3102_v53 }
0x23c3   : > { %4145 = vpow2.f32 %v3103_v6 }
0x23d0   : > { %v4146_v16 = vpop.eup %4145 }
0x23d1   : > { %v3105_v39 = vsel %vm871_vm5, %v4146_v16, 0.0 }
0x23d2   : > { %3106 = vadd.xlane.f32.xlu1 %v3105_v39 }
0x23d6   : > { %3213 = vadd.xlane.f32.xlu1 %v3212_v0 }
0x245b   : > { %v3107_v61 = vpop.xlane.xlu1 %3106 }
0x245c   : > { %4147 = vrcp.f32 %v3107_v61 }
0x245f   : > { %v3214_v36 = vpop.xlane.xlu1 %3213 }
0x2460   : > { %v3215_v7 = vadd.f32 %v5168_v44, %v3214_v36 }
0x2462   : > { %3217 = vrot.lane.b32.xlu1 %v3215_v7, %s4497_s10 }
0x2469   : > { %v4148_v50 = vpop.eup %4147 }
0x246a   : > { %v3109_v15 = vmul.f32 %v4148_v50, %v4146_v16 }
0x246c   : > { %v3110_v52 = vpack.c.bf16 %v3109_v15, %v3109_v15 }
0x246e   : > { %3941 = vmatmul.mubr.msk.bf16.vlgmr.msra.gmra.mxu0 %vm871_vm5, %v3110_v52 }
0x24d4   : > { %v3218_v5 = vpop.permute.xlu1 %3217 }
0x24d5   : > { %v3220_v55 = vmax.f32 %v3210_v37, %v3218_v5 }
0x24d7   : > { %v3221_v34 = vsub.f32 %v3210_v37, %v3220_v55  ;;  %3225 = vrot.lane.b32.xlu1 %v3220_v55, %s4498_s28 }
0x24d9   : > { %v3222_v63 = vmul.f32 1.442695, %v3221_v34 }
0x252e   : > { %v3151_v19 = vpop.f32.mrf.mxu0 }
0x252f   : > { %3158 = vrot.lane.b32.xlu1 %v3151_v19, %s4499_s17 }
0x2530   : > { %v3942_v31 = vpop.f32.mrf.mxu0 }
0x2532   : > { %v3154_v47 = vpop.f32.mrf.mxu0 }
0x2534   : > { %v3943_v56 = vpop.f32.mrf.mxu0 }
0x2549   : > { %v3226_v59 = vpop.permute.xlu1 %3225 }
0x254a   : > { %v3228_v60 = vsub.f32 %v3215_v7, %v3226_v59 }
0x254c   : > { %v3229_v62 = vmul.f32 1.442695, %v3228_v60 }
0x254e   : > { %4149 = vpow2.f32 %v3229_v62 }
0x254f   : > { %4151 = vpow2.f32 %v3222_v63 }
0x255b   : > { %v4150_v30 = vpop.eup %4149 }
0x255c   : > { %3232 = vrot.lane.b32.xlu1 %v4150_v30, %s4497_s10  ;;  %v4152_v1 = vpop.eup %4151 }
0x25a1   : > { %v3159_v25 = vpop.permute.xlu1 %3158 }
0x25a2   : > { %v3161_v44 = vsel %vm700_vm2, %v5372_v2, %v3159_v25 }
0x25a3   : > { %v3162_v58 = vpack.c.bf16 %v3161_v44, %v3161_v44 }
0x25a5   : > { %3949 = vmatmul.mubr.msk.bf16.vlgmr.msra.gmra.mxu1 %vm654_vm1, %v3162_v58 }
0x25ce   : > { %v3233_v3 = vpop.permute.xlu1 %3232 }
0x25cf   : > { %v3235_v4 = vadd.f32 %v4152_v1, %v3233_v3 }
0x25d1   : > { %4153 = vrcp.f32 %v3235_v4 }
0x25de   : > { %v4154_v11 = vpop.eup %4153 }
0x25df   : > { %3247 = vrot.lane.b32.xlu0 %v4154_v11, %s4498_s28  ;;  %v3238_v9 = vmul.f32 %v4154_v11, %v4152_v1  ;;  %s5504_s28 = sld [smem:[#allocation35_spill]] }
0x25e1   : > { %3241 = vperm.xlu1 %4100, %v3238_v9  }
0x25e5   : > { %4101 = vset.pattern.permute.xlu1 %v4501_v38  ;;  %s3271_s5 = scalar_lea.hbm %s5504_s28, %s3500_s4 }
0x2651   : > { %v3248_v8 = vpop.permute.xlu0 %3247 }
0x2652   : > { %v3250_v17 = vmul.f32 %v4150_v30, %v3248_v8 }
0x2654   : > { %3253 = vperm.xlu1 %4101, %v3250_v17  }
0x265c   : > { %v3242_v14 = vpop.permute.xlu1 %3241 }
0x265d   : > { %v3244_v48 = vmul.f32 %v3242_v14, %v5335_v12 }
0x265f   : > { %v3245_v38 = vadd.f32 %v3244_v48, %v5222_v18 }
0x2665   : > { %v3200_v26 = vpop.f32.mrf.mxu1 }
0x2666   : > { %v3201_v2 = vadd.f32 %v5216_v51, %v3200_v26 }
0x2667   : > { %v3950_v23 = vpop.f32.mrf.mxu1 }
0x2669   : > { %v3203_v28 = vpop.f32.mrf.mxu1 }
0x266b   : > { %v3951_v21 = vpop.f32.mrf.mxu1 }
0x26cf   : > { %v3254_v32 = vpop.permute.xlu1 %3253 }
0x26d0   : > { %v3256_v33 = vmul.f32 %v3254_v32, %v3201_v2 }
0x26d2   : > { %v3257_v29 = vadd.f32 %v3256_v33, %v3245_v38 }
0x26d4   : > { %3258 = vst.msk [vmem:[%s642_s26] sm:$0xff] %vm654_vm1, %v3257_v29 }
0x26d5   : > { %4405 = shalt.err (!%p4402_p13)
}
0x26d6   : > { %s4406_s17 = scalar_lea.hbm %s3271_s5, 128  ;;  %s4410_s25 = scalar_lea.hbm %s5504_s28, 256 }
0x26d7   : > { %p4407_p0 = scmp.ne.s32.totalorder %s3271_s5, %s4406_s17  ;;  %p4411_p5 = scmp.lt.s32.totalorder %s3271_s5, %s5504_s28 }
0x26d8   : > { %p4412_p8 = scmp.lt.s32.totalorder %s4410_s25, %s4406_s17 }
0x26d9   : > { %p4408_p7 = pnand %p4407_p0, %p5505_p11 }
0x26da   : > { %p4413_p9 = por %p4412_p8, %p4411_p5 }
0x26db   : > { %p4409_p2 = pneg %p4408_p7 }
0x26dd   : > { %p4414_p10 = pnand %p4413_p9, %p4409_p2 }
0x26df   : > { %4417 = shalt.err (!%p4414_p10)
}
0x26e0   : > { %3986 = dma.vmem_to_hbm [thread:$0]  (%p5505_p11), %s3274_s30, 128, %s3271_s5, %s3260_s19  }
0x26e1 PF: > { %s3285_s26 = sand.u32 1, %s4460_s21   ;;  %p5506_p1 = scmp.ne.s32.totalorder %s5490_s16, 0 }
0x26e2   : > { %p5507_p3 = scmp.ge.s32.totalorder %s4472_s24, 2  ;;  %s3286_s8 = scalar_lea.sflag [#allocation4], %s3285_s26 }
0x26e4   : > { %p4018_p4 = pnand %p5507_p3, %p5506_p1 }
0x26e6   : > { %p4019_p6 = pneg %p4018_p4 }
0x26e8   : > { %4455 = dma.done.wait (%p4019_p6), %s3286_s8, 128  }
0x26e9   : > { %4457 = vsyncadd (%p4019_p6), %s3286_s8, 4294967168  ;;  %s5508_s10 = sld [smem:[#allocation24_spill]]  ;;  %p33_p12 = scmp.ge.s32.totalorder %s4707_s0, 4  }
0x26ea   : > { %s5509_s21 = smov %s4464_s22  ;;  %s5510_s22 = smov %s4468_s23 }
0x26eb   : > { %s5512_s24 = smov %s4707_s0  ;;  %35 = sbr.rel (!%p33_p12) target bundleno = 21 (0x15), region = 161 }
0x26ef   : > { %s5511_s23 = smov %s5508_s10 }
0x26f0   :  { %3291 = vsyncpa [#allocation3], 1 }
0x26f1   :  { %3293 = vsyncpa [#allocation3 + $0x1], 1 }
0x26f2   :  { %3294 = vsyncpa [#allocation6], 1 }
0x26f3   :  { %3295 = vsyncpa [#allocation9], 1 }
0x26f4   :  { %3296 = vsyncpa [#allocation12], 1 }
0x26f5   :  { %3297 = vsyncpa [#allocation15], 1 }
0x26f6   :  { %3298 = vsyncpa [#allocation4], 1 }
0x26f7   :  { %3300 = vsyncpa [#allocation4 + $0x1], 1 }

</bundles_post_ra>
